<compile_context>
chip_gen: v7x
topology: tpu7x:2x2x1
jax: 0.10.0
libtpu: 0.0.40
codegen_flags: <defaults>
</compile_context>

<pallas_src>
import math

import jax
import jax.numpy as jnp
from jax import lax
from jax.experimental import pallas as pl
from jax.experimental.pallas import tpu as pltpu

SEQ = 128     # tokens (== Conv1d in_channels)
VD = 8 * 6    # video feature dim = 48
AD = 2        # audio feature dim
VAD = VD + AD # concatenated video|audio feature dim = 50
DM = 256      # model dim (== Conv1d length)
CO = 64       # conv out channels
PLEN = 128    # pooled length (256 / 2)
OUT = 256     # final output dim
BB_MAX = 8    # max batch elements per grid step


def attn_conv_pool_kernel(x_ref, pe_ref, wqkv_ref, bqkv_ref, wf_ref, bf_ref,
                          wc_ref, bc_ref, sel_ref, out_ref, qkv_scr):
    f32, bf16 = jnp.float32, jnp.bfloat16
    bb = x_ref.shape[0] // SEQ          # static (from block shape)

    # positional encodings: single (SEQ, 50) block broadcast over the bb batch
    # elements stacked on the sublane/M axis (no host-side tiling).
    pe = pe_ref[...]
    if bb > 1:
        pe = jnp.concatenate([pe] * bb, axis=0)
    x = (x_ref[...] + pe).astype(bf16)                                   # (bb*128, 50)

    # fused q|k|v projection: one bf16 MXU matmul, f32 accumulation.
    # wqkv rows 0:48 = video -> k|v columns, rows 48:50 = audio -> q columns.
    qkv = jnp.dot(x, wqkv_ref[...], preferred_element_type=f32) + bqkv_ref[...]
    qkv_scr[...] = qkv.astype(bf16)                                      # (bb*128, 768)

    def body(b, carry):
        off = pl.multiple_of(b * SEQ, SEQ)
        q = qkv_scr[pl.ds(off, SEQ), 0:DM]                               # (128, 256) bf16
        k = qkv_scr[pl.ds(off, SEQ), DM:2 * DM]
        v = qkv_scr[pl.ds(off, SEQ), 2 * DM:3 * DM]

        # scaled dot-product attention, softmax in f32
        scores = lax.dot_general(q, k, (((1,), (1,)), ((), ())),
                                 preferred_element_type=f32) * (1.0 / 16.0)
        scores = scores - jnp.max(scores, axis=-1, keepdims=True)
        e = jnp.exp(scores)
        p = e * pl.reciprocal(jnp.sum(e, axis=-1, keepdims=True), approx=False)
        att = jnp.dot(p.astype(bf16), v, preferred_element_type=f32)     # (128, 256)

        # final_linear
        t = jnp.dot(att.astype(bf16), wf_ref[...],
                    preferred_element_type=f32) + bf_ref[...]
        tb = t.astype(bf16)                                              # (Cin=128, L=256)

        # Conv1d(128->64, k=3, stride=1, pad=1): three K=128 matmuls on tb,
        # tap shifts applied to the f32 outputs with XLU rolls + zero masks.
        a_m1 = jnp.dot(wc_ref[0:CO, :], tb, preferred_element_type=f32)       # tap l-1
        a_0 = jnp.dot(wc_ref[CO:2 * CO, :], tb, preferred_element_type=f32)   # tap l
        a_p1 = jnp.dot(wc_ref[2 * CO:3 * CO, :], tb, preferred_element_type=f32)  # tap l+1
        col = lax.broadcasted_iota(jnp.int32, (CO, DM), 1)
        y = a_0 + bc_ref[...]
        y = y + jnp.where(col == 0, 0.0, pltpu.roll(a_m1, 1, axis=1))
        y = y + jnp.where(col == DM - 1, 0.0, pltpu.roll(a_p1, DM - 1, axis=1))
        y = jnp.maximum(y, 0.0)                                          # ReLU, (64, 256)

        # MaxPool1d(2): pairwise max via roll(-1), then ONE even-column
        # selector matmul.  The wrapped column 255 (= y[:, 0]) is never
        # selected by the even-column selector, so no extra mask is needed.
        ymax = jnp.maximum(y, pltpu.roll(y, DM - 1, axis=1))
        pooled = jnp.dot(ymax.astype(bf16), sel_ref[...],
                         preferred_element_type=f32)                     # (64, 128)
        out_ref[b] = pooled.astype(out_ref.dtype)
        return carry

    lax.fori_loop(0, bb, body, 0, unroll=(bb <= 2))


def fc_kernel(p_ref, w_ref, b_ref, o_ref):
    acc = jnp.dot(p_ref[...], w_ref[...], preferred_element_type=jnp.float32)
    o_ref[...] = jnp.maximum(acc + b_ref[...], 0.0)


def _full(shape):
    n = len(shape)
    return pl.BlockSpec(shape, lambda i: (0,) * n)


def improved_cross_attention(video, audio, params):
    f32, bf16 = jnp.float32, jnp.bfloat16
    B = video.shape[0]

    # batch elements per grid step: amortize per-step overhead, but keep
    # >= 2 grid steps so v7x's two TensorCores both get work.
    bb = max(1, min(BB_MAX, B // 2))
    b_pad = ((B + bb - 1) // bb) * bb

    video = video.reshape(B, SEQ, VD).astype(f32)
    audio = audio.reshape(B, SEQ, AD).astype(f32)
    x = jnp.concatenate([video, audio], axis=-1)                          # (B, 128, 50)
    if b_pad != B:
        x = jnp.pad(x, ((0, b_pad - B), (0, 0), (0, 0)))
    x = x.reshape(b_pad * SEQ, VAD)

    # packed / pre-transposed parameters: matmul weights bf16, biases & pe f32
    pe = jnp.concatenate([params["pe_video"].reshape(SEQ, VD),
                          params["pe_audio"]], axis=-1).astype(f32)       # (128, 50)
    wqkv = jnp.concatenate([
        jnp.concatenate([jnp.zeros((VD, DM), f32), params["wk"].T, params["wv"].T], axis=1),
        jnp.concatenate([params["wq"].T, jnp.zeros((AD, 2 * DM), f32)], axis=1),
    ], axis=0).astype(bf16)                                               # (50, 768) = [q|k|v]
    bqkv = jnp.concatenate([params["bq"], params["bk"], params["bv"]]
                           ).reshape(1, 3 * DM).astype(f32)
    wf = params["wf"].T.astype(bf16)                                      # (256, 256)
    bf_ = params["bf"].reshape(1, DM).astype(f32)
    wc = jnp.transpose(params["wconv"], (2, 0, 1)).reshape(3 * CO, SEQ).astype(bf16)  # (192, 128)
    bc = params["bconv"].reshape(CO, 1).astype(f32)
    lidx = jnp.arange(DM)[:, None]
    l2idx = jnp.arange(PLEN)[None, :]
    sel_e = (lidx == 2 * l2idx).astype(bf16)                              # (256, 128)
    wfc = params["wfc"].T.astype(bf16)                                    # (8192, 256), row = co*128+l2
    bfc = params["bfc"].reshape(1, OUT).astype(f32)

    in_specs = [
        pl.BlockSpec((bb * SEQ, VAD), lambda i: (i, 0)),   # [video|audio] block
        _full((SEQ, VAD)),                                 # positional encodings (single copy)
        _full((VAD, 3 * DM)), _full((1, 3 * DM)),          # fused q|k|v projection
        _full((DM, DM)), _full((1, DM)),                   # final_linear
        _full((3 * CO, SEQ)), _full((CO, 1)),              # conv taps (l-1, l, l+1)
        _full((DM, PLEN)),                                 # maxpool even-column selector
    ]

    pooled = pl.pallas_call(
        attn_conv_pool_kernel,
        out_shape=jax.ShapeDtypeStruct((b_pad, CO, PLEN), bf16),
        grid_spec=pltpu.PrefetchScalarGridSpec(
            num_scalar_prefetch=0,
            grid=(b_pad // bb,),
            in_specs=in_specs,
            out_specs=pl.BlockSpec((bb, CO, PLEN), lambda i: (i, 0, 0)),
            scratch_shapes=[pltpu.VMEM((bb * SEQ, 3 * DM), bf16)],
        ),
        compiler_params=pltpu.CompilerParams(
            dimension_semantics=("parallel",),
            vmem_limit_bytes=32 * 1024 * 1024,
        ),
    )(x, pe, wqkv, bqkv, wf, bf_, wc, bc, sel_e)

    # fc(64*128 -> 256): batch-tiled bf16 matmul (weight block resident).
    # Flatten to co*128+l2 order is contiguous in HBM (cheap XLA reshape).
    p_flat = pooled.reshape(b_pad, CO * PLEN)
    tb_fc = min(256, b_pad)
    b_fc = ((b_pad + tb_fc - 1) // tb_fc) * tb_fc
    if b_fc != b_pad:
        p_flat = jnp.pad(p_flat, ((0, b_fc - b_pad), (0, 0)))

    out = pl.pallas_call(
        fc_kernel,
        out_shape=jax.ShapeDtypeStruct((b_fc, OUT), jnp.float32),
        grid_spec=pltpu.PrefetchScalarGridSpec(
            num_scalar_prefetch=0,
            grid=(b_fc // tb_fc,),
            in_specs=[pl.BlockSpec((tb_fc, CO * PLEN), lambda i: (i, 0)),
                      _full((CO * PLEN, OUT)),
                      _full((1, OUT))],
            out_specs=pl.BlockSpec((tb_fc, OUT), lambda i: (i, 0)),
        ),
        compiler_params=pltpu.CompilerParams(
            dimension_semantics=("parallel",),
            vmem_limit_bytes=32 * 1024 * 1024,
        ),
    )(p_flat, wfc, bfc)
    return out[:B]


def init_params(key):
    ks = jax.random.split(key, 14)

    def lin(kw, kb, out_f, in_f):
        bound = 1.0 / math.sqrt(in_f)
        w = jax.random.uniform(kw, (out_f, in_f), jnp.float32, -bound, bound)
        b = jax.random.uniform(kb, (out_f,), jnp.float32, -bound, bound)
        return w, b

    p = {}
    p["pe_video"] = jax.random.normal(ks[0], (SEQ, 8, 6), jnp.float32)
    p["pe_audio"] = jax.random.normal(ks[1], (SEQ, AD), jnp.float32)
    p["wq"], p["bq"] = lin(ks[2], ks[3], DM, AD)
    p["wk"], p["bk"] = lin(ks[4], ks[5], DM, VD)
    p["wv"], p["bv"] = lin(ks[6], ks[7], DM, VD)
    p["wf"], p["bf"] = lin(ks[8], ks[9], DM, DM)
    bound = 1.0 / math.sqrt(SEQ * 3)
    p["wconv"] = jax.random.uniform(ks[10], (CO, SEQ, 3), jnp.float32, -bound, bound)
    p["bconv"] = jax.random.uniform(ks[11], (CO,), jnp.float32, -bound, bound)
    p["wfc"], p["bfc"] = lin(ks[12], ks[13], OUT, CO * PLEN)
    return p


def reference(video, audio, p):
    """Pure-JAX f32 reference mirroring the PyTorch forward."""
    B = video.shape[0]
    v = video.reshape(B, SEQ, VD) + p["pe_video"].reshape(1, SEQ, VD)
    a = audio.reshape(B, SEQ, AD) + p["pe_audio"][None]
    q = jnp.einsum("bsd,od->bso", a, p["wq"]) + p["bq"]
    k = jnp.einsum("bsd,od->bso", v, p["wk"]) + p["bk"]
    val = jnp.einsum("bsd,od->bso", v, p["wv"]) + p["bv"]
    scores = jnp.einsum("bqo,bko->bqk", q, k) / jnp.sqrt(256.0)
    attn = jax.nn.softmax(scores, axis=-1)
    att = jnp.einsum("bqk,bko->bqo", attn, val)
    t = jnp.einsum("bso,po->bsp", att, p["wf"]) + p["bf"]          # (B, 128, 256)
    y = lax.conv_general_dilated(t, p["wconv"], window_strides=(1,),
                                 padding=((1, 1),),
                                 dimension_numbers=("NCH", "OIH", "NCH"))
    y = jax.nn.relu(y + p["bconv"][None, :, None])                 # (B, 64, 256)
    pooled = jnp.max(y.reshape(B, CO, PLEN, 2), axis=-1)           # (B, 64, 128)
    flat = pooled.reshape(B, CO * PLEN)
    return jax.nn.relu(flat @ p["wfc"].T + p["bfc"])


if __name__ == "__main__":
    key = jax.random.PRNGKey(0)
    kp, kvid, kaud = jax.random.split(key, 3)
    params = init_params(kp)

    # B=7 exercises bb=3 (rolled in-kernel fori_loop, padded batch, 3 grid steps);
    # B=2 exercises bb=1 (unrolled path, 2 parallel grid steps).
    for B in (7, 2):
        video = jax.random.normal(jax.random.fold_in(kvid, B), (B, SEQ, 8, 6), jnp.float32)
        audio = jax.random.normal(jax.random.fold_in(kaud, B), (B, SEQ, AD), jnp.float32)

        out = improved_cross_attention(video, audio, params)
        out = jax.block_until_ready(out)
        assert out.shape == (B, OUT), out.shape

        ref = reference(video, audio, params)
        max_err = float(jnp.max(jnp.abs(out - ref)))
        if not jnp.allclose(out, ref, rtol=5e-2, atol=5e-2):
            raise AssertionError(f"B={B}: kernel/reference mismatch, max abs err = {max_err}")

    print("KERNEL_OK")
</pallas_src>

<mosaic_0001>
module attributes {stable_mosaic.version = 11 : i64} {
  func.func @attn_conv_pool_kernel(%arg0: i32, %arg1: memref<384x50xf32, #tpu.memory_space<vmem>>, %arg2: memref<128x50xf32, #tpu.memory_space<vmem>>, %arg3: memref<50x768xbf16, #tpu.memory_space<vmem>>, %arg4: memref<1x768xf32, #tpu.memory_space<vmem>>, %arg5: memref<256x256xbf16, #tpu.memory_space<vmem>>, %arg6: memref<1x256xf32, #tpu.memory_space<vmem>>, %arg7: memref<192x128xbf16, #tpu.memory_space<vmem>>, %arg8: memref<64x1xf32, #tpu.memory_space<vmem>>, %arg9: memref<256x128xbf16, #tpu.memory_space<vmem>>, %arg10: memref<3x64x128xbf16, #tpu.memory_space<vmem>>, %arg11: memref<384x768xbf16, #tpu.memory_space<vmem>>) attributes {dimension_semantics = [#tpu.dimension_semantics<parallel>], iteration_bounds = array<i64: 3>, scalar_prefetch = 0 : i64, scratch_operands = 1 : i64, tpu.core_type = #tpu.core_type<tc>, window_params = [{transform_indices = @transform_0, window_bounds = array<i64: 384, 50>}, {pipeline_mode = #tpu.pipeline_mode<synchronous>, transform_indices = @transform_1, window_bounds = array<i64: 128, 50>}, {pipeline_mode = #tpu.pipeline_mode<synchronous>, transform_indices = @transform_2, window_bounds = array<i64: 50, 768>}, {pipeline_mode = #tpu.pipeline_mode<synchronous>, transform_indices = @transform_3, window_bounds = array<i64: 1, 768>}, {pipeline_mode = #tpu.pipeline_mode<synchronous>, transform_indices = @transform_4, window_bounds = array<i64: 256, 256>}, {pipeline_mode = #tpu.pipeline_mode<synchronous>, transform_indices = @transform_5, window_bounds = array<i64: 1, 256>}, {pipeline_mode = #tpu.pipeline_mode<synchronous>, transform_indices = @transform_6, window_bounds = array<i64: 192, 128>}, {pipeline_mode = #tpu.pipeline_mode<synchronous>, transform_indices = @transform_7, window_bounds = array<i64: 64, 1>}, {pipeline_mode = #tpu.pipeline_mode<synchronous>, transform_indices = @transform_8, window_bounds = array<i64: 256, 128>}, {transform_indices = @transform_9, window_bounds = array<i64: 3, 64, 128>}]} {
    %c0 = arith.constant 0 : index
    %c0_0 = arith.constant 0 : index
    %0 = vector.load %arg2[%c0, %c0_0] : memref<128x50xf32, #tpu.memory_space<vmem>>, vector<128x50xf32>
    %1 = tpu.concatenate %0, %0, %0 in 0 : vector<128x50xf32>, vector<128x50xf32>, vector<128x50xf32> -> vector<384x50xf32>
    %c0_1 = arith.constant 0 : index
    %c0_2 = arith.constant 0 : index
    %2 = vector.load %arg1[%c0_1, %c0_2] : memref<384x50xf32, #tpu.memory_space<vmem>>, vector<384x50xf32>
    %3 = arith.addf %2, %1 : vector<384x50xf32>
    %4 = arith.truncf %3 : vector<384x50xf32> to vector<384x50xbf16>
    %c0_3 = arith.constant 0 : index
    %c0_4 = arith.constant 0 : index
    %5 = vector.load %arg3[%c0_3, %c0_4] : memref<50x768xbf16, #tpu.memory_space<vmem>>, vector<50x768xbf16>
    %cst = arith.constant dense<0.000000e+00> : vector<384x768xf32>
    %6 = tpu.matmul %4, %5, %cst {dimension_numbers = #tpu.dot_dimension_numbers<[1], [0], [0], [1], [0, 0, 1, 1], [], []>} : vector<384x50xbf16>, vector<50x768xbf16>, vector<384x768xf32> -> vector<384x768xf32>
    %c0_5 = arith.constant 0 : index
    %c0_6 = arith.constant 0 : index
    %7 = vector.load %arg4[%c0_5, %c0_6] : memref<1x768xf32, #tpu.memory_space<vmem>>, vector<1x768xf32>
    %8 = vector.broadcast %7 : vector<1x768xf32> to vector<384x768xf32>
    %9 = arith.addf %6, %8 : vector<384x768xf32>
    %10 = arith.truncf %9 : vector<384x768xf32> to vector<384x768xbf16>
    %c0_7 = arith.constant 0 : index
    %c0_8 = arith.constant 0 : index
    %11 = vector.load %arg11[%c0_7, %c0_8] : memref<384x768xbf16, #tpu.memory_space<vmem>>, vector<384x768xbf16>
    tpu.vector_store %arg11[%c0_7, %c0_8], %10 {strides = array<i32>} : memref<384x768xbf16, #tpu.memory_space<vmem>>, vector<384x768xbf16>,
    %c0_i32 = arith.constant 0 : i32
    %c3_i32 = arith.constant 3 : i32
    %12 = arith.addi %c0_i32, %c3_i32 : i32
    %c1_i32 = arith.constant 1 : i32
    scf.for %arg12 = %c0_i32 to %12 step %c1_i32  : i32 {
      %c128_i32 = arith.constant 128 : i32
      %13 = arith.muli %arg12, %c128_i32 : i32
      %14 = tpu.assume_multiple %13, 128 : i32
      %15 = arith.index_cast %14 : i32 to index
      %c0_10 = arith.constant 0 : index
      %16 = vector.load %arg11[%15, %c0_10] : memref<384x768xbf16, #tpu.memory_space<vmem>>, vector<128x256xbf16>
      %17 = arith.index_cast %14 : i32 to index
      %c256 = arith.constant 256 : index
      %18 = vector.load %arg11[%17, %c256] : memref<384x768xbf16, #tpu.memory_space<vmem>>, vector<128x256xbf16>
      %19 = arith.index_cast %14 : i32 to index
      %c512 = arith.constant 512 : index
      %20 = vector.load %arg11[%19, %c512] : memref<384x768xbf16, #tpu.memory_space<vmem>>, vector<128x256xbf16>
      %cst_11 = arith.constant dense<0.000000e+00> : vector<128x128xf32>
      %21 = tpu.matmul %16, %18, %cst_11 {dimension_numbers = #tpu.dot_dimension_numbers<[1], [1], [0], [0], [0, 0, 1, 0], [], []>} : vector<128x256xbf16>, vector<128x256xbf16>, vector<128x128xf32> -> vector<128x128xf32>
      %cst_12 = arith.constant 6.250000e-02 : f32
      %22 = vector.broadcast %cst_12 : f32 to vector<128x128xf32>
      %23 = arith.mulf %21, %22 : vector<128x128xf32>
      %cst_13 = arith.constant dense<0xFF800000> : vector<128xf32>
      %24 = vector.multi_reduction <maximumf>, %23, %cst_13 [1] : vector<128x128xf32> to vector<128xf32>
      %25 = vector.shape_cast %24 : vector<128xf32> to vector<128x1xf32>
      %26 = vector.broadcast %25 : vector<128x1xf32> to vector<128x128xf32>
      %27 = arith.subf %23, %26 : vector<128x128xf32>
      %28 = math.exp %27 : vector<128x128xf32>
      %cst_14 = arith.constant dense<0.000000e+00> : vector<128xf32>
      %29 = vector.multi_reduction <add>, %28, %cst_14 [1] : vector<128x128xf32> to vector<128xf32>
      %30 = vector.shape_cast %29 : vector<128xf32> to vector<128x1xf32>
      %31 = tpu.reciprocal %30 : vector<128x1xf32> -> vector<128x1xf32>
      %32 = vector.broadcast %31 : vector<128x1xf32> to vector<128x128xf32>
      %33 = arith.mulf %28, %32 : vector<128x128xf32>
      %34 = arith.truncf %33 : vector<128x128xf32> to vector<128x128xbf16>
      %cst_15 = arith.constant dense<0.000000e+00> : vector<128x256xf32>
      %35 = tpu.matmul %34, %20, %cst_15 {dimension_numbers = #tpu.dot_dimension_numbers<[1], [0], [0], [1], [0, 0, 1, 1], [], []>} : vector<128x128xbf16>, vector<128x256xbf16>, vector<128x256xf32> -> vector<128x256xf32>
      %36 = arith.truncf %35 : vector<128x256xf32> to vector<128x256xbf16>
      %c0_16 = arith.constant 0 : index
      %c0_17 = arith.constant 0 : index
      %37 = vector.load %arg5[%c0_16, %c0_17] : memref<256x256xbf16, #tpu.memory_space<vmem>>, vector<256x256xbf16>
      %cst_18 = arith.constant dense<0.000000e+00> : vector<128x256xf32>
      %38 = tpu.matmul %36, %37, %cst_18 {dimension_numbers = #tpu.dot_dimension_numbers<[1], [0], [0], [1], [0, 0, 1, 1], [], []>} : vector<128x256xbf16>, vector<256x256xbf16>, vector<128x256xf32> -> vector<128x256xf32>
      %c0_19 = arith.constant 0 : index
      %c0_20 = arith.constant 0 : index
      %39 = vector.load %arg6[%c0_19, %c0_20] : memref<1x256xf32, #tpu.memory_space<vmem>>, vector<1x256xf32>
      %40 = vector.broadcast %39 : vector<1x256xf32> to vector<128x256xf32>
      %41 = arith.addf %38, %40 : vector<128x256xf32>
      %42 = arith.truncf %41 : vector<128x256xf32> to vector<128x256xbf16>
      %c0_21 = arith.constant 0 : index
      %c0_22 = arith.constant 0 : index
      %43 = vector.load %arg7[%c0_21, %c0_22] : memref<192x128xbf16, #tpu.memory_space<vmem>>, vector<64x128xbf16>
      %cst_23 = arith.constant dense<0.000000e+00> : vector<64x256xf32>
      %44 = tpu.matmul %43, %42, %cst_23 {dimension_numbers = #tpu.dot_dimension_numbers<[1], [0], [0], [1], [0, 0, 1, 1], [], []>} : vector<64x128xbf16>, vector<128x256xbf16>, vector<64x256xf32> -> vector<64x256xf32>
      %c64 = arith.constant 64 : index
      %c0_24 = arith.constant 0 : index
      %45 = vector.load %arg7[%c64, %c0_24] : memref<192x128xbf16, #tpu.memory_space<vmem>>, vector<64x128xbf16>
      %cst_25 = arith.constant dense<0.000000e+00> : vector<64x256xf32>
      %46 = tpu.matmul %45, %42, %cst_25 {dimension_numbers = #tpu.dot_dimension_numbers<[1], [0], [0], [1], [0, 0, 1, 1], [], []>} : vector<64x128xbf16>, vector<128x256xbf16>, vector<64x256xf32> -> vector<64x256xf32>
      %c128 = arith.constant 128 : index
      %c0_26 = arith.constant 0 : index
      %47 = vector.load %arg7[%c128, %c0_26] : memref<192x128xbf16, #tpu.memory_space<vmem>>, vector<64x128xbf16>
      %cst_27 = arith.constant dense<0.000000e+00> : vector<64x256xf32>
      %48 = tpu.matmul %47, %42, %cst_27 {dimension_numbers = #tpu.dot_dimension_numbers<[1], [0], [0], [1], [0, 0, 1, 1], [], []>} : vector<64x128xbf16>, vector<128x256xbf16>, vector<64x256xf32> -> vector<64x256xf32>
      %49 = tpu.iota {dimensions = array<i32: 1>} : vector<64x256xi32>
      %c0_28 = arith.constant 0 : index
      %c0_29 = arith.constant 0 : index
      %50 = vector.load %arg8[%c0_28, %c0_29] : memref<64x1xf32, #tpu.memory_space<vmem>>, vector<64x1xf32>
      %51 = vector.broadcast %50 : vector<64x1xf32> to vector<64x256xf32>
      %52 = arith.addf %46, %51 : vector<64x256xf32>
      %c0_i32_30 = arith.constant 0 : i32
      %53 = vector.broadcast %c0_i32_30 : i32 to vector<64x256xi32>
      %54 = arith.cmpi eq, %49, %53 : vector<64x256xi32>
      %c1_i32_31 = arith.constant 1 : i32
      %55 = tpu.dynamic_rotate %44 by %c1_i32_31 dim 1 : vector<64x256xf32>, i32 -> vector<64x256xf32>
      %cst_32 = arith.constant 0.000000e+00 : f32
      %56 = vector.broadcast %cst_32 : f32 to vector<64x256xf32>
      %57 = arith.select %54, %56, %55 : vector<64x256xi1>, vector<64x256xf32>
      %58 = arith.addf %52, %57 : vector<64x256xf32>
      %c255_i32 = arith.constant 255 : i32
      %59 = vector.broadcast %c255_i32 : i32 to vector<64x256xi32>
      %60 = arith.cmpi eq, %49, %59 : vector<64x256xi32>
      %c255_i32_33 = arith.constant 255 : i32
      %61 = tpu.dynamic_rotate %48 by %c255_i32_33 dim 1 : vector<64x256xf32>, i32 -> vector<64x256xf32>
      %cst_34 = arith.constant 0.000000e+00 : f32
      %62 = vector.broadcast %cst_34 : f32 to vector<64x256xf32>
      %63 = arith.select %60, %62, %61 : vector<64x256xi1>, vector<64x256xf32>
      %64 = arith.addf %58, %63 : vector<64x256xf32>
      %cst_35 = arith.constant 0.000000e+00 : f32
      %65 = vector.broadcast %cst_35 : f32 to vector<64x256xf32>
      %66 = arith.maximumf %64, %65 : vector<64x256xf32>
      %c255_i32_36 = arith.constant 255 : i32
      %67 = tpu.dynamic_rotate %66 by %c255_i32_36 dim 1 : vector<64x256xf32>, i32 -> vector<64x256xf32>
      %68 = arith.maximumf %66, %67 : vector<64x256xf32>
      %69 = arith.truncf %68 : vector<64x256xf32> to vector<64x256xbf16>
      %c0_37 = arith.constant 0 : index
      %c0_38 = arith.constant 0 : index
      %70 = vector.load %arg9[%c0_37, %c0_38] : memref<256x128xbf16, #tpu.memory_space<vmem>>, vector<256x128xbf16>
      %cst_39 = arith.constant dense<0.000000e+00> : vector<64x128xf32>
      %71 = tpu.matmul %69, %70, %cst_39 {dimension_numbers = #tpu.dot_dimension_numbers<[1], [0], [0], [1], [0, 0, 1, 1], [], []>} : vector<64x256xbf16>, vector<256x128xbf16>, vector<64x128xf32> -> vector<64x128xf32>
      %72 = arith.truncf %71 : vector<64x128xf32> to vector<64x128xbf16>
      %73 = arith.index_cast %arg12 : i32 to index
      %c0_40 = arith.constant 0 : index
      %c0_41 = arith.constant 0 : index
      %74 = vector.load %arg10[%73, %c0_40, %c0_41] : memref<3x64x128xbf16, #tpu.memory_space<vmem>>, vector<1x64x128xbf16>
      %75 = vector.shape_cast %74 : vector<1x64x128xbf16> to vector<64x128xbf16>
      %76 = vector.shape_cast %72 : vector<64x128xbf16> to vector<1x64x128xbf16>
      tpu.vector_store %arg10[%73, %c0_40, %c0_41], %76 {strides = array<i32>} : memref<3x64x128xbf16, #tpu.memory_space<vmem>>, vector<1x64x128xbf16>,
    }
    %c3_i32_9 = arith.constant 3 : i32
    return
  }
  func.func @transform_0(%arg0: i32) -> (i32, i32) {
    %c0_i32 = arith.constant 0 : i32
    %c0_i32_0 = arith.constant 0 : i32
    return %arg0, %c0_i32 : i32, i32
  }
  func.func @transform_1(%arg0: i32) -> (i32, i32) {
    %c0_i32 = arith.constant 0 : i32
    %c0_i32_0 = arith.constant 0 : i32
    %c0_i32_1 = arith.constant 0 : i32
    return %c0_i32, %c0_i32_0 : i32, i32
  }
  func.func @transform_2(%arg0: i32) -> (i32, i32) {
    %c0_i32 = arith.constant 0 : i32
    %c0_i32_0 = arith.constant 0 : i32
    %c0_i32_1 = arith.constant 0 : i32
    return %c0_i32, %c0_i32_0 : i32, i32
  }
  func.func @transform_3(%arg0: i32) -> (i32, i32) {
    %c0_i32 = arith.constant 0 : i32
    %c0_i32_0 = arith.constant 0 : i32
    %c0_i32_1 = arith.constant 0 : i32
    return %c0_i32, %c0_i32_0 : i32, i32
  }
  func.func @transform_4(%arg0: i32) -> (i32, i32) {
    %c0_i32 = arith.constant 0 : i32
    %c0_i32_0 = arith.constant 0 : i32
    %c0_i32_1 = arith.constant 0 : i32
    return %c0_i32, %c0_i32_0 : i32, i32
  }
  func.func @transform_5(%arg0: i32) -> (i32, i32) {
    %c0_i32 = arith.constant 0 : i32
    %c0_i32_0 = arith.constant 0 : i32
    %c0_i32_1 = arith.constant 0 : i32
    return %c0_i32, %c0_i32_0 : i32, i32
  }
  func.func @transform_6(%arg0: i32) -> (i32, i32) {
    %c0_i32 = arith.constant 0 : i32
    %c0_i32_0 = arith.constant 0 : i32
    %c0_i32_1 = arith.constant 0 : i32
    return %c0_i32, %c0_i32_0 : i32, i32
  }
  func.func @transform_7(%arg0: i32) -> (i32, i32) {
    %c0_i32 = arith.constant 0 : i32
    %c0_i32_0 = arith.constant 0 : i32
    %c0_i32_1 = arith.constant 0 : i32
    return %c0_i32, %c0_i32_0 : i32, i32
  }
  func.func @transform_8(%arg0: i32) -> (i32, i32) {
    %c0_i32 = arith.constant 0 : i32
    %c0_i32_0 = arith.constant 0 : i32
    %c0_i32_1 = arith.constant 0 : i32
    return %c0_i32, %c0_i32_0 : i32, i32
  }
  func.func @transform_9(%arg0: i32) -> (i32, i32, i32) {
    %c0_i32 = arith.constant 0 : i32
    %c0_i32_0 = arith.constant 0 : i32
    %c0_i32_1 = arith.constant 0 : i32
    return %arg0, %c0_i32, %c0_i32_0 : i32, i32, i32
  }
}

</mosaic_0001>

<bundles_post_ra>
// kernel: tpu_custom_call.1
= control target key start
LH: loop header
LB: loop body
LE: loop exit
PB: predicated region body
PF: predicated region fallthrough
CT: control target
= control target key end

     0   :  { %14 = vsyncpa [#allocation4], 0  ;;  %s6103_s0 = inlined_call_operand.vmem [shape: f32[1152,50], index: 0, kind: input, shape index: {}]   ;;  %s6104_s1 = inlined_call_operand.vmem [shape: f32[128,50], index: 1, kind: input, shape index: {}]   ;;  %s6105_s2 = inlined_call_operand.vmem [shape: bf16[50,768], index: 2, kind: input, shape index: {}]   ;;  %s6106_s3 = inlined_call_operand.vmem [shape: f32[1,768], index: 3, kind: input, shape index: {}]   ;;  %s6107_s4 = inlined_call_operand.vmem [shape: bf16[256,256], index: 4, kind: input, shape index: {}]   ;;  %s6108_s5 = inlined_call_operand.vmem [shape: f32[1,256], index: 5, kind: input, shape index: {}]   ;;  %s6109_s6 = inlined_call_operand.vmem [shape: bf16[192,128], index: 6, kind: input, shape index: {}]   ;;  %s6110_s7 = inlined_call_operand.vmem [shape: f32[64,1], index: 7, kind: input, shape index: {}]   ;;  %s6111_s8 = inlined_call_operand.vmem [shape: bf16[256,128], index: 8, kind: input, shape index: {}]   ;;  %s6112_s9 = inlined_call_operand.hbm [shape: bf16[9,64,128], index: 9, kind: output, shape index: {}]  }
   0x1   :  { %16 = vsyncpa [#allocation4 + $0x1], 0  ;;  %s4235_s30 = smov 0   ;;  %s4237_s10 = smov 0  }
   0x2   :  { %s4239_s11 = smov 0   ;;  %s4241_s12 = smov 0  }
   0x3 LB: > { %s4256_s13 = sadd.s32 4294967295, %s4172_s12   ;;  %s3557_s14 = sadd.s32 4294967294, %s4172_s12   ;;  %s4172_s12 = sphi %s4241_s12, %s6120_s12   ;;  %s4168_s11 = sphi %s4239_s11, %s6119_s11   ;;  %s4164_s10 = sphi %s4237_s10, %s6118_s10   ;;  %s4160_s30 = sphi %s4235_s30, %s6117_s30  }
   0x4   : > { %s4260_s15 = sadd.s32 1, %s4172_s12   ;;  %s223_s16 = sadd.s32 1, %s4168_s11 }
   0x5   : > { %s220_s17 = ssub.s32 %s4172_s12, %s4260_s15  ;;  %p233_p0 = scmp.ne.s32.totalorder %s4168_s11, %s4164_s10 }
   0x6   : > { %p221_p1 = scmp.eq.s32.totalorder %s220_s17, 0  ;;  %p234_p2 = scmp.eq.s32.totalorder %s4256_s13, 2 }
   0x7   : > { %p239_p3 = scmp.ne.s32.totalorder %s4164_s10, %s4160_s30  ;;  %p240_p4 = scmp.eq.s32.totalorder %s3557_s14, 2 }
   0x8   : > { %s4271_s18 = scalar_select %p221_p1, %s4168_s11, %s223_s16  }
   0x9   : > { %p4273_p5 = por %p234_p2, %p233_p0  ;;  %p4277_p6 = por %p240_p4, %p239_p3 }
   0xa   : > { %p3560_p7 = scmp.ge.s32.totalorder %s4172_s12, 1  ;;  %p291_p8 = scmp.lt.s32.totalorder %s4172_s12, 4 }
   0xc   : > { %p292_p9 = pnand %p3560_p7, %p291_p8 }
   0xd   : > { %s6113_s21 = sand.u32 (!%p292_p9), 1, %s4164_s10   ;;  %v3891_v0 = vld [vmem:[%s6105_s2 + $0x4] ss:$24 sps:$4 sm:$0xff] (!%p292_p9)   ;;  %v3893_v1 = vld [vmem:[%s6105_s2] ss:$24 sps:$4 sm:$0xff] (!%p292_p9)   ;;  %s327_s29 = smul.u32 (!%p292_p9), 48, %s4256_s13 }
   0xe   : > { %295 = sbr.rel (%p292_p9) target bundleno = 2393 (0x959), region = 56  ;;  %721 = vmatprep.subr.bf16.mxu0 (!%p292_p9), %v3891_v0  ;;  %3813 = vmatprep.subr.bf16.mxu1 (!%p292_p9), %v3891_v0  ;;  %v3894_v2 = vld [vmem:[%s6105_s2 + $0x34] ss:$24 sps:$4 sm:$0xff] (!%p292_p9)   ;;  %v3896_v3 = vld [vmem:[%s6105_s2 + $0x30] ss:$24 sps:$4 sm:$0xff] (!%p292_p9)   ;;  %v4178_v6 = vmov (!%p292_p9), 0  }
   0xf   : > { %s4289_s24 = smul.u32 (!%p292_p9), 96, %s6113_s21  ;;  %722 = vmatpush1.bf16.msra.mxu0 (!%p292_p9), %v3893_v1  ;;  %3817 = vmatpush1.bf16.msra.mxu1 (!%p292_p9), %v3893_v1  ;;  %v3897_v4 = vld [vmem:[%s6105_s2 + $0x64] ss:$24 sps:$4 sm:$0xff] (!%p292_p9)   ;;  %p328_p10 = scmp.lt.s32.totalorder (!%p292_p9), %s327_s29, 143  ;;  %v489_v5 = vld [vmem:[%s6105_s2 + $0x90] sm:$0x11] (!%p292_p9) }
  0x10   : > { %723 = vmatprep.subr.bf16.mxu0 (!%p292_p9), %v3894_v2  ;;  %3814 = vmatprep.subr.bf16.mxu1 (!%p292_p9), %v3894_v2  ;;  %v3899_v7 = vld [vmem:[%s6105_s2 + $0x60] ss:$24 sps:$4 sm:$0xff] (!%p292_p9)   ;;  %v3581_v8 = vcombine.high (!%p292_p9), %v489_v5, %v489_v5  ;;  %v3580_v9 = vcombine.low (!%p292_p9), %v489_v5, %v489_v5  ;;  %v4320_v11 = vld [vmem:[%s6104_s1 + $0x8] sm:$0xff] (!%p292_p9)  ;;  %vm702_vm0 = vcmask (!%p292_p9), 1040384   ;;  %v4363_v27 = vld [vmem:[%s6104_s1 + $0x10] sm:$0xff] (!%p292_p9)  ;;  %vm629_vm1 = vcmask (!%p292_p9), 408576  }
  0x11   : > { %753 = vmatprep.mubr.bf16.mxu0 (!%p292_p9), %v4178_v6  ;;  %873 = vmatprep.mubr.bf16.mxu1 (!%p292_p9), %v4178_v6  ;;  %v4315_v10 = vld [vmem:[%s6104_s1] sm:$0xff] (!%p292_p9)  ;;  %v4335_v13 = vld [vmem:[%s6104_s1 + $0x48] sm:$0xff] (!%p292_p9)  ;;  %v4368_v28 = vld [vmem:[%s6104_s1 + $0x18] sm:$0xff] (!%p292_p9)  ;;  %s326_s17 = scalar_lea.vmem (!%p292_p9), [#allocation3], %s4289_s24  ;;  %s5122_s22 = smov (!%p292_p9), 0  }
  0x12   : > { %v4325_v12 = vld [vmem:[%s6104_s1 + $0x40] sm:$0xff] (!%p292_p9)  ;;  %v704_v21 = vsel (!%p292_p9), %vm702_vm0, %v3580_v9, 0  ;;  %v3907_v24 = vld [vmem:[%s6105_s2 + $0x14] ss:$24 sps:$4 sm:$0xff] (!%p292_p9)   ;;  %v3905_v26 = vld [vmem:[%s6105_s2 + $0x10] ss:$24 sps:$4 sm:$0xff] (!%p292_p9)  }
  0x13   : > { %724 = vmatpush1.bf16.msra.mxu0 (!%p292_p9), %v3896_v3  ;;  %3818 = vmatpush1.bf16.msra.mxu1 (!%p292_p9), %v3896_v3  ;;  %v3904_v23 = vld [vmem:[%s6105_s2 + $0xc] ss:$24 sps:$4 sm:$0xff] (!%p292_p9)   ;;  %v3902_v25 = vld [vmem:[%s6105_s2 + $0x8] ss:$24 sps:$4 sm:$0xff] (!%p292_p9)   ;;  %v4378_v32 = vld [vmem:[%s6104_s1 + $0x50] sm:$0xff] (!%p292_p9) }
  0x14   : > { %725 = vmatprep.subr.bf16.mxu0 (!%p292_p9), %v3897_v4  ;;  %3815 = vmatprep.subr.bf16.mxu1 (!%p292_p9), %v3897_v4  ;;  %v4383_v33 = vld [vmem:[%s6104_s1 + $0x58] sm:$0xff] (!%p292_p9)  ;;  %v4405_v43 = vld [vmem:[%s6104_s1 + $0x20] sm:$0xff] (!%p292_p9)  ;;  %v4410_v44 = vld [vmem:[%s6104_s1 + $0x28] sm:$0xff] (!%p292_p9) }
  0x15   : > { %s6122_s29 = smov (!%p328_p10, %s327_s29), 143  ;;  %v3908_v41 = vld [vmem:[%s6105_s2 + $0x38] ss:$24 sps:$4 sm:$0xff]   ;;  %v3910_v42 = vld [vmem:[%s6105_s2 + $0x3c] ss:$24 sps:$4 sm:$0xff]   ;;  %v4422_v48 = vld [vmem:[%s6104_s1 + $0x60] sm:$0xff] }
  0x16   : > { %s3561_s28 = sshll.u32 %s6122_s29, 3  ;;  %v3911_v46 = vld [vmem:[%s6105_s2 + $0x40] ss:$24 sps:$4 sm:$0xff]   ;;  %v3913_v49 = vld [vmem:[%s6105_s2 + $0x44] ss:$24 sps:$4 sm:$0xff]   ;;  %v4430_v50 = vld [vmem:[%s6104_s1 + $0x68] sm:$0xff] }
  0x17   : > { %s4330_s29 = scalar_lea.vmem %s6103_s0, %s3561_s28  ;;  %726 = vmatpush1.bf16.msra.mxu0 %v3899_v7  ;;  %3819 = vmatpush1.bf16.msra.mxu1 %v3899_v7  ;;  %v4441_v55 = vld [vmem:[%s6104_s1 + $0x30] sm:$0xff]  ;;  %v4451_v61 = vld [vmem:[%s6104_s1 + $0x38] sm:$0xff]  ;;  %v3914_v63 = vld [vmem:[%s6105_s2 + $0x68] ss:$24 sps:$4 sm:$0xff]  }
  0x18   : > { %v351_v14 = vld [vmem:[%s4330_s29] sm:$0xff]  ;;  %v352_v15 = vld [vmem:[%s4330_s29 + $0x8] sm:$0xff]  ;;  %3586 = vmatprep.subr.msk.bf16.mxu0 %vm702_vm0, %v3581_v8  ;;  %3816 = vmatprep.subr.msk.bf16.mxu1 %vm702_vm0, %v3581_v8  ;;  %v353_v31 = vld [vmem:[%s4330_s29 + $0x10] sm:$0xff] }
  0x19   : > { %v375_v16 = vld [vmem:[%s4330_s29 + $0xc0] sm:$0xff]  ;;  %v399_v17 = vadd.f32 %v351_v14, %v4315_v10  ;;  %v400_v18 = vadd.f32 %v352_v15, %v4320_v11  ;;  %v376_v19 = vld [vmem:[%s4330_s29 + $0xc8] sm:$0xff]  ;;  %v354_v34 = vld [vmem:[%s4330_s29 + $0x18] sm:$0xff]  ;;  %v401_v37 = vadd.f32 %v353_v31, %v4363_v27 }
  0x1a   : > { %v423_v20 = vadd.f32 %v375_v16, %v4325_v12  ;;  %v424_v22 = vadd.f32 %v376_v19, %v4335_v13  ;;  %v377_v35 = vld [vmem:[%s4330_s29 + $0xd0] sm:$0xff]  ;;  %v378_v36 = vld [vmem:[%s4330_s29 + $0xd8] sm:$0xff]  ;;  %v402_v38 = vadd.f32 %v354_v34, %v4368_v28  ;;  %v355_v45 = vld [vmem:[%s4330_s29 + $0x20] sm:$0xff] }
  0x1b   : > { %v4370_v29 = vpack.c.bf16 %v400_v18, %v399_v17  ;;  %728 = vmatpush1.bf16.msra.mxu0 %v704_v21  ;;  %3820 = vmatpush1.bf16.msra.mxu1 %v704_v21  ;;  %v425_v39 = vadd.f32 %v377_v35, %v4378_v32  ;;  %v426_v40 = vadd.f32 %v378_v36, %v4383_v33  ;;  %v356_v47 = vld [vmem:[%s4330_s29 + $0x28] sm:$0xff]  ;;  %v379_v51 = vld [vmem:[%s4330_s29 + $0xe0] sm:$0xff]  ;;  %v357_v56 = vld [vmem:[%s4330_s29 + $0x30] sm:$0xff] }
  0x1c   : > { %v4372_v30 = vpack.c.bf16 %v424_v22, %v423_v20  ;;  %994 = vmatprep.subr.bf16.mxu1 %v3904_v23  ;;  %1267 = vmatprep.subr.bf16.mxu0 %v3907_v24  ;;  %v380_v52 = vld [vmem:[%s4330_s29 + $0xe8] sm:$0xff]  ;;  %v4434_v53 = vpack.c.bf16 %v402_v38, %v401_v37  ;;  %v403_v57 = vadd.f32 %v355_v45, %v4405_v43  ;;  %v358_v62 = vld [vmem:[%s4330_s29 + $0x38] sm:$0xff]  ;;  %v4475_v3 = vld [vmem:[%s6104_s1 + $0x70] sm:$0xff] }
  0x1d   : > { %v4436_v54 = vpack.c.bf16 %v426_v40, %v425_v39  ;;  %v404_v58 = vadd.f32 %v356_v47, %v4410_v44  ;;  %v427_v59 = vadd.f32 %v379_v51, %v4422_v48  ;;  %v428_v60 = vadd.f32 %v380_v52, %v4430_v50  ;;  %v3916_v0 = vld [vmem:[%s6105_s2 + $0x6c] ss:$24 sps:$4 sm:$0xff]   ;;  %v3917_v1 = vld [vmem:[%s6105_s2 + $0x70] ss:$24 sps:$4 sm:$0xff]   ;;  %v4480_v4 = vld [vmem:[%s6104_s1 + $0x78] sm:$0xff] }
  0x1e   : > { %3587 = vmatmul.mubr.msk.bf16.vlgmr.msra.gmra.mrb[0].mxu0 %vm629_vm1, %v4370_v29  ;;  %3599 = vmatmul.mubr.msk.bf16.vlgmr.msra.gmra.mrb[0].mxu1 %vm629_vm1, %v4372_v30  ;;  %v3919_v2 = vld [vmem:[%s6105_s2 + $0x74] ss:$24 sps:$4 sm:$0xff]   ;;  %v4488_v9 = vadd.f32 %v357_v56, %v4441_v55  ;;  %v382_v14 = vld [vmem:[%s4330_s29 + $0xf8] sm:$0xff]  ;;  %v367_v15 = vld [vmem:[%s4330_s29 + $0x80] sm:$0xff]  ;;  %v406_v17 = vadd.f32 %v358_v62, %v4451_v61 }
  0x1f   : > { %995 = vmatpush1.bf16.msra.mxu1 %v3902_v25  ;;  %1268 = vmatpush1.bf16.msra.mxu0 %v3905_v26  ;;  %v381_v5 = vld [vmem:[%s4330_s29 + $0xf0] sm:$0xff]  ;;  %v4483_v7 = vpack.c.bf16 %v404_v58, %v403_v57  ;;  %v4485_v8 = vpack.c.bf16 %v428_v60, %v427_v59  ;;  %v368_v16 = vld [vmem:[%s4330_s29 + $0x88] sm:$0xff]  ;;  %v415_v18 = vadd.f32 %v367_v15, %v4315_v10  ;;  %v391_v20 = vld [vmem:[%s4330_s29 + $0x140] sm:$0xff] }
  0x20   : > { %763 = vmatprep.mubr.bf16.mxu0 %v4178_v6  ;;  %883 = vmatprep.mubr.bf16.mxu1 %v4178_v6  ;;  %v416_v19 = vadd.f32 %v368_v16, %v4320_v11  ;;  %v392_v21 = vld [vmem:[%s4330_s29 + $0x148] sm:$0xff]  ;;  %v369_v22 = vld [vmem:[%s4330_s29 + $0x90] sm:$0xff]  ;;  %v429_v23 = vadd.f32 %v381_v5, %v4475_v3  ;;  %v439_v24 = vadd.f32 %v391_v20, %v4325_v12  ;;  %v370_v26 = vld [vmem:[%s4330_s29 + $0x98] sm:$0xff] }
  0x21   : > { %996 = vmatprep.subr.bf16.mxu1 %v3910_v42  ;;  %1269 = vmatprep.subr.bf16.mxu0 %v3913_v49  ;;  %v440_v25 = vadd.f32 %v392_v21, %v4335_v13  ;;  %v417_v31 = vadd.f32 %v369_v22, %v4363_v27  ;;  %v393_v34 = vld [vmem:[%s4330_s29 + $0x150] sm:$0xff]  ;;  %v394_v35 = vld [vmem:[%s4330_s29 + $0x158] sm:$0xff]  ;;  %v430_v36 = vadd.f32 %v382_v14, %v4480_v4  ;;  %v371_v42 = vld [vmem:[%s4330_s29 + $0xa0] sm:$0xff] }
  0x22   : > { %v4507_v37 = vpack.c.bf16 %v416_v19, %v415_v18  ;;  %v418_v38 = vadd.f32 %v370_v26, %v4368_v28  ;;  %v441_v39 = vadd.f32 %v393_v34, %v4378_v32  ;;  %v490_v40 = vld [vmem:[%s6105_s2 + $0x98] sm:$0x11]  ;;  %v372_v51 = vld [vmem:[%s4330_s29 + $0xa8] sm:$0xff]  ;;  %v395_v52 = vld [vmem:[%s4330_s29 + $0x160] sm:$0xff]  ;;  %v419_v60 = vadd.f32 %v371_v42, %v4405_v43 }
  0x23   : > { %997 = vmatpush1.bf16.msra.mxu1 %v3908_v41  ;;  %1270 = vmatpush1.bf16.msra.mxu0 %v3911_v46  ;;  %v491_v41 = vld [vmem:[%s6105_s2 + $0xa0] sm:$0x11]  ;;  %v4518_v45 = vpack.c.bf16 %v440_v25, %v439_v24  ;;  %v442_v46 = vadd.f32 %v394_v35, %v4383_v33  ;;  %v3583_v47 = vcombine.high %v490_v40, %v490_v40  ;;  %v396_v56 = vld [vmem:[%s4330_s29 + $0x168] sm:$0xff]  ;;  %v373_v62 = vld [vmem:[%s4330_s29 + $0xb0] sm:$0xff] }
  0x24   : > { %998 = vmatprep.subr.bf16.mxu1 %v3916_v0  ;;  %1271 = vmatprep.subr.bf16.mxu0 %v3919_v2  ;;  %v3585_v49 = vcombine.high %v491_v41, %v491_v41  ;;  %v4524_v57 = vpack.c.bf16 %v418_v38, %v417_v31  ;;  %v3582_v58 = vcombine.low %v490_v40, %v490_v40  ;;  %v397_v0 = vld [vmem:[%s4330_s29 + $0x170] sm:$0xff]  ;;  %v398_v14 = vld [vmem:[%s4330_s29 + $0x178] sm:$0xff]  ;;  %v359_v34 = vld [vmem:[%s4330_s29 + $0x40] sm:$0xff] }
  0x25   : > { %v3584_v59 = vcombine.low %v491_v41, %v491_v41  ;;  %v420_v2 = vadd.f32 %v372_v51, %v4410_v44  ;;  %v443_v5 = vadd.f32 %v395_v52, %v4422_v48  ;;  %v444_v18 = vadd.f32 %v396_v56, %v4430_v50  ;;  %v360_v38 = vld [vmem:[%s4330_s29 + $0x48] sm:$0xff] }
  0x26   : > { %3588 = vmatmul.mubr.msk.bf16.gmra.mrb[4].mxu0 %vm629_vm1, %v4434_v53  ;;  %3600 = vmatmul.mubr.msk.bf16.gmra.mrb[4].mxu1 %vm629_vm1, %v4436_v54  ;;  %v710_v15 = vsel %vm702_vm0, %v3582_v58, 0  ;;  %v421_v19 = vadd.f32 %v373_v62, %v4441_v55  ;;  %v445_v22 = vadd.f32 %v397_v0, %v4475_v3  ;;  %v446_v25 = vadd.f32 %v398_v14, %v4480_v4  ;;  %v384_v40 = vld [vmem:[%s4330_s29 + $0x108] sm:$0xff]  ;;  %v363_v58 = vld [vmem:[%s4330_s29 + $0x60] sm:$0xff]  ;;  %v389_v14 = vld [vmem:[%s4330_s29 + $0x130] sm:$0xff] }
  0x27   : > { %773 = vmatprep.mubr.bf16.mxu0 %v4178_v6  ;;  %893 = vmatprep.mubr.bf16.mxu1 %v4178_v6  ;;  %v716_v16 = vsel %vm702_vm0, %v3584_v59, 0  ;;  %v4547_v20 = vpack.c.bf16 %v420_v2, %v419_v60  ;;  %v4551_v24 = vpack.c.bf16 %v444_v18, %v443_v5  ;;  %v4555_v26 = vpack.c.bf16 %v406_v17, %v4488_v9  ;;  %v364_v59 = vld [vmem:[%s4330_s29 + $0x68] sm:$0xff]  ;;  %v387_v60 = vld [vmem:[%s4330_s29 + $0x120] sm:$0xff]  ;;  %v366_v5 = vld [vmem:[%s4330_s29 + $0x78] sm:$0xff] }
  0x28   : > { %999 = vmatpush1.bf16.msra.mxu1 %v3914_v63  ;;  %1272 = vmatpush1.bf16.msra.mxu0 %v3917_v1  ;;  %v374_v63 = vld [vmem:[%s4330_s29 + $0xb8] sm:$0xff]  ;;  %v4534_v1 = vpack.c.bf16 %v442_v46, %v441_v39  ;;  %v4557_v31 = vpack.c.bf16 %v430_v36, %v429_v23  ;;  %v383_v39 = vld [vmem:[%s4330_s29 + $0x100] sm:$0xff]  ;;  %v4565_v41 = vpack.c.bf16 %v446_v25, %v445_v22  ;;  %v361_v46 = vld [vmem:[%s4330_s29 + $0x50] sm:$0xff] }
  0x29   : > { %3611 = vmatprep.subr.msk.bf16.mxu1 %vm702_vm0, %v3583_v47  ;;  %3636 = vmatprep.subr.msk.bf16.mxu0 %vm702_vm0, %v3585_v49  ;;  %v422_v21 = vadd.f32 %v374_v63, %v4451_v61  ;;  %v407_v42 = vadd.f32 %v359_v34, %v4325_v12  ;;  %v408_v9 = vadd.f32 %v360_v38, %v4335_v13  ;;  %v362_v47 = vld [vmem:[%s4330_s29 + $0x58] sm:$0xff]  ;;  %v385_v49 = vld [vmem:[%s4330_s29 + $0x110] sm:$0xff] }
  0x2a   : > { %v431_v17 = vadd.f32 %v383_v39, %v4315_v10  ;;  %v432_v23 = vadd.f32 %v384_v40, %v4320_v11  ;;  %v386_v13 = vld [vmem:[%s4330_s29 + $0x118] sm:$0xff]  ;;  %v409_v10 = vadd.f32 %v361_v46, %v4378_v32  ;;  %v410_v11 = vadd.f32 %v362_v47, %v4383_v33  ;;  %v388_v33 = vld [vmem:[%s4330_s29 + $0x128] sm:$0xff] }
  0x2b   : > { %v4560_v35 = vpack.c.bf16 %v422_v21, %v421_v19  ;;  %v4577_v36 = vpack.c.bf16 %v408_v9, %v407_v42  ;;  %v433_v51 = vadd.f32 %v385_v49, %v4363_v27  ;;  %v434_v52 = vadd.f32 %v386_v13, %v4368_v28 }
  0x2c   : > { %1001 = vmatpush1.bf16.msra.mxu1 %v710_v15  ;;  %1274 = vmatpush1.bf16.msra.mxu0 %v716_v16  ;;  %v4579_v12 = vpack.c.bf16 %v432_v23, %v431_v17  ;;  %v4595_v56 = vpack.c.bf16 %v410_v11, %v409_v10  ;;  %v411_v27 = vadd.f32 %v363_v58, %v4422_v48  ;;  %v365_v48 = vld [vmem:[%s4330_s29 + $0x70] sm:$0xff]  ;;  %v390_v15 = vld [vmem:[%s4330_s29 + $0x138] sm:$0xff] }
  0x2d   : > { %v4597_v32 = vpack.c.bf16 %v434_v52, %v433_v51  ;;  %v412_v28 = vadd.f32 %v364_v59, %v4430_v50  ;;  %v435_v62 = vadd.f32 %v387_v60, %v4405_v43  ;;  %v436_v63 = vadd.f32 %v388_v33, %v4410_v44 }
  0x2e   : > { %3589 = vmatmul.mubr.msk.bf16.gmra.mrb[8].mxu0 %vm629_vm1, %v4483_v7  ;;  %3601 = vmatmul.mubr.msk.bf16.gmra.mrb[8].mxu1 %vm629_vm1, %v4485_v8  ;;  %v413_v16 = vadd.f32 %v365_v48, %v4475_v3  ;;  %v414_v43 = vadd.f32 %v366_v5, %v4480_v4  ;;  %v437_v44 = vadd.f32 %v389_v14, %v4441_v55  ;;  %v4746_v55 = vld [vmem:[%s6106_s3] sm:$0x3f] }
  0x2f   : > { %783 = vmatprep.mubr.bf16.mxu0 %v4178_v6  ;;  %903 = vmatprep.mubr.bf16.mxu1 %v4178_v6  ;;  %v453_v0 = vpack.c.bf16 %v412_v28, %v411_v27  ;;  %v4613_v2 = vpack.c.bf16 %v436_v63, %v435_v62  ;;  %v438_v50 = vadd.f32 %v390_v15, %v4451_v61 }
  0x30   : > { %v454_v18 = vpack.c.bf16 %v414_v43, %v413_v16 }
  0x31   : > { %v4628_v19 = vpack.c.bf16 %v438_v50, %v437_v44 }
  0x36   : > { %3590 = vmatmul.mubr.msk.bf16.gmra.mrb[12].mxu0 %vm629_vm1, %v4555_v26  ;;  %3602 = vmatmul.mubr.msk.bf16.gmra.mrb[12].mxu1 %vm629_vm1, %v4557_v31 }
  0x37   : > { %793 = vmatprep.mubr.bf16.mxu0 %v4178_v6  ;;  %913 = vmatprep.mubr.bf16.mxu1 %v4178_v6 }
  0x3e   : > { %3591 = vmatmul.mubr.msk.bf16.gmra.mrb[16].mxu0 %vm629_vm1, %v4577_v36  ;;  %3603 = vmatmul.mubr.msk.bf16.gmra.mrb[16].mxu1 %vm629_vm1, %v4579_v12 }
  0x3f   : > { %803 = vmatprep.mubr.bf16.mxu0 %v4178_v6  ;;  %923 = vmatprep.mubr.bf16.mxu1 %v4178_v6 }
  0x46   : > { %3592 = vmatmul.mubr.msk.bf16.gmra.mrb[20].mxu0 %vm629_vm1, %v4595_v56  ;;  %3604 = vmatmul.mubr.msk.bf16.gmra.mrb[20].mxu1 %vm629_vm1, %v4597_v32 }
  0x47   : > { %813 = vmatprep.mubr.bf16.mxu0 %v4178_v6  ;;  %933 = vmatprep.mubr.bf16.mxu1 %v4178_v6 }
  0x4e   : > { %3593 = vmatmul.mubr.msk.bf16.gmra.mrb[24].mxu0 %vm629_vm1, %v453_v0  ;;  %3605 = vmatmul.mubr.msk.bf16.gmra.mrb[24].mxu1 %vm629_vm1, %v4613_v2 }
  0x4f   : > { %823 = vmatprep.mubr.bf16.mxu0 %v4178_v6  ;;  %943 = vmatprep.mubr.bf16.mxu1 %v4178_v6 }
  0x56   : > { %3594 = vmatmul.mubr.msk.bf16.gmra.mrb[28].mxu0 %vm629_vm1, %v454_v18  ;;  %3606 = vmatmul.mubr.msk.bf16.gmra.mrb[28].mxu1 %vm629_vm1, %v4628_v19 }
  0x57   : > { %833 = vmatprep.mubr.bf16.mxu0 %v4178_v6  ;;  %953 = vmatprep.mubr.bf16.mxu1 %v4178_v6 }
  0x5e   : > { %3595 = vmatmul.mubr.msk.bf16.gmra.mrb[32].mxu0 %vm629_vm1, %v4507_v37  ;;  %3607 = vmatmul.mubr.msk.bf16.gmra.mrb[32].mxu1 %vm629_vm1, %v4518_v45 }
  0x5f   : > { %843 = vmatprep.mubr.bf16.mxu0 %v4178_v6  ;;  %963 = vmatprep.mubr.bf16.mxu1 %v4178_v6 }
  0x66   : > { %3596 = vmatmul.mubr.msk.bf16.gmra.mrb[36].mxu0 %vm629_vm1, %v4524_v57  ;;  %3608 = vmatmul.mubr.msk.bf16.gmra.mrb[36].mxu1 %vm629_vm1, %v4534_v1 }
  0x67   : > { %853 = vmatprep.mubr.bf16.mxu0 %v4178_v6  ;;  %973 = vmatprep.mubr.bf16.mxu1 %v4178_v6 }
  0x6e   : > { %3597 = vmatmul.mubr.msk.bf16.gmra.mrb[40].mxu0 %vm629_vm1, %v4547_v20  ;;  %3609 = vmatmul.mubr.msk.bf16.gmra.mrb[40].mxu1 %vm629_vm1, %v4551_v24 }
  0x6f   : > { %863 = vmatprep.mubr.bf16.mxu0 %v4178_v6  ;;  %983 = vmatprep.mubr.bf16.mxu1 %v4178_v6 }
  0x76   : > { %3598 = vmatmul.mubr.msk.bf16.gmra.mrb[44].mxu0 %vm629_vm1, %v4560_v35  ;;  %3610 = vmatmul.mubr.msk.bf16.gmra.mrb[44].mxu1 %vm629_vm1, %v4565_v41 }
  0x77   : > { %1026 = vmatprep.mubr.bf16.mxu1 %v4178_v6  ;;  %1299 = vmatprep.mubr.bf16.mxu0 %v4178_v6 }
  0x7e   : > { %3612 = vmatmul.mubr.msk.bf16.vlgmr.msra.gmra.mrb[48].mxu1 %vm629_vm1, %v4370_v29  ;;  %3637 = vmatmul.mubr.msk.bf16.vlgmr.msra.gmra.mrb[48].mxu0 %vm629_vm1, %v4370_v29  ;;  %v494_v29 = vlaneseq }
  0x7f   : > { %1036 = vmatprep.mubr.bf16.mxu1 %v4178_v6  ;;  %1309 = vmatprep.mubr.bf16.mxu0 %v4178_v6 }
  0x86   : > { %3613 = vmatmul.mubr.msk.bf16.gmra.mrb[52].mxu1 %vm629_vm1, %v4434_v53  ;;  %3638 = vmatmul.mubr.msk.bf16.gmra.mrb[52].mxu0 %vm629_vm1, %v4434_v53  ;;  %v4740_v53 = vshrl.u32 %v494_v29, 7 }
  0x87   : > { %1046 = vmatprep.mubr.bf16.mxu1 %v4178_v6  ;;  %1319 = vmatprep.mubr.bf16.mxu0 %v4178_v6 }
  0x88   : > { %v500_v61 = vsub.s32 1, %v4740_v53 }
  0x8e   : > { %3614 = vmatmul.mubr.msk.bf16.gmra.mrb[56].mxu1 %vm629_vm1, %v4483_v7  ;;  %3639 = vmatmul.mubr.msk.bf16.gmra.mrb[56].mxu0 %vm629_vm1, %v4483_v7  ;;  %v4763_v7 = vrot.slane %v4746_v55, %v500_v61 }
  0x8f   : > { %1056 = vmatprep.mubr.bf16.mxu1 %v4178_v6  ;;  %1329 = vmatprep.mubr.bf16.mxu0 %v4178_v6 }
  0x96   : > { %3615 = vmatmul.mubr.msk.bf16.gmra.mrb[60].mxu1 %vm629_vm1, %v4555_v26  ;;  %3640 = vmatmul.mubr.msk.bf16.gmra.mrb[60].mxu0 %vm629_vm1, %v4555_v26 }
  0x97   : > { %1066 = vmatprep.mubr.bf16.mxu1 %v4178_v6  ;;  %1339 = vmatprep.mubr.bf16.mxu0 %v4178_v6 }
  0x9e   : > { %3616 = vmatmul.mubr.msk.bf16.gmra.mrb[64].mxu1 %vm629_vm1, %v4577_v36  ;;  %3641 = vmatmul.mubr.msk.bf16.gmra.mrb[64].mxu0 %vm629_vm1, %v4577_v36 }
  0x9f   : > { %1076 = vmatprep.mubr.bf16.mxu1 %v4178_v6  ;;  %1349 = vmatprep.mubr.bf16.mxu0 %v4178_v6 }
  0xa6   : > { %3617 = vmatmul.mubr.msk.bf16.gmra.mrb[68].mxu1 %vm629_vm1, %v4595_v56  ;;  %3642 = vmatmul.mubr.msk.bf16.gmra.mrb[68].mxu0 %vm629_vm1, %v4595_v56 }
  0xa7   : > { %1086 = vmatprep.mubr.bf16.mxu1 %v4178_v6  ;;  %1359 = vmatprep.mubr.bf16.mxu0 %v4178_v6 }
  0xae   : > { %3618 = vmatmul.mubr.msk.bf16.gmra.mrb[72].mxu1 %vm629_vm1, %v453_v0  ;;  %3643 = vmatmul.mubr.msk.bf16.gmra.mrb[72].mxu0 %vm629_vm1, %v453_v0 }
  0xaf   : > { %1096 = vmatprep.mubr.bf16.mxu1 %v4178_v6  ;;  %1369 = vmatprep.mubr.bf16.mxu0 %v4178_v6 }
  0xb6   : > { %3619 = vmatmul.mubr.msk.bf16.gmra.mrb[76].mxu1 %vm629_vm1, %v454_v18  ;;  %3644 = vmatmul.mubr.msk.bf16.gmra.mrb[76].mxu0 %vm629_vm1, %v454_v18 }
  0xb7   : > { %1106 = vmatprep.mubr.bf16.mxu1 %v4178_v6  ;;  %1379 = vmatprep.mubr.bf16.mxu0 %v4178_v6 }
  0xbe   : > { %3620 = vmatmul.mubr.msk.bf16.gmra.mrb[80].mxu1 %vm629_vm1, %v4507_v37  ;;  %3645 = vmatmul.mubr.msk.bf16.gmra.mrb[80].mxu0 %vm629_vm1, %v4507_v37 }
  0xbf   : > { %1116 = vmatprep.mubr.bf16.mxu1 %v4178_v6  ;;  %1389 = vmatprep.mubr.bf16.mxu0 %v4178_v6 }
  0xc6   : > { %3621 = vmatmul.mubr.msk.bf16.gmra.mrb[84].mxu1 %vm629_vm1, %v4524_v57  ;;  %3646 = vmatmul.mubr.msk.bf16.gmra.mrb[84].mxu0 %vm629_vm1, %v4524_v57 }
  0xc7   : > { %1126 = vmatprep.mubr.bf16.mxu1 %v4178_v6  ;;  %1399 = vmatprep.mubr.bf16.mxu0 %v4178_v6 }
  0xce   : > { %3622 = vmatmul.mubr.msk.bf16.gmra.mrb[88].mxu1 %vm629_vm1, %v4547_v20  ;;  %3647 = vmatmul.mubr.msk.bf16.gmra.mrb[88].mxu0 %vm629_vm1, %v4547_v20 }
  0xcf   : > { %1136 = vmatprep.mubr.bf16.mxu1 %v4178_v6  ;;  %1409 = vmatprep.mubr.bf16.mxu0 %v4178_v6 }
  0xd6   : > { %3623 = vmatmul.mubr.msk.bf16.gmra.mrb[92].mxu1 %vm629_vm1, %v4560_v35  ;;  %3648 = vmatmul.mubr.msk.bf16.gmra.mrb[92].mxu0 %vm629_vm1, %v4560_v35 }
  0xd7   : > { %1146 = vmatprep.mubr.bf16.mxu1 %v4178_v6  ;;  %1419 = vmatprep.mubr.bf16.mxu0 %v4178_v6 }
  0xde   : > { %3624 = vmatmul.mubr.msk.bf16.gmra.mrb[96].mxu1 %vm629_vm1, %v4372_v30  ;;  %3649 = vmatmul.mubr.msk.bf16.gmra.mrb[96].mxu0 %vm629_vm1, %v4372_v30  ;;  %v496_v30 = vsub.s32 0, %v4740_v53 }
  0xdf   : > { %1156 = vmatprep.mubr.bf16.mxu1 %v4178_v6  ;;  %1429 = vmatprep.mubr.bf16.mxu0 %v4178_v6 }
  0xe6   : > { %3625 = vmatmul.mubr.msk.bf16.gmra.mrb[100].mxu1 %vm629_vm1, %v4436_v54  ;;  %3650 = vmatmul.mubr.msk.bf16.gmra.mrb[100].mxu0 %vm629_vm1, %v4436_v54  ;;  %v4758_v54 = vrot.slane %v4746_v55, %v496_v30 }
  0xe7   : > { %1166 = vmatprep.mubr.bf16.mxu1 %v4178_v6  ;;  %1439 = vmatprep.mubr.bf16.mxu0 %v4178_v6 }
  0xee   : > { %3626 = vmatmul.mubr.msk.bf16.gmra.mrb[104].mxu1 %vm629_vm1, %v4485_v8  ;;  %3651 = vmatmul.mubr.msk.bf16.gmra.mrb[104].mxu0 %vm629_vm1, %v4485_v8 }
  0xef   : > { %1176 = vmatprep.mubr.bf16.mxu1 %v4178_v6  ;;  %1449 = vmatprep.mubr.bf16.mxu0 %v4178_v6 }
  0xf1   : > { %v755_v3 = vpop.f32.mrb[0].mxu0  ;;  %v875_v4 = vpop.f32.mrb[0].mxu1 }
  0xf2   : > { %v757_v37 = vpop.f32.mrb[1].mxu0  ;;  %v877_v57 = vpop.f32.mrb[1].mxu1  ;;  %v756_v21 = vadd.f32 %v755_v3, %v4758_v54  ;;  %v876_v22 = vadd.f32 %v875_v4, %v4758_v54 }
  0xf3   : > { %v759_v20 = vpop.f32.mrb[2].mxu0  ;;  %v879_v8 = vpop.f32.mrb[2].mxu1  ;;  %v758_v38 = vadd.f32 %v757_v37, %v4763_v7  ;;  %v878_v39 = vadd.f32 %v877_v57, %v4763_v7 }
  0xf4   : > { %v760_v25 = vadd.f32 %v759_v20, %v4758_v54  ;;  %v880_v26 = vadd.f32 %v879_v8, %v4758_v54  ;;  %v761_v34 = vpop.f32.mrb[3].mxu0  ;;  %v881_v35 = vpop.f32.mrb[3].mxu1 }
  0xf5   : > { %v762_v40 = vadd.f32 %v761_v34, %v4763_v7  ;;  %v882_v42 = vadd.f32 %v881_v35, %v4763_v7 }
  0xf6   : > { %v1540_v9 = vpack.c.bf16 %v760_v25, %v756_v21  ;;  %v1612_v17 = vpack.c.bf16 %v880_v26, %v876_v22  ;;  %3627 = vmatmul.mubr.msk.bf16.gmra.mrb[108].mxu1 %vm629_vm1, %v4557_v31  ;;  %3652 = vmatmul.mubr.msk.bf16.gmra.mrb[108].mxu0 %vm629_vm1, %v4557_v31 }
  0xf7   : > { %v1541_v23 = vpack.c.bf16 %v762_v40, %v758_v38  ;;  %v1613_v36 = vpack.c.bf16 %v882_v42, %v878_v39  ;;  %1186 = vmatprep.mubr.bf16.mxu1 %v4178_v6  ;;  %1459 = vmatprep.mubr.bf16.mxu0 %v4178_v6 }
  0xf8   : > { %1684 = vst [vmem:[#allocation2] sm:$0xff] %v1540_v9  ;;  %1756 = vst [vmem:[#allocation2 + $0x240] sm:$0xff] %v1612_v17 }
  0xf9   : > { %1685 = vst [vmem:[#allocation2 + $0x8] sm:$0xff] %v1541_v23  ;;  %1757 = vst [vmem:[#allocation2 + $0x248] sm:$0xff] %v1613_v36  ;;  %v765_v46 = vpop.f32.mrb[4].mxu0  ;;  %v885_v47 = vpop.f32.mrb[4].mxu1 }
  0xfa   : > { %v767_v49 = vpop.f32.mrb[5].mxu0  ;;  %v887_v13 = vpop.f32.mrb[5].mxu1  ;;  %v766_v51 = vadd.f32 %v765_v46, %v4758_v54  ;;  %v886_v31 = vadd.f32 %v885_v47, %v4758_v54 }
  0xfb   : > { %v769_v10 = vpop.f32.mrb[6].mxu0  ;;  %v889_v11 = vpop.f32.mrb[6].mxu1  ;;  %v768_v60 = vadd.f32 %v767_v49, %v4763_v7  ;;  %v888_v33 = vadd.f32 %v887_v13, %v4763_v7 }
  0xfc   : > { %v770_v52 = vadd.f32 %v769_v10, %v4758_v54  ;;  %v890_v56 = vadd.f32 %v889_v11, %v4758_v54  ;;  %v771_v58 = vpop.f32.mrb[7].mxu0  ;;  %v891_v59 = vpop.f32.mrb[7].mxu1 }
  0xfd   : > { %v772_v27 = vadd.f32 %v771_v58, %v4763_v7  ;;  %v892_v28 = vadd.f32 %v891_v59, %v4763_v7 }
  0xfe   : > { %v1546_v62 = vpack.c.bf16 %v770_v52, %v766_v51  ;;  %v1618_v63 = vpack.c.bf16 %v890_v56, %v886_v31  ;;  %3628 = vmatmul.mubr.msk.bf16.gmra.mrb[112].mxu1 %vm629_vm1, %v4579_v12  ;;  %3653 = vmatmul.mubr.msk.bf16.gmra.mrb[112].mxu0 %vm629_vm1, %v4579_v12 }
  0xff   : > { %v1547_v0 = vpack.c.bf16 %v772_v27, %v768_v60  ;;  %v1619_v48 = vpack.c.bf16 %v892_v28, %v888_v33  ;;  %1196 = vmatprep.mubr.bf16.mxu1 %v4178_v6  ;;  %1469 = vmatprep.mubr.bf16.mxu0 %v4178_v6 }
 0x100   : > { %1690 = vst [vmem:[#allocation2 + $0x30] sm:$0xff] %v1546_v62  ;;  %1762 = vst [vmem:[#allocation2 + $0x270] sm:$0xff] %v1618_v63 }
 0x101   : > { %1691 = vst [vmem:[#allocation2 + $0x38] sm:$0xff] %v1547_v0  ;;  %1763 = vst [vmem:[#allocation2 + $0x278] sm:$0xff] %v1619_v48  ;;  %v775_v5 = vpop.f32.mrb[8].mxu0  ;;  %v895_v14 = vpop.f32.mrb[8].mxu1 }
 0x102   : > { %v777_v15 = vpop.f32.mrb[9].mxu0  ;;  %v897_v16 = vpop.f32.mrb[9].mxu1  ;;  %v776_v50 = vadd.f32 %v775_v5, %v4758_v54  ;;  %v896_v12 = vadd.f32 %v895_v14, %v4758_v54 }
 0x103   : > { %v779_v43 = vpop.f32.mrb[10].mxu0  ;;  %v899_v44 = vpop.f32.mrb[10].mxu1  ;;  %v778_v57 = vadd.f32 %v777_v15, %v4763_v7  ;;  %v898_v20 = vadd.f32 %v897_v16, %v4763_v7 }
 0x104   : > { %v780_v18 = vadd.f32 %v779_v43, %v4758_v54  ;;  %v900_v3 = vadd.f32 %v899_v44, %v4758_v54  ;;  %v781_v4 = vpop.f32.mrb[11].mxu0  ;;  %v901_v37 = vpop.f32.mrb[11].mxu1 }
 0x105   : > { %v782_v8 = vadd.f32 %v781_v4, %v4763_v7  ;;  %v902_v21 = vadd.f32 %v901_v37, %v4763_v7 }
 0x106   : > { %v1552_v22 = vpack.c.bf16 %v780_v18, %v776_v50  ;;  %v1624_v25 = vpack.c.bf16 %v900_v3, %v896_v12  ;;  %3629 = vmatmul.mubr.msk.bf16.gmra.mrb[116].mxu1 %vm629_vm1, %v4597_v32  ;;  %3654 = vmatmul.mubr.msk.bf16.gmra.mrb[116].mxu0 %vm629_vm1, %v4597_v32 }
 0x107   : > { %v1553_v26 = vpack.c.bf16 %v782_v8, %v778_v57  ;;  %v1625_v34 = vpack.c.bf16 %v902_v21, %v898_v20  ;;  %1206 = vmatprep.mubr.bf16.mxu1 %v4178_v6  ;;  %1479 = vmatprep.mubr.bf16.mxu0 %v4178_v6 }
 0x108   : > { %1696 = vst [vmem:[#allocation2 + $0x60] sm:$0xff] %v1552_v22  ;;  %1768 = vst [vmem:[#allocation2 + $0x2a0] sm:$0xff] %v1624_v25 }
 0x109   : > { %1697 = vst [vmem:[#allocation2 + $0x68] sm:$0xff] %v1553_v26  ;;  %1769 = vst [vmem:[#allocation2 + $0x2a8] sm:$0xff] %v1625_v34  ;;  %v785_v35 = vpop.f32.mrb[12].mxu0  ;;  %v905_v38 = vpop.f32.mrb[12].mxu1 }
 0x10a   : > { %v787_v39 = vpop.f32.mrb[13].mxu0  ;;  %v907_v40 = vpop.f32.mrb[13].mxu1  ;;  %v786_v17 = vadd.f32 %v785_v35, %v4758_v54  ;;  %v906_v32 = vadd.f32 %v905_v38, %v4758_v54 }
 0x10b   : > { %v789_v42 = vpop.f32.mrb[14].mxu0  ;;  %v909_v9 = vpop.f32.mrb[14].mxu1  ;;  %v788_v49 = vadd.f32 %v787_v39, %v4763_v7  ;;  %v908_v13 = vadd.f32 %v907_v40, %v4763_v7 }
 0x10c   : > { %v790_v23 = vadd.f32 %v789_v42, %v4758_v54  ;;  %v910_v36 = vadd.f32 %v909_v9, %v4758_v54  ;;  %v791_v46 = vpop.f32.mrb[15].mxu0  ;;  %v911_v47 = vpop.f32.mrb[15].mxu1 }
 0x10d   : > { %v792_v10 = vadd.f32 %v791_v46, %v4763_v7  ;;  %v912_v11 = vadd.f32 %v911_v47, %v4763_v7 }
 0x10e   : > { %v1558_v51 = vpack.c.bf16 %v790_v23, %v786_v17  ;;  %v1630_v31 = vpack.c.bf16 %v910_v36, %v906_v32  ;;  %3630 = vmatmul.mubr.msk.bf16.gmra.mrb[120].mxu1 %vm629_vm1, %v4613_v2  ;;  %3655 = vmatmul.mubr.msk.bf16.gmra.mrb[120].mxu0 %vm629_vm1, %v4613_v2 }
 0x10f   : > { %v1559_v52 = vpack.c.bf16 %v792_v10, %v788_v49  ;;  %v1631_v56 = vpack.c.bf16 %v912_v11, %v908_v13  ;;  %1216 = vmatprep.mubr.bf16.mxu1 %v4178_v6  ;;  %1489 = vmatprep.mubr.bf16.mxu0 %v4178_v6 }
 0x110   : > { %1702 = vst [vmem:[#allocation2 + $0x90] sm:$0xff] %v1558_v51  ;;  %1774 = vst [vmem:[#allocation2 + $0x2d0] sm:$0xff] %v1630_v31 }
 0x111   : > { %1703 = vst [vmem:[#allocation2 + $0x98] sm:$0xff] %v1559_v52  ;;  %1775 = vst [vmem:[#allocation2 + $0x2d8] sm:$0xff] %v1631_v56  ;;  %v795_v58 = vpop.f32.mrb[16].mxu0  ;;  %v915_v59 = vpop.f32.mrb[16].mxu1 }
 0x112   : > { %v797_v60 = vpop.f32.mrb[17].mxu0  ;;  %v917_v33 = vpop.f32.mrb[17].mxu1  ;;  %v796_v62 = vadd.f32 %v795_v58, %v4758_v54  ;;  %v916_v2 = vadd.f32 %v915_v59, %v4758_v54 }
 0x113   : > { %v799_v27 = vpop.f32.mrb[18].mxu0  ;;  %v919_v28 = vpop.f32.mrb[18].mxu1  ;;  %v798_v14 = vadd.f32 %v797_v60, %v4763_v7  ;;  %v918_v15 = vadd.f32 %v917_v33, %v4763_v7 }
 0x114   : > { %v800_v63 = vadd.f32 %v799_v27, %v4758_v54  ;;  %v920_v0 = vadd.f32 %v919_v28, %v4758_v54  ;;  %v801_v48 = vpop.f32.mrb[19].mxu0  ;;  %v921_v5 = vpop.f32.mrb[19].mxu1 }
 0x115   : > { %v802_v16 = vadd.f32 %v801_v48, %v4763_v7  ;;  %v922_v43 = vadd.f32 %v921_v5, %v4763_v7 }
 0x116   : > { %v1564_v44 = vpack.c.bf16 %v800_v63, %v796_v62  ;;  %v1636_v50 = vpack.c.bf16 %v920_v0, %v916_v2  ;;  %3631 = vmatmul.mubr.msk.bf16.gmra.mrb[124].mxu1 %vm629_vm1, %v4628_v19  ;;  %3656 = vmatmul.mubr.msk.bf16.gmra.mrb[124].mxu0 %vm629_vm1, %v4628_v19 }
 0x117   : > { %v1565_v12 = vpack.c.bf16 %v802_v16, %v798_v14  ;;  %v1637_v18 = vpack.c.bf16 %v922_v43, %v918_v15  ;;  %1226 = vmatprep.mubr.bf16.mxu1 %v4178_v6  ;;  %1499 = vmatprep.mubr.bf16.mxu0 %v4178_v6 }
 0x118   : > { %1708 = vst [vmem:[#allocation2 + $0xc0] sm:$0xff] %v1564_v44  ;;  %1780 = vst [vmem:[#allocation2 + $0x300] sm:$0xff] %v1636_v50 }
 0x119   : > { %1709 = vst [vmem:[#allocation2 + $0xc8] sm:$0xff] %v1565_v12  ;;  %1781 = vst [vmem:[#allocation2 + $0x308] sm:$0xff] %v1637_v18  ;;  %v805_v3 = vpop.f32.mrb[20].mxu0  ;;  %v925_v4 = vpop.f32.mrb[20].mxu1 }
 0x11a   : > { %v807_v37 = vpop.f32.mrb[21].mxu0  ;;  %v927_v57 = vpop.f32.mrb[21].mxu1  ;;  %v806_v21 = vadd.f32 %v805_v3, %v4758_v54  ;;  %v926_v19 = vadd.f32 %v925_v4, %v4758_v54 }
 0x11b   : > { %v809_v20 = vpop.f32.mrb[22].mxu0  ;;  %v929_v8 = vpop.f32.mrb[22].mxu1  ;;  %v808_v35 = vadd.f32 %v807_v37, %v4763_v7  ;;  %v928_v38 = vadd.f32 %v927_v57, %v4763_v7 }
 0x11c   : > { %v810_v22 = vadd.f32 %v809_v20, %v4758_v54  ;;  %v930_v25 = vadd.f32 %v929_v8, %v4758_v54  ;;  %v811_v26 = vpop.f32.mrb[23].mxu0  ;;  %v931_v34 = vpop.f32.mrb[23].mxu1 }
 0x11d   : > { %v812_v39 = vadd.f32 %v811_v26, %v4763_v7  ;;  %v932_v40 = vadd.f32 %v931_v34, %v4763_v7 }
 0x11e   : > { %v1570_v42 = vpack.c.bf16 %v810_v22, %v806_v21  ;;  %v1642_v9 = vpack.c.bf16 %v930_v25, %v926_v19  ;;  %3632 = vmatmul.mubr.msk.bf16.gmra.mrb[128].mxu1 %vm629_vm1, %v4518_v45  ;;  %3657 = vmatmul.mubr.msk.bf16.gmra.mrb[128].mxu0 %vm629_vm1, %v4518_v45 }
 0x11f   : > { %v1571_v17 = vpack.c.bf16 %v812_v39, %v808_v35  ;;  %v1643_v32 = vpack.c.bf16 %v932_v40, %v928_v38  ;;  %1236 = vmatprep.mubr.bf16.mxu1 %v4178_v6  ;;  %1509 = vmatprep.mubr.bf16.mxu0 %v4178_v6 }
 0x120   : > { %1714 = vst [vmem:[#allocation2 + $0xf0] sm:$0xff] %v1570_v42  ;;  %1786 = vst [vmem:[#allocation2 + $0x330] sm:$0xff] %v1642_v9 }
 0x121   : > { %1715 = vst [vmem:[#allocation2 + $0xf8] sm:$0xff] %v1571_v17  ;;  %1787 = vst [vmem:[#allocation2 + $0x338] sm:$0xff] %v1643_v32  ;;  %v815_v23 = vpop.f32.mrb[24].mxu0  ;;  %v935_v36 = vpop.f32.mrb[24].mxu1 }
 0x122   : > { %v817_v46 = vpop.f32.mrb[25].mxu0  ;;  %v937_v47 = vpop.f32.mrb[25].mxu1  ;;  %v816_v10 = vadd.f32 %v815_v23, %v4758_v54  ;;  %v936_v45 = vadd.f32 %v935_v36, %v4758_v54 }
 0x123   : > { %v819_v49 = vpop.f32.mrb[26].mxu0  ;;  %v939_v13 = vpop.f32.mrb[26].mxu1  ;;  %v818_v56 = vadd.f32 %v817_v46, %v4763_v7  ;;  %v938_v58 = vadd.f32 %v937_v47, %v4763_v7 }
 0x124   : > { %v820_v11 = vadd.f32 %v819_v49, %v4758_v54  ;;  %v940_v51 = vadd.f32 %v939_v13, %v4758_v54  ;;  %v821_v31 = vpop.f32.mrb[27].mxu0  ;;  %v941_v52 = vpop.f32.mrb[27].mxu1 }
 0x125   : > { %v822_v59 = vadd.f32 %v821_v31, %v4763_v7  ;;  %v942_v60 = vadd.f32 %v941_v52, %v4763_v7 }
 0x126   : > { %v1576_v33 = vpack.c.bf16 %v820_v11, %v816_v10  ;;  %v1648_v27 = vpack.c.bf16 %v940_v51, %v936_v45  ;;  %3633 = vmatmul.mubr.msk.bf16.gmra.mrb[132].mxu1 %vm629_vm1, %v4534_v1  ;;  %3658 = vmatmul.mubr.msk.bf16.gmra.mrb[132].mxu0 %vm629_vm1, %v4534_v1 }
 0x127   : > { %v1577_v28 = vpack.c.bf16 %v822_v59, %v818_v56  ;;  %v1649_v62 = vpack.c.bf16 %v942_v60, %v938_v58  ;;  %1246 = vmatprep.mubr.bf16.mxu1 %v4178_v6  ;;  %1519 = vmatprep.mubr.bf16.mxu0 %v4178_v6 }
 0x128   : > { %1720 = vst [vmem:[#allocation2 + $0x120] sm:$0xff] %v1576_v33  ;;  %1792 = vst [vmem:[#allocation2 + $0x360] sm:$0xff] %v1648_v27 }
 0x129   : > { %1721 = vst [vmem:[#allocation2 + $0x128] sm:$0xff] %v1577_v28  ;;  %1793 = vst [vmem:[#allocation2 + $0x368] sm:$0xff] %v1649_v62  ;;  %v825_v2 = vpop.f32.mrb[28].mxu0  ;;  %v945_v63 = vpop.f32.mrb[28].mxu1 }
 0x12a   : > { %v827_v0 = vpop.f32.mrb[29].mxu0  ;;  %v947_v48 = vpop.f32.mrb[29].mxu1  ;;  %v826_v15 = vadd.f32 %v825_v2, %v4758_v54  ;;  %v946_v1 = vadd.f32 %v945_v63, %v4758_v54 }
 0x12b   : > { %v829_v5 = vpop.f32.mrb[30].mxu0  ;;  %v949_v14 = vpop.f32.mrb[30].mxu1  ;;  %v828_v12 = vadd.f32 %v827_v0, %v4763_v7  ;;  %v948_v18 = vadd.f32 %v947_v48, %v4763_v7 }
 0x12c   : > { %v830_v16 = vadd.f32 %v829_v5, %v4758_v54  ;;  %v950_v43 = vadd.f32 %v949_v14, %v4758_v54  ;;  %v831_v44 = vpop.f32.mrb[31].mxu0  ;;  %v951_v50 = vpop.f32.mrb[31].mxu1 }
 0x12d   : > { %v832_v3 = vadd.f32 %v831_v44, %v4763_v7  ;;  %v952_v4 = vadd.f32 %v951_v50, %v4763_v7 }
 0x12e   : > { %v1582_v37 = vpack.c.bf16 %v830_v16, %v826_v15  ;;  %v1654_v57 = vpack.c.bf16 %v950_v43, %v946_v1  ;;  %3634 = vmatmul.mubr.msk.bf16.gmra.mrb[136].mxu1 %vm629_vm1, %v4551_v24  ;;  %3659 = vmatmul.mubr.msk.bf16.gmra.mrb[136].mxu0 %vm629_vm1, %v4551_v24 }
 0x12f   : > { %v1583_v20 = vpack.c.bf16 %v832_v3, %v828_v12  ;;  %v1655_v8 = vpack.c.bf16 %v952_v4, %v948_v18  ;;  %1256 = vmatprep.mubr.bf16.mxu1 %v4178_v6  ;;  %1529 = vmatprep.mubr.bf16.mxu0 %v4178_v6 }
 0x130   : > { %1726 = vst [vmem:[#allocation2 + $0x150] sm:$0xff] %v1582_v37  ;;  %1798 = vst [vmem:[#allocation2 + $0x390] sm:$0xff] %v1654_v57 }
 0x131   : > { %1727 = vst [vmem:[#allocation2 + $0x158] sm:$0xff] %v1583_v20  ;;  %1799 = vst [vmem:[#allocation2 + $0x398] sm:$0xff] %v1655_v8  ;;  %v835_v21 = vpop.f32.mrb[32].mxu0  ;;  %v955_v19 = vpop.f32.mrb[32].mxu1 }
 0x132   : > { %v837_v22 = vpop.f32.mrb[33].mxu0  ;;  %v957_v25 = vpop.f32.mrb[33].mxu1  ;;  %v836_v35 = vadd.f32 %v835_v21, %v4758_v54  ;;  %v956_v24 = vadd.f32 %v955_v19, %v4758_v54 }
 0x133   : > { %v839_v26 = vpop.f32.mrb[34].mxu0  ;;  %v959_v34 = vpop.f32.mrb[34].mxu1  ;;  %v838_v42 = vadd.f32 %v837_v22, %v4763_v7  ;;  %v958_v9 = vadd.f32 %v957_v25, %v4763_v7 }
 0x134   : > { %v840_v38 = vadd.f32 %v839_v26, %v4758_v54  ;;  %v960_v39 = vadd.f32 %v959_v34, %v4758_v54  ;;  %v841_v40 = vpop.f32.mrb[35].mxu0  ;;  %v961_v6 = vpop.f32.mrb[35].mxu1 }
 0x135   : > { %v842_v17 = vadd.f32 %v841_v40, %v4763_v7  ;;  %v962_v32 = vadd.f32 %v961_v6, %v4763_v7  ;;  %v512_v40 = vsub.s32 4, %v4740_v53  ;;  %v508_v6 = vsub.s32 3, %v4740_v53 }
 0x136   : > { %v1588_v23 = vpack.c.bf16 %v840_v38, %v836_v35  ;;  %v1660_v36 = vpack.c.bf16 %v960_v39, %v956_v24  ;;  %3635 = vmatmul.mubr.msk.bf16.gmra.mrb[140].mxu1 %vm629_vm1, %v4565_v41  ;;  %3660 = vmatmul.mubr.msk.bf16.gmra.mrb[140].mxu0 %vm629_vm1, %v4565_v41  ;;  %v504_v39 = vsub.s32 2, %v4740_v53 }
 0x137   : > { %v1589_v46 = vpack.c.bf16 %v842_v17, %v838_v42  ;;  %v1661_v47 = vpack.c.bf16 %v962_v32, %v958_v9  ;;  %v516_v42 = vsub.s32 5, %v4740_v53 }
 0x138   : > { %1732 = vst [vmem:[#allocation2 + $0x180] sm:$0xff] %v1588_v23  ;;  %1804 = vst [vmem:[#allocation2 + $0x3c0] sm:$0xff] %v1660_v36 }
 0x139   : > { %1733 = vst [vmem:[#allocation2 + $0x188] sm:$0xff] %v1589_v46  ;;  %1805 = vst [vmem:[#allocation2 + $0x3c8] sm:$0xff] %v1661_v47  ;;  %v845_v49 = vpop.f32.mrb[36].mxu0  ;;  %v965_v13 = vpop.f32.mrb[36].mxu1 }
 0x13a   : > { %v847_v10 = vpop.f32.mrb[37].mxu0  ;;  %v967_v45 = vpop.f32.mrb[37].mxu1  ;;  %v846_v31 = vadd.f32 %v845_v49, %v4758_v54  ;;  %v966_v52 = vadd.f32 %v965_v13, %v4758_v54 }
 0x13b   : > { %v849_v11 = vpop.f32.mrb[38].mxu0  ;;  %v969_v51 = vpop.f32.mrb[38].mxu1  ;;  %v848_v60 = vadd.f32 %v847_v10, %v4763_v7  ;;  %v968_v33 = vadd.f32 %v967_v45, %v4763_v7 }
 0x13c   : > { %v850_v56 = vadd.f32 %v849_v11, %v4758_v54  ;;  %v970_v41 = vadd.f32 %v969_v51, %v4758_v54  ;;  %v851_v58 = vpop.f32.mrb[39].mxu0  ;;  %v971_v59 = vpop.f32.mrb[39].mxu1 }
 0x13d   : > { %v852_v27 = vadd.f32 %v851_v58, %v4763_v7  ;;  %v972_v28 = vadd.f32 %v971_v59, %v4763_v7  ;;  %v4924_v58 = vrot.slane %v4746_v55, %v508_v6 }
 0x13e   : > { %v1594_v62 = vpack.c.bf16 %v850_v56, %v846_v31  ;;  %v1666_v2 = vpack.c.bf16 %v970_v41, %v966_v52  ;;  %v4918_v52 = vrot.slane %v4746_v55, %v504_v39 }
 0x13f   : > { %v1595_v63 = vpack.c.bf16 %v852_v27, %v848_v60  ;;  %v1667_v0 = vpack.c.bf16 %v972_v28, %v968_v33 }
 0x140   : > { %1738 = vst [vmem:[#allocation2 + $0x1b0] sm:$0xff] %v1594_v62  ;;  %1810 = vst [vmem:[#allocation2 + $0x3f0] sm:$0xff] %v1666_v2 }
 0x141   : > { %1739 = vst [vmem:[#allocation2 + $0x1b8] sm:$0xff] %v1595_v63  ;;  %1811 = vst [vmem:[#allocation2 + $0x3f8] sm:$0xff] %v1667_v0  ;;  %v855_v48 = vpop.f32.mrb[40].mxu0  ;;  %v975_v5 = vpop.f32.mrb[40].mxu1 }
 0x142   : > { %v857_v14 = vpop.f32.mrb[41].mxu0  ;;  %v977_v15 = vpop.f32.mrb[41].mxu1  ;;  %v856_v43 = vadd.f32 %v855_v48, %v4758_v54  ;;  %v976_v44 = vadd.f32 %v975_v5, %v4758_v54 }
 0x143   : > { %v859_v1 = vpop.f32.mrb[42].mxu0  ;;  %v979_v16 = vpop.f32.mrb[42].mxu1  ;;  %v858_v4 = vadd.f32 %v857_v14, %v4763_v7  ;;  %v978_v37 = vadd.f32 %v977_v15, %v4763_v7 }
 0x144   : > { %v860_v50 = vadd.f32 %v859_v1, %v4758_v54  ;;  %v980_v12 = vadd.f32 %v979_v16, %v4758_v54  ;;  %v861_v18 = vpop.f32.mrb[43].mxu0  ;;  %v981_v3 = vpop.f32.mrb[43].mxu1 }
 0x145   : > { %v862_v57 = vadd.f32 %v861_v18, %v4763_v7  ;;  %v982_v20 = vadd.f32 %v981_v3, %v4763_v7 }
 0x146   : > { %v1600_v8 = vpack.c.bf16 %v860_v50, %v856_v43  ;;  %v1672_v21 = vpack.c.bf16 %v980_v12, %v976_v44 }
 0x147   : > { %v1601_v19 = vpack.c.bf16 %v862_v57, %v858_v4  ;;  %v1673_v22 = vpack.c.bf16 %v982_v20, %v978_v37 }
 0x148   : > { %1744 = vst [vmem:[#allocation2 + $0x1e0] sm:$0xff] %v1600_v8  ;;  %1816 = vst [vmem:[#allocation2 + $0x420] sm:$0xff] %v1672_v21 }
 0x149   : > { %1745 = vst [vmem:[#allocation2 + $0x1e8] sm:$0xff] %v1601_v19  ;;  %1817 = vst [vmem:[#allocation2 + $0x428] sm:$0xff] %v1673_v22  ;;  %v865_v25 = vpop.f32.mrb[44].mxu0  ;;  %v985_v26 = vpop.f32.mrb[44].mxu1 }
 0x14a   : > { %v867_v34 = vpop.f32.mrb[45].mxu0  ;;  %v987_v35 = vpop.f32.mrb[45].mxu1  ;;  %v866_v9 = vadd.f32 %v865_v25, %v4758_v54  ;;  %v986_v17 = vadd.f32 %v985_v26, %v4758_v54 }
 0x14b   : > { %v869_v24 = vpop.f32.mrb[46].mxu0  ;;  %v989_v38 = vpop.f32.mrb[46].mxu1  ;;  %v868_v47 = vadd.f32 %v867_v34, %v4763_v7  ;;  %v988_v49 = vadd.f32 %v987_v35, %v4763_v7 }
 0x14c   : > { %v870_v32 = vadd.f32 %v869_v24, %v4758_v54  ;;  %v990_v23 = vadd.f32 %v989_v38, %v4758_v54  ;;  %v871_v36 = vpop.f32.mrb[47].mxu0  ;;  %v991_v46 = vpop.f32.mrb[47].mxu1  ;;  %v4921_v54 = vrot.slane %v4746_v55, %v512_v40 }
 0x14d   : > { %v872_v13 = vadd.f32 %v871_v36, %v4763_v7  ;;  %v992_v10 = vadd.f32 %v991_v46, %v4763_v7  ;;  %v4927_v7 = vrot.slane %v4746_v55, %v516_v42 }
 0x14e   : > { %v1606_v45 = vpack.c.bf16 %v870_v32, %v866_v9  ;;  %v1678_v11 = vpack.c.bf16 %v990_v23, %v986_v17 }
 0x14f   : > { %v1607_v51 = vpack.c.bf16 %v872_v13, %v868_v47  ;;  %v1679_v31 = vpack.c.bf16 %v992_v10, %v988_v49 }
 0x150   : > { %1750 = vst [vmem:[#allocation2 + $0x210] sm:$0xff] %v1606_v45  ;;  %1822 = vst [vmem:[#allocation2 + $0x450] sm:$0xff] %v1678_v11 }
 0x151   : > { %1751 = vst [vmem:[#allocation2 + $0x218] sm:$0xff] %v1607_v51  ;;  %1823 = vst [vmem:[#allocation2 + $0x458] sm:$0xff] %v1679_v31  ;;  %v1028_v56 = vpop.f32.mrb[48].mxu1  ;;  %v1301_v41 = vpop.f32.mrb[48].mxu0 }
 0x152   : > { %v1030_v59 = vpop.f32.mrb[49].mxu1  ;;  %v1303_v60 = vpop.f32.mrb[49].mxu0  ;;  %v1029_v28 = vadd.f32 %v1028_v56, %v4918_v52  ;;  %v1302_v62 = vadd.f32 %v1301_v41, %v4921_v54 }
 0x153   : > { %v1032_v33 = vpop.f32.mrb[50].mxu1  ;;  %v1305_v27 = vpop.f32.mrb[50].mxu0  ;;  %v1031_v5 = vadd.f32 %v1030_v59, %v4924_v58  ;;  %v1304_v14 = vadd.f32 %v1303_v60, %v4927_v7 }
 0x154   : > { %v1033_v2 = vadd.f32 %v1032_v33, %v4918_v52  ;;  %v1306_v63 = vadd.f32 %v1305_v27, %v4921_v54  ;;  %v1034_v0 = vpop.f32.mrb[51].mxu1  ;;  %v1307_v48 = vpop.f32.mrb[51].mxu0 }
 0x155   : > { %v1035_v55 = vadd.f32 %v1034_v0, %v4924_v58  ;;  %v1308_v15 = vadd.f32 %v1307_v48, %v4927_v7 }
 0x156   : > { %v1542_v1 = vpack.c.bf16 %v1033_v2, %v1029_v28  ;;  %v1544_v16 = vpack.c.bf16 %v1306_v63, %v1302_v62 }
 0x157   : > { %v1543_v43 = vpack.c.bf16 %v1035_v55, %v1031_v5  ;;  %v1545_v44 = vpack.c.bf16 %v1308_v15, %v1304_v14 }
 0x158   : > { %1686 = vst [vmem:[#allocation2 + $0x10] sm:$0xff] %v1542_v1  ;;  %1688 = vst [vmem:[#allocation2 + $0x20] sm:$0xff] %v1544_v16 }
 0x159   : > { %1687 = vst [vmem:[#allocation2 + $0x18] sm:$0xff] %v1543_v43  ;;  %1689 = vst [vmem:[#allocation2 + $0x28] sm:$0xff] %v1545_v44  ;;  %v1038_v50 = vpop.f32.mrb[52].mxu1  ;;  %v1311_v12 = vpop.f32.mrb[52].mxu0 }
 0x15a   : > { %v1040_v18 = vpop.f32.mrb[53].mxu1  ;;  %v1313_v3 = vpop.f32.mrb[53].mxu0  ;;  %v1039_v57 = vadd.f32 %v1038_v50, %v4918_v52  ;;  %v1312_v20 = vadd.f32 %v1311_v12, %v4921_v54 }
 0x15b   : > { %v1042_v4 = vpop.f32.mrb[54].mxu1  ;;  %v1315_v37 = vpop.f32.mrb[54].mxu0  ;;  %v1041_v25 = vadd.f32 %v1040_v18, %v4924_v58  ;;  %v1314_v26 = vadd.f32 %v1313_v3, %v4927_v7 }
 0x15c   : > { %v1043_v8 = vadd.f32 %v1042_v4, %v4918_v52  ;;  %v1316_v21 = vadd.f32 %v1315_v37, %v4921_v54  ;;  %v1044_v19 = vpop.f32.mrb[55].mxu1  ;;  %v1317_v22 = vpop.f32.mrb[55].mxu0 }
 0x15d   : > { %v1045_v34 = vadd.f32 %v1044_v19, %v4924_v58  ;;  %v1318_v35 = vadd.f32 %v1317_v22, %v4927_v7 }
 0x15e   : > { %v1548_v24 = vpack.c.bf16 %v1043_v8, %v1039_v57  ;;  %v1550_v38 = vpack.c.bf16 %v1316_v21, %v1312_v20 }
 0x15f   : > { %v1549_v39 = vpack.c.bf16 %v1045_v34, %v1041_v25  ;;  %v1551_v40 = vpack.c.bf16 %v1318_v35, %v1314_v26 }
 0x160   : > { %1692 = vst [vmem:[#allocation2 + $0x40] sm:$0xff] %v1548_v24  ;;  %1694 = vst [vmem:[#allocation2 + $0x50] sm:$0xff] %v1550_v38 }
 0x161   : > { %1693 = vst [vmem:[#allocation2 + $0x48] sm:$0xff] %v1549_v39  ;;  %1695 = vst [vmem:[#allocation2 + $0x58] sm:$0xff] %v1551_v40  ;;  %v1048_v6 = vpop.f32.mrb[56].mxu1  ;;  %v1321_v42 = vpop.f32.mrb[56].mxu0 }
 0x162   : > { %v1050_v9 = vpop.f32.mrb[57].mxu1  ;;  %v1323_v17 = vpop.f32.mrb[57].mxu0  ;;  %v1049_v36 = vadd.f32 %v1048_v6, %v4918_v52  ;;  %v1322_v46 = vadd.f32 %v1321_v42, %v4921_v54 }
 0x163   : > { %v1052_v32 = vpop.f32.mrb[58].mxu1  ;;  %v1325_v23 = vpop.f32.mrb[58].mxu0  ;;  %v1051_v45 = vadd.f32 %v1050_v9, %v4924_v58  ;;  %v1324_v11 = vadd.f32 %v1323_v17, %v4927_v7 }
 0x164   : > { %v1053_v47 = vadd.f32 %v1052_v32, %v4918_v52  ;;  %v1326_v49 = vadd.f32 %v1325_v23, %v4921_v54  ;;  %v1054_v13 = vpop.f32.mrb[59].mxu1  ;;  %v1327_v10 = vpop.f32.mrb[59].mxu0 }
 0x165   : > { %v1055_v51 = vadd.f32 %v1054_v13, %v4924_v58  ;;  %v1328_v31 = vadd.f32 %v1327_v10, %v4927_v7 }
 0x166   : > { %v1554_v56 = vpack.c.bf16 %v1053_v47, %v1049_v36  ;;  %v1556_v41 = vpack.c.bf16 %v1326_v49, %v1322_v46 }
 0x167   : > { %v1555_v59 = vpack.c.bf16 %v1055_v51, %v1051_v45  ;;  %v1557_v60 = vpack.c.bf16 %v1328_v31, %v1324_v11 }
 0x168   : > { %1698 = vst [vmem:[#allocation2 + $0x70] sm:$0xff] %v1554_v56  ;;  %1700 = vst [vmem:[#allocation2 + $0x80] sm:$0xff] %v1556_v41 }
 0x169   : > { %1699 = vst [vmem:[#allocation2 + $0x78] sm:$0xff] %v1555_v59  ;;  %1701 = vst [vmem:[#allocation2 + $0x88] sm:$0xff] %v1557_v60  ;;  %v1058_v33 = vpop.f32.mrb[60].mxu1  ;;  %v1331_v27 = vpop.f32.mrb[60].mxu0 }
 0x16a   : > { %v1060_v28 = vpop.f32.mrb[61].mxu1  ;;  %v1333_v62 = vpop.f32.mrb[61].mxu0  ;;  %v1059_v0 = vadd.f32 %v1058_v33, %v4918_v52  ;;  %v1332_v48 = vadd.f32 %v1331_v27, %v4921_v54 }
 0x16b   : > { %v1062_v2 = vpop.f32.mrb[62].mxu1  ;;  %v1335_v63 = vpop.f32.mrb[62].mxu0  ;;  %v1061_v1 = vadd.f32 %v1060_v28, %v4924_v58  ;;  %v1334_v16 = vadd.f32 %v1333_v62, %v4927_v7 }
 0x16c   : > { %v1063_v5 = vadd.f32 %v1062_v2, %v4918_v52  ;;  %v1336_v14 = vadd.f32 %v1335_v63, %v4921_v54  ;;  %v1064_v55 = vpop.f32.mrb[63].mxu1  ;;  %v1337_v15 = vpop.f32.mrb[63].mxu0 }
 0x16d   : > { %v1065_v43 = vadd.f32 %v1064_v55, %v4924_v58  ;;  %v1338_v44 = vadd.f32 %v1337_v15, %v4927_v7 }
 0x16e   : > { %v1560_v50 = vpack.c.bf16 %v1063_v5, %v1059_v0  ;;  %v1562_v12 = vpack.c.bf16 %v1336_v14, %v1332_v48 }
 0x16f   : > { %v1561_v18 = vpack.c.bf16 %v1065_v43, %v1061_v1  ;;  %v1563_v3 = vpack.c.bf16 %v1338_v44, %v1334_v16 }
 0x170   : > { %1704 = vst [vmem:[#allocation2 + $0xa0] sm:$0xff] %v1560_v50  ;;  %1706 = vst [vmem:[#allocation2 + $0xb0] sm:$0xff] %v1562_v12 }
 0x171   : > { %1705 = vst [vmem:[#allocation2 + $0xa8] sm:$0xff] %v1561_v18  ;;  %1707 = vst [vmem:[#allocation2 + $0xb8] sm:$0xff] %v1563_v3  ;;  %v1068_v4 = vpop.f32.mrb[64].mxu1  ;;  %v1341_v37 = vpop.f32.mrb[64].mxu0 }
 0x172   : > { %v1070_v57 = vpop.f32.mrb[65].mxu1  ;;  %v1343_v20 = vpop.f32.mrb[65].mxu0  ;;  %v1069_v19 = vadd.f32 %v1068_v4, %v4918_v52  ;;  %v1342_v22 = vadd.f32 %v1341_v37, %v4921_v54 }
 0x173   : > { %v1072_v8 = vpop.f32.mrb[66].mxu1  ;;  %v1345_v21 = vpop.f32.mrb[66].mxu0  ;;  %v1071_v24 = vadd.f32 %v1070_v57, %v4924_v58  ;;  %v1344_v38 = vadd.f32 %v1343_v20, %v4927_v7 }
 0x174   : > { %v1073_v25 = vadd.f32 %v1072_v8, %v4918_v52  ;;  %v1346_v26 = vadd.f32 %v1345_v21, %v4921_v54  ;;  %v1074_v34 = vpop.f32.mrb[67].mxu1  ;;  %v1347_v35 = vpop.f32.mrb[67].mxu0 }
 0x175   : > { %v1075_v39 = vadd.f32 %v1074_v34, %v4924_v58  ;;  %v1348_v40 = vadd.f32 %v1347_v35, %v4927_v7 }
 0x176   : > { %v1566_v6 = vpack.c.bf16 %v1073_v25, %v1069_v19  ;;  %v1568_v42 = vpack.c.bf16 %v1346_v26, %v1342_v22 }
 0x177   : > { %v1567_v9 = vpack.c.bf16 %v1075_v39, %v1071_v24  ;;  %v1569_v17 = vpack.c.bf16 %v1348_v40, %v1344_v38 }
 0x178   : > { %1710 = vst [vmem:[#allocation2 + $0xd0] sm:$0xff] %v1566_v6  ;;  %1712 = vst [vmem:[#allocation2 + $0xe0] sm:$0xff] %v1568_v42 }
 0x179   : > { %1711 = vst [vmem:[#allocation2 + $0xd8] sm:$0xff] %v1567_v9  ;;  %1713 = vst [vmem:[#allocation2 + $0xe8] sm:$0xff] %v1569_v17  ;;  %v1078_v32 = vpop.f32.mrb[68].mxu1  ;;  %v1351_v23 = vpop.f32.mrb[68].mxu0 }
 0x17a   : > { %v1080_v36 = vpop.f32.mrb[69].mxu1  ;;  %v1353_v46 = vpop.f32.mrb[69].mxu0  ;;  %v1079_v13 = vadd.f32 %v1078_v32, %v4918_v52  ;;  %v1352_v10 = vadd.f32 %v1351_v23, %v4921_v54 }
 0x17b   : > { %v1082_v47 = vpop.f32.mrb[70].mxu1  ;;  %v1355_v49 = vpop.f32.mrb[70].mxu0  ;;  %v1081_v56 = vadd.f32 %v1080_v36, %v4924_v58  ;;  %v1354_v41 = vadd.f32 %v1353_v46, %v4927_v7 }
 0x17c   : > { %v1083_v45 = vadd.f32 %v1082_v47, %v4918_v52  ;;  %v1356_v11 = vadd.f32 %v1355_v49, %v4921_v54  ;;  %v1084_v51 = vpop.f32.mrb[71].mxu1  ;;  %v1357_v31 = vpop.f32.mrb[71].mxu0 }
 0x17d   : > { %v1085_v59 = vadd.f32 %v1084_v51, %v4924_v58  ;;  %v1358_v60 = vadd.f32 %v1357_v31, %v4927_v7 }
 0x17e   : > { %v1572_v33 = vpack.c.bf16 %v1083_v45, %v1079_v13  ;;  %v1574_v27 = vpack.c.bf16 %v1356_v11, %v1352_v10 }
 0x17f   : > { %v1573_v28 = vpack.c.bf16 %v1085_v59, %v1081_v56  ;;  %v1575_v62 = vpack.c.bf16 %v1358_v60, %v1354_v41 }
 0x180   : > { %1716 = vst [vmem:[#allocation2 + $0x100] sm:$0xff] %v1572_v33  ;;  %1718 = vst [vmem:[#allocation2 + $0x110] sm:$0xff] %v1574_v27 }
 0x181   : > { %1717 = vst [vmem:[#allocation2 + $0x108] sm:$0xff] %v1573_v28  ;;  %1719 = vst [vmem:[#allocation2 + $0x118] sm:$0xff] %v1575_v62  ;;  %v1088_v2 = vpop.f32.mrb[72].mxu1  ;;  %v1361_v63 = vpop.f32.mrb[72].mxu0 }
 0x182   : > { %v1090_v0 = vpop.f32.mrb[73].mxu1  ;;  %v1363_v48 = vpop.f32.mrb[73].mxu0  ;;  %v1089_v55 = vadd.f32 %v1088_v2, %v4918_v52  ;;  %v1362_v15 = vadd.f32 %v1361_v63, %v4921_v54 }
 0x183   : > { %v1092_v5 = vpop.f32.mrb[74].mxu1  ;;  %v1365_v14 = vpop.f32.mrb[74].mxu0  ;;  %v1091_v50 = vadd.f32 %v1090_v0, %v4924_v58  ;;  %v1364_v12 = vadd.f32 %v1363_v48, %v4927_v7 }
 0x184   : > { %v1093_v1 = vadd.f32 %v1092_v5, %v4918_v52  ;;  %v1366_v16 = vadd.f32 %v1365_v14, %v4921_v54  ;;  %v1094_v43 = vpop.f32.mrb[75].mxu1  ;;  %v1367_v44 = vpop.f32.mrb[75].mxu0 }
 0x185   : > { %v1095_v18 = vadd.f32 %v1094_v43, %v4924_v58  ;;  %v1368_v3 = vadd.f32 %v1367_v44, %v4927_v7 }
 0x186   : > { %v1578_v4 = vpack.c.bf16 %v1093_v1, %v1089_v55  ;;  %v1580_v37 = vpack.c.bf16 %v1366_v16, %v1362_v15 }
 0x187   : > { %v1579_v57 = vpack.c.bf16 %v1095_v18, %v1091_v50  ;;  %v1581_v20 = vpack.c.bf16 %v1368_v3, %v1364_v12 }
 0x188   : > { %1722 = vst [vmem:[#allocation2 + $0x130] sm:$0xff] %v1578_v4  ;;  %1724 = vst [vmem:[#allocation2 + $0x140] sm:$0xff] %v1580_v37 }
 0x189   : > { %1723 = vst [vmem:[#allocation2 + $0x138] sm:$0xff] %v1579_v57  ;;  %1725 = vst [vmem:[#allocation2 + $0x148] sm:$0xff] %v1581_v20  ;;  %v1098_v8 = vpop.f32.mrb[76].mxu1  ;;  %v1371_v21 = vpop.f32.mrb[76].mxu0 }
 0x18a   : > { %v1100_v19 = vpop.f32.mrb[77].mxu1  ;;  %v1373_v22 = vpop.f32.mrb[77].mxu0  ;;  %v1099_v34 = vadd.f32 %v1098_v8, %v4918_v52  ;;  %v1372_v35 = vadd.f32 %v1371_v21, %v4921_v54 }
 0x18b   : > { %v1102_v25 = vpop.f32.mrb[78].mxu1  ;;  %v1375_v26 = vpop.f32.mrb[78].mxu0  ;;  %v1101_v6 = vadd.f32 %v1100_v19, %v4924_v58  ;;  %v1374_v42 = vadd.f32 %v1373_v22, %v4927_v7 }
 0x18c   : > { %v1103_v24 = vadd.f32 %v1102_v25, %v4918_v52  ;;  %v1376_v38 = vadd.f32 %v1375_v26, %v4921_v54  ;;  %v1104_v39 = vpop.f32.mrb[79].mxu1  ;;  %v1377_v40 = vpop.f32.mrb[79].mxu0 }
 0x18d   : > { %v1105_v9 = vadd.f32 %v1104_v39, %v4924_v58  ;;  %v1378_v17 = vadd.f32 %v1377_v40, %v4927_v7 }
 0x18e   : > { %v1584_v32 = vpack.c.bf16 %v1103_v24, %v1099_v34  ;;  %v1586_v23 = vpack.c.bf16 %v1376_v38, %v1372_v35 }
 0x18f   : > { %v1585_v36 = vpack.c.bf16 %v1105_v9, %v1101_v6  ;;  %v1587_v46 = vpack.c.bf16 %v1378_v17, %v1374_v42 }
 0x190   : > { %1728 = vst [vmem:[#allocation2 + $0x160] sm:$0xff] %v1584_v32  ;;  %1730 = vst [vmem:[#allocation2 + $0x170] sm:$0xff] %v1586_v23 }
 0x191   : > { %1729 = vst [vmem:[#allocation2 + $0x168] sm:$0xff] %v1585_v36  ;;  %1731 = vst [vmem:[#allocation2 + $0x178] sm:$0xff] %v1587_v46  ;;  %v1108_v47 = vpop.f32.mrb[80].mxu1  ;;  %v1381_v49 = vpop.f32.mrb[80].mxu0 }
 0x192   : > { %v1110_v13 = vpop.f32.mrb[81].mxu1  ;;  %v1383_v10 = vpop.f32.mrb[81].mxu0  ;;  %v1109_v51 = vadd.f32 %v1108_v47, %v4918_v52  ;;  %v1382_v31 = vadd.f32 %v1381_v49, %v4921_v54 }
 0x193   : > { %v1112_v45 = vpop.f32.mrb[82].mxu1  ;;  %v1385_v11 = vpop.f32.mrb[82].mxu0  ;;  %v1111_v33 = vadd.f32 %v1110_v13, %v4924_v58  ;;  %v1384_v27 = vadd.f32 %v1383_v10, %v4927_v7 }
 0x194   : > { %v1113_v56 = vadd.f32 %v1112_v45, %v4918_v52  ;;  %v1386_v41 = vadd.f32 %v1385_v11, %v4921_v54  ;;  %v1114_v59 = vpop.f32.mrb[83].mxu1  ;;  %v1387_v60 = vpop.f32.mrb[83].mxu0 }
 0x195   : > { %v1115_v28 = vadd.f32 %v1114_v59, %v4924_v58  ;;  %v1388_v62 = vadd.f32 %v1387_v60, %v4927_v7 }
 0x196   : > { %v1590_v2 = vpack.c.bf16 %v1113_v56, %v1109_v51  ;;  %v1592_v63 = vpack.c.bf16 %v1386_v41, %v1382_v31 }
 0x197   : > { %v1591_v0 = vpack.c.bf16 %v1115_v28, %v1111_v33  ;;  %v1593_v48 = vpack.c.bf16 %v1388_v62, %v1384_v27 }
 0x198   : > { %1734 = vst [vmem:[#allocation2 + $0x190] sm:$0xff] %v1590_v2  ;;  %1736 = vst [vmem:[#allocation2 + $0x1a0] sm:$0xff] %v1592_v63 }
 0x199   : > { %1735 = vst [vmem:[#allocation2 + $0x198] sm:$0xff] %v1591_v0  ;;  %1737 = vst [vmem:[#allocation2 + $0x1a8] sm:$0xff] %v1593_v48  ;;  %v1118_v5 = vpop.f32.mrb[84].mxu1  ;;  %v1391_v14 = vpop.f32.mrb[84].mxu0 }
 0x19a   : > { %v1120_v55 = vpop.f32.mrb[85].mxu1  ;;  %v1393_v15 = vpop.f32.mrb[85].mxu0  ;;  %v1119_v43 = vadd.f32 %v1118_v5, %v4918_v52  ;;  %v1392_v44 = vadd.f32 %v1391_v14, %v4921_v54 }
 0x19b   : > { %v1122_v1 = vpop.f32.mrb[86].mxu1  ;;  %v1395_v16 = vpop.f32.mrb[86].mxu0  ;;  %v1121_v4 = vadd.f32 %v1120_v55, %v4924_v58  ;;  %v1394_v37 = vadd.f32 %v1393_v15, %v4927_v7 }
 0x19c   : > { %v1123_v50 = vadd.f32 %v1122_v1, %v4918_v52  ;;  %v1396_v12 = vadd.f32 %v1395_v16, %v4921_v54  ;;  %v1124_v18 = vpop.f32.mrb[87].mxu1  ;;  %v1397_v3 = vpop.f32.mrb[87].mxu0 }
 0x19d   : > { %v1125_v57 = vadd.f32 %v1124_v18, %v4924_v58  ;;  %v1398_v20 = vadd.f32 %v1397_v3, %v4927_v7 }
 0x19e   : > { %v1596_v8 = vpack.c.bf16 %v1123_v50, %v1119_v43  ;;  %v1598_v21 = vpack.c.bf16 %v1396_v12, %v1392_v44 }
 0x19f   : > { %v1597_v19 = vpack.c.bf16 %v1125_v57, %v1121_v4  ;;  %v1599_v22 = vpack.c.bf16 %v1398_v20, %v1394_v37 }
 0x1a0   : > { %1740 = vst [vmem:[#allocation2 + $0x1c0] sm:$0xff] %v1596_v8  ;;  %1742 = vst [vmem:[#allocation2 + $0x1d0] sm:$0xff] %v1598_v21 }
 0x1a1   : > { %1741 = vst [vmem:[#allocation2 + $0x1c8] sm:$0xff] %v1597_v19  ;;  %1743 = vst [vmem:[#allocation2 + $0x1d8] sm:$0xff] %v1599_v22  ;;  %v1128_v25 = vpop.f32.mrb[88].mxu1  ;;  %v1401_v26 = vpop.f32.mrb[88].mxu0 }
 0x1a2   : > { %v1130_v34 = vpop.f32.mrb[89].mxu1  ;;  %v1403_v35 = vpop.f32.mrb[89].mxu0  ;;  %v1129_v39 = vadd.f32 %v1128_v25, %v4918_v52  ;;  %v1402_v40 = vadd.f32 %v1401_v26, %v4921_v54 }
 0x1a3   : > { %v1132_v24 = vpop.f32.mrb[90].mxu1  ;;  %v1405_v38 = vpop.f32.mrb[90].mxu0  ;;  %v1131_v32 = vadd.f32 %v1130_v34, %v4924_v58  ;;  %v1404_v23 = vadd.f32 %v1403_v35, %v4927_v7 }
 0x1a4   : > { %v1133_v6 = vadd.f32 %v1132_v24, %v4918_v52  ;;  %v1406_v42 = vadd.f32 %v1405_v38, %v4921_v54  ;;  %v1134_v9 = vpop.f32.mrb[91].mxu1  ;;  %v1407_v17 = vpop.f32.mrb[91].mxu0 }
 0x1a5   : > { %v1135_v36 = vadd.f32 %v1134_v9, %v4924_v58  ;;  %v1408_v46 = vadd.f32 %v1407_v17, %v4927_v7 }
 0x1a6   : > { %v1602_v47 = vpack.c.bf16 %v1133_v6, %v1129_v39  ;;  %v1604_v49 = vpack.c.bf16 %v1406_v42, %v1402_v40 }
 0x1a7   : > { %v1603_v13 = vpack.c.bf16 %v1135_v36, %v1131_v32  ;;  %v1605_v10 = vpack.c.bf16 %v1408_v46, %v1404_v23 }
 0x1a8   : > { %1746 = vst [vmem:[#allocation2 + $0x1f0] sm:$0xff] %v1602_v47  ;;  %1748 = vst [vmem:[#allocation2 + $0x200] sm:$0xff] %v1604_v49 }
 0x1a9   : > { %1747 = vst [vmem:[#allocation2 + $0x1f8] sm:$0xff] %v1603_v13  ;;  %1749 = vst [vmem:[#allocation2 + $0x208] sm:$0xff] %v1605_v10  ;;  %v1138_v45 = vpop.f32.mrb[92].mxu1  ;;  %v1411_v11 = vpop.f32.mrb[92].mxu0 }
 0x1aa   : > { %v1140_v51 = vpop.f32.mrb[93].mxu1  ;;  %v1413_v31 = vpop.f32.mrb[93].mxu0  ;;  %v1139_v59 = vadd.f32 %v1138_v45, %v4918_v52  ;;  %v1412_v60 = vadd.f32 %v1411_v11, %v4921_v54 }
 0x1ab   : > { %v1142_v56 = vpop.f32.mrb[94].mxu1  ;;  %v1415_v41 = vpop.f32.mrb[94].mxu0  ;;  %v1141_v2 = vadd.f32 %v1140_v51, %v4924_v58  ;;  %v1414_v63 = vadd.f32 %v1413_v31, %v4927_v7 }
 0x1ac   : > { %v1143_v33 = vadd.f32 %v1142_v56, %v4918_v52  ;;  %v1416_v27 = vadd.f32 %v1415_v41, %v4921_v54  ;;  %v1144_v28 = vpop.f32.mrb[95].mxu1  ;;  %v1417_v62 = vpop.f32.mrb[95].mxu0 }
 0x1ad   : > { %v1145_v0 = vadd.f32 %v1144_v28, %v4924_v58  ;;  %v1418_v48 = vadd.f32 %v1417_v62, %v4927_v7 }
 0x1ae   : > { %v1608_v5 = vpack.c.bf16 %v1143_v33, %v1139_v59  ;;  %v1610_v14 = vpack.c.bf16 %v1416_v27, %v1412_v60 }
 0x1af   : > { %v1609_v55 = vpack.c.bf16 %v1145_v0, %v1141_v2  ;;  %v1611_v15 = vpack.c.bf16 %v1418_v48, %v1414_v63 }
 0x1b0   : > { %1752 = vst [vmem:[#allocation2 + $0x220] sm:$0xff] %v1608_v5  ;;  %1754 = vst [vmem:[#allocation2 + $0x230] sm:$0xff] %v1610_v14 }
 0x1b1   : > { %1753 = vst [vmem:[#allocation2 + $0x228] sm:$0xff] %v1609_v55  ;;  %1755 = vst [vmem:[#allocation2 + $0x238] sm:$0xff] %v1611_v15  ;;  %v1148_v1 = vpop.f32.mrb[96].mxu1  ;;  %v1421_v16 = vpop.f32.mrb[96].mxu0 }
 0x1b2   : > { %v1150_v43 = vpop.f32.mrb[97].mxu1  ;;  %v1423_v44 = vpop.f32.mrb[97].mxu0  ;;  %v1149_v18 = vadd.f32 %v1148_v1, %v4918_v52  ;;  %v1422_v3 = vadd.f32 %v1421_v16, %v4921_v54 }
 0x1b3   : > { %v1152_v50 = vpop.f32.mrb[98].mxu1  ;;  %v1425_v12 = vpop.f32.mrb[98].mxu0  ;;  %v1151_v8 = vadd.f32 %v1150_v43, %v4924_v58  ;;  %v1424_v21 = vadd.f32 %v1423_v44, %v4927_v7 }
 0x1b4   : > { %v1153_v4 = vadd.f32 %v1152_v50, %v4918_v52  ;;  %v1426_v37 = vadd.f32 %v1425_v12, %v4921_v54  ;;  %v1154_v57 = vpop.f32.mrb[99].mxu1  ;;  %v1427_v20 = vpop.f32.mrb[99].mxu0 }
 0x1b5   : > { %v1155_v19 = vadd.f32 %v1154_v57, %v4924_v58  ;;  %v1428_v22 = vadd.f32 %v1427_v20, %v4927_v7 }
 0x1b6   : > { %v1614_v25 = vpack.c.bf16 %v1153_v4, %v1149_v18  ;;  %v1616_v26 = vpack.c.bf16 %v1426_v37, %v1422_v3 }
 0x1b7   : > { %v1615_v34 = vpack.c.bf16 %v1155_v19, %v1151_v8  ;;  %v1617_v35 = vpack.c.bf16 %v1428_v22, %v1424_v21 }
 0x1b8   : > { %1758 = vst [vmem:[#allocation2 + $0x250] sm:$0xff] %v1614_v25  ;;  %1760 = vst [vmem:[#allocation2 + $0x260] sm:$0xff] %v1616_v26 }
 0x1b9   : > { %1759 = vst [vmem:[#allocation2 + $0x258] sm:$0xff] %v1615_v34  ;;  %1761 = vst [vmem:[#allocation2 + $0x268] sm:$0xff] %v1617_v35  ;;  %v1158_v24 = vpop.f32.mrb[100].mxu1  ;;  %v1431_v38 = vpop.f32.mrb[100].mxu0 }
 0x1ba   : > { %v1160_v39 = vpop.f32.mrb[101].mxu1  ;;  %v1433_v40 = vpop.f32.mrb[101].mxu0  ;;  %v1159_v9 = vadd.f32 %v1158_v24, %v4918_v52  ;;  %v1432_v17 = vadd.f32 %v1431_v38, %v4921_v54 }
 0x1bb   : > { %v1162_v6 = vpop.f32.mrb[102].mxu1  ;;  %v1435_v42 = vpop.f32.mrb[102].mxu0  ;;  %v1161_v47 = vadd.f32 %v1160_v39, %v4924_v58  ;;  %v1434_v49 = vadd.f32 %v1433_v40, %v4927_v7 }
 0x1bc   : > { %v1163_v32 = vadd.f32 %v1162_v6, %v4918_v52  ;;  %v1436_v23 = vadd.f32 %v1435_v42, %v4921_v54  ;;  %v1164_v36 = vpop.f32.mrb[103].mxu1  ;;  %v1437_v46 = vpop.f32.mrb[103].mxu0 }
 0x1bd   : > { %v1165_v13 = vadd.f32 %v1164_v36, %v4924_v58  ;;  %v1438_v10 = vadd.f32 %v1437_v46, %v4927_v7 }
 0x1be   : > { %v1620_v45 = vpack.c.bf16 %v1163_v32, %v1159_v9  ;;  %v1622_v11 = vpack.c.bf16 %v1436_v23, %v1432_v17 }
 0x1bf   : > { %v1621_v51 = vpack.c.bf16 %v1165_v13, %v1161_v47  ;;  %v1623_v31 = vpack.c.bf16 %v1438_v10, %v1434_v49 }
 0x1c0   : > { %1764 = vst [vmem:[#allocation2 + $0x280] sm:$0xff] %v1620_v45  ;;  %1766 = vst [vmem:[#allocation2 + $0x290] sm:$0xff] %v1622_v11 }
 0x1c1   : > { %1765 = vst [vmem:[#allocation2 + $0x288] sm:$0xff] %v1621_v51  ;;  %1767 = vst [vmem:[#allocation2 + $0x298] sm:$0xff] %v1623_v31  ;;  %v1168_v56 = vpop.f32.mrb[104].mxu1  ;;  %v1441_v41 = vpop.f32.mrb[104].mxu0 }
 0x1c2   : > { %v1170_v59 = vpop.f32.mrb[105].mxu1  ;;  %v1443_v60 = vpop.f32.mrb[105].mxu0  ;;  %v1169_v28 = vadd.f32 %v1168_v56, %v4918_v52  ;;  %v1442_v62 = vadd.f32 %v1441_v41, %v4921_v54 }
 0x1c3   : > { %v1172_v33 = vpop.f32.mrb[106].mxu1  ;;  %v1445_v27 = vpop.f32.mrb[106].mxu0  ;;  %v1171_v5 = vadd.f32 %v1170_v59, %v4924_v58  ;;  %v1444_v14 = vadd.f32 %v1443_v60, %v4927_v7 }
 0x1c4   : > { %v1173_v2 = vadd.f32 %v1172_v33, %v4918_v52  ;;  %v1446_v63 = vadd.f32 %v1445_v27, %v4921_v54  ;;  %v1174_v0 = vpop.f32.mrb[107].mxu1  ;;  %v1447_v48 = vpop.f32.mrb[107].mxu0 }
 0x1c5   : > { %v1175_v55 = vadd.f32 %v1174_v0, %v4924_v58  ;;  %v1448_v15 = vadd.f32 %v1447_v48, %v4927_v7 }
 0x1c6   : > { %v1626_v1 = vpack.c.bf16 %v1173_v2, %v1169_v28  ;;  %v1628_v16 = vpack.c.bf16 %v1446_v63, %v1442_v62 }
 0x1c7   : > { %v1627_v43 = vpack.c.bf16 %v1175_v55, %v1171_v5  ;;  %v1629_v44 = vpack.c.bf16 %v1448_v15, %v1444_v14 }
 0x1c8   : > { %1770 = vst [vmem:[#allocation2 + $0x2b0] sm:$0xff] %v1626_v1  ;;  %1772 = vst [vmem:[#allocation2 + $0x2c0] sm:$0xff] %v1628_v16 }
 0x1c9   : > { %1771 = vst [vmem:[#allocation2 + $0x2b8] sm:$0xff] %v1627_v43  ;;  %1773 = vst [vmem:[#allocation2 + $0x2c8] sm:$0xff] %v1629_v44  ;;  %v1178_v50 = vpop.f32.mrb[108].mxu1  ;;  %v1451_v12 = vpop.f32.mrb[108].mxu0 }
 0x1ca   : > { %v1180_v18 = vpop.f32.mrb[109].mxu1  ;;  %v1453_v3 = vpop.f32.mrb[109].mxu0  ;;  %v1179_v57 = vadd.f32 %v1178_v50, %v4918_v52  ;;  %v1452_v20 = vadd.f32 %v1451_v12, %v4921_v54 }
 0x1cb   : > { %v1182_v4 = vpop.f32.mrb[110].mxu1  ;;  %v1455_v37 = vpop.f32.mrb[110].mxu0  ;;  %v1181_v25 = vadd.f32 %v1180_v18, %v4924_v58  ;;  %v1454_v26 = vadd.f32 %v1453_v3, %v4927_v7 }
 0x1cc   : > { %v1183_v8 = vadd.f32 %v1182_v4, %v4918_v52  ;;  %v1456_v21 = vadd.f32 %v1455_v37, %v4921_v54  ;;  %v1184_v19 = vpop.f32.mrb[111].mxu1  ;;  %v1457_v22 = vpop.f32.mrb[111].mxu0 }
 0x1cd   : > { %v1185_v34 = vadd.f32 %v1184_v19, %v4924_v58  ;;  %v1458_v35 = vadd.f32 %v1457_v22, %v4927_v7 }
 0x1ce   : > { %v1632_v24 = vpack.c.bf16 %v1183_v8, %v1179_v57  ;;  %v1634_v38 = vpack.c.bf16 %v1456_v21, %v1452_v20 }
 0x1cf   : > { %v1633_v39 = vpack.c.bf16 %v1185_v34, %v1181_v25  ;;  %v1635_v40 = vpack.c.bf16 %v1458_v35, %v1454_v26 }
 0x1d0   : > { %1776 = vst [vmem:[#allocation2 + $0x2e0] sm:$0xff] %v1632_v24  ;;  %1778 = vst [vmem:[#allocation2 + $0x2f0] sm:$0xff] %v1634_v38 }
 0x1d1   : > { %1777 = vst [vmem:[#allocation2 + $0x2e8] sm:$0xff] %v1633_v39  ;;  %1779 = vst [vmem:[#allocation2 + $0x2f8] sm:$0xff] %v1635_v40  ;;  %v1188_v6 = vpop.f32.mrb[112].mxu1  ;;  %v1461_v42 = vpop.f32.mrb[112].mxu0 }
 0x1d2   : > { %v1190_v9 = vpop.f32.mrb[113].mxu1  ;;  %v1463_v17 = vpop.f32.mrb[113].mxu0  ;;  %v1189_v36 = vadd.f32 %v1188_v6, %v4918_v52  ;;  %v1462_v46 = vadd.f32 %v1461_v42, %v4921_v54 }
 0x1d3   : > { %v1192_v32 = vpop.f32.mrb[114].mxu1  ;;  %v1465_v23 = vpop.f32.mrb[114].mxu0  ;;  %v1191_v45 = vadd.f32 %v1190_v9, %v4924_v58  ;;  %v1464_v11 = vadd.f32 %v1463_v17, %v4927_v7 }
 0x1d4   : > { %v1193_v47 = vadd.f32 %v1192_v32, %v4918_v52  ;;  %v1466_v49 = vadd.f32 %v1465_v23, %v4921_v54  ;;  %v1194_v13 = vpop.f32.mrb[115].mxu1  ;;  %v1467_v10 = vpop.f32.mrb[115].mxu0 }
 0x1d5   : > { %v1195_v51 = vadd.f32 %v1194_v13, %v4924_v58  ;;  %v1468_v31 = vadd.f32 %v1467_v10, %v4927_v7 }
 0x1d6   : > { %v1638_v56 = vpack.c.bf16 %v1193_v47, %v1189_v36  ;;  %v1640_v41 = vpack.c.bf16 %v1466_v49, %v1462_v46 }
 0x1d7   : > { %v1639_v59 = vpack.c.bf16 %v1195_v51, %v1191_v45  ;;  %v1641_v60 = vpack.c.bf16 %v1468_v31, %v1464_v11 }
 0x1d8   : > { %1782 = vst [vmem:[#allocation2 + $0x310] sm:$0xff] %v1638_v56  ;;  %1784 = vst [vmem:[#allocation2 + $0x320] sm:$0xff] %v1640_v41 }
 0x1d9   : > { %1783 = vst [vmem:[#allocation2 + $0x318] sm:$0xff] %v1639_v59  ;;  %1785 = vst [vmem:[#allocation2 + $0x328] sm:$0xff] %v1641_v60  ;;  %v1198_v33 = vpop.f32.mrb[116].mxu1  ;;  %v1471_v27 = vpop.f32.mrb[116].mxu0 }
 0x1da   : > { %v1200_v28 = vpop.f32.mrb[117].mxu1  ;;  %v1473_v62 = vpop.f32.mrb[117].mxu0  ;;  %v1199_v0 = vadd.f32 %v1198_v33, %v4918_v52  ;;  %v1472_v48 = vadd.f32 %v1471_v27, %v4921_v54 }
 0x1db   : > { %v1202_v2 = vpop.f32.mrb[118].mxu1  ;;  %v1475_v63 = vpop.f32.mrb[118].mxu0  ;;  %v1201_v1 = vadd.f32 %v1200_v28, %v4924_v58  ;;  %v1474_v16 = vadd.f32 %v1473_v62, %v4927_v7 }
 0x1dc   : > { %v1203_v5 = vadd.f32 %v1202_v2, %v4918_v52  ;;  %v1476_v14 = vadd.f32 %v1475_v63, %v4921_v54  ;;  %v1204_v55 = vpop.f32.mrb[119].mxu1  ;;  %v1477_v15 = vpop.f32.mrb[119].mxu0 }
 0x1dd   : > { %v1205_v43 = vadd.f32 %v1204_v55, %v4924_v58  ;;  %v1478_v44 = vadd.f32 %v1477_v15, %v4927_v7 }
 0x1de   : > { %v1644_v50 = vpack.c.bf16 %v1203_v5, %v1199_v0  ;;  %v1646_v12 = vpack.c.bf16 %v1476_v14, %v1472_v48 }
 0x1df   : > { %v1645_v18 = vpack.c.bf16 %v1205_v43, %v1201_v1  ;;  %v1647_v3 = vpack.c.bf16 %v1478_v44, %v1474_v16 }
 0x1e0   : > { %1788 = vst [vmem:[#allocation2 + $0x340] sm:$0xff] %v1644_v50  ;;  %1790 = vst [vmem:[#allocation2 + $0x350] sm:$0xff] %v1646_v12 }
 0x1e1   : > { %1789 = vst [vmem:[#allocation2 + $0x348] sm:$0xff] %v1645_v18  ;;  %1791 = vst [vmem:[#allocation2 + $0x358] sm:$0xff] %v1647_v3  ;;  %v1208_v4 = vpop.f32.mrb[120].mxu1  ;;  %v1481_v37 = vpop.f32.mrb[120].mxu0 }
 0x1e2   : > { %v1210_v57 = vpop.f32.mrb[121].mxu1  ;;  %v1483_v20 = vpop.f32.mrb[121].mxu0  ;;  %v1209_v19 = vadd.f32 %v1208_v4, %v4918_v52  ;;  %v1482_v22 = vadd.f32 %v1481_v37, %v4921_v54 }
 0x1e3   : > { %v1212_v8 = vpop.f32.mrb[122].mxu1  ;;  %v1485_v21 = vpop.f32.mrb[122].mxu0  ;;  %v1211_v24 = vadd.f32 %v1210_v57, %v4924_v58  ;;  %v1484_v38 = vadd.f32 %v1483_v20, %v4927_v7 }
 0x1e4   : > { %v1213_v25 = vadd.f32 %v1212_v8, %v4918_v52  ;;  %v1486_v26 = vadd.f32 %v1485_v21, %v4921_v54  ;;  %v1214_v34 = vpop.f32.mrb[123].mxu1  ;;  %v1487_v35 = vpop.f32.mrb[123].mxu0 }
 0x1e5   : > { %v1215_v39 = vadd.f32 %v1214_v34, %v4924_v58  ;;  %v1488_v40 = vadd.f32 %v1487_v35, %v4927_v7 }
 0x1e6   : > { %v1650_v6 = vpack.c.bf16 %v1213_v25, %v1209_v19  ;;  %v1652_v42 = vpack.c.bf16 %v1486_v26, %v1482_v22 }
 0x1e7   : > { %v1651_v9 = vpack.c.bf16 %v1215_v39, %v1211_v24  ;;  %v1653_v17 = vpack.c.bf16 %v1488_v40, %v1484_v38 }
 0x1e8   : > { %1794 = vst [vmem:[#allocation2 + $0x370] sm:$0xff] %v1650_v6  ;;  %1796 = vst [vmem:[#allocation2 + $0x380] sm:$0xff] %v1652_v42 }
 0x1e9   : > { %1795 = vst [vmem:[#allocation2 + $0x378] sm:$0xff] %v1651_v9  ;;  %1797 = vst [vmem:[#allocation2 + $0x388] sm:$0xff] %v1653_v17  ;;  %v1218_v32 = vpop.f32.mrb[124].mxu1  ;;  %v1491_v23 = vpop.f32.mrb[124].mxu0 }
 0x1ea   : > { %v1220_v36 = vpop.f32.mrb[125].mxu1  ;;  %v1493_v46 = vpop.f32.mrb[125].mxu0  ;;  %v1219_v13 = vadd.f32 %v1218_v32, %v4918_v52  ;;  %v1492_v10 = vadd.f32 %v1491_v23, %v4921_v54 }
 0x1eb   : > { %v1222_v47 = vpop.f32.mrb[126].mxu1  ;;  %v1495_v49 = vpop.f32.mrb[126].mxu0  ;;  %v1221_v56 = vadd.f32 %v1220_v36, %v4924_v58  ;;  %v1494_v41 = vadd.f32 %v1493_v46, %v4927_v7 }
 0x1ec   : > { %v1223_v45 = vadd.f32 %v1222_v47, %v4918_v52  ;;  %v1496_v11 = vadd.f32 %v1495_v49, %v4921_v54  ;;  %v1224_v51 = vpop.f32.mrb[127].mxu1  ;;  %v1497_v31 = vpop.f32.mrb[127].mxu0 }
 0x1ed   : > { %v1225_v59 = vadd.f32 %v1224_v51, %v4924_v58  ;;  %v1498_v60 = vadd.f32 %v1497_v31, %v4927_v7 }
 0x1ee   : > { %v1656_v33 = vpack.c.bf16 %v1223_v45, %v1219_v13  ;;  %v1658_v27 = vpack.c.bf16 %v1496_v11, %v1492_v10 }
 0x1ef   : > { %v1657_v28 = vpack.c.bf16 %v1225_v59, %v1221_v56  ;;  %v1659_v62 = vpack.c.bf16 %v1498_v60, %v1494_v41 }
 0x1f0   : > { %1800 = vst [vmem:[#allocation2 + $0x3a0] sm:$0xff] %v1656_v33  ;;  %1802 = vst [vmem:[#allocation2 + $0x3b0] sm:$0xff] %v1658_v27 }
 0x1f1   : > { %1801 = vst [vmem:[#allocation2 + $0x3a8] sm:$0xff] %v1657_v28  ;;  %1803 = vst [vmem:[#allocation2 + $0x3b8] sm:$0xff] %v1659_v62  ;;  %v1228_v2 = vpop.f32.mrb[128].mxu1  ;;  %v1501_v63 = vpop.f32.mrb[128].mxu0 }
 0x1f2   : > { %v1230_v0 = vpop.f32.mrb[129].mxu1  ;;  %v1503_v48 = vpop.f32.mrb[129].mxu0  ;;  %v1229_v55 = vadd.f32 %v1228_v2, %v4918_v52  ;;  %v1502_v15 = vadd.f32 %v1501_v63, %v4921_v54 }
 0x1f3   : > { %v1232_v5 = vpop.f32.mrb[130].mxu1  ;;  %v1505_v14 = vpop.f32.mrb[130].mxu0  ;;  %v1231_v50 = vadd.f32 %v1230_v0, %v4924_v58  ;;  %v1504_v12 = vadd.f32 %v1503_v48, %v4927_v7 }
 0x1f4   : > { %v1233_v1 = vadd.f32 %v1232_v5, %v4918_v52  ;;  %v1506_v16 = vadd.f32 %v1505_v14, %v4921_v54  ;;  %v1234_v43 = vpop.f32.mrb[131].mxu1  ;;  %v1507_v44 = vpop.f32.mrb[131].mxu0 }
 0x1f5   : > { %v1235_v18 = vadd.f32 %v1234_v43, %v4924_v58  ;;  %v1508_v3 = vadd.f32 %v1507_v44, %v4927_v7 }
 0x1f6   : > { %v1662_v4 = vpack.c.bf16 %v1233_v1, %v1229_v55  ;;  %v1664_v37 = vpack.c.bf16 %v1506_v16, %v1502_v15 }
 0x1f7   : > { %v1663_v57 = vpack.c.bf16 %v1235_v18, %v1231_v50  ;;  %v1665_v20 = vpack.c.bf16 %v1508_v3, %v1504_v12 }
 0x1f8   : > { %1806 = vst [vmem:[#allocation2 + $0x3d0] sm:$0xff] %v1662_v4  ;;  %1808 = vst [vmem:[#allocation2 + $0x3e0] sm:$0xff] %v1664_v37 }
 0x1f9   : > { %1807 = vst [vmem:[#allocation2 + $0x3d8] sm:$0xff] %v1663_v57  ;;  %1809 = vst [vmem:[#allocation2 + $0x3e8] sm:$0xff] %v1665_v20  ;;  %v1238_v8 = vpop.f32.mrb[132].mxu1  ;;  %v1511_v21 = vpop.f32.mrb[132].mxu0 }
 0x1fa   : > { %v1240_v19 = vpop.f32.mrb[133].mxu1  ;;  %v1513_v22 = vpop.f32.mrb[133].mxu0  ;;  %v1239_v34 = vadd.f32 %v1238_v8, %v4918_v52  ;;  %v1512_v35 = vadd.f32 %v1511_v21, %v4921_v54 }
 0x1fb   : > { %v1242_v25 = vpop.f32.mrb[134].mxu1  ;;  %v1515_v26 = vpop.f32.mrb[134].mxu0  ;;  %v1241_v6 = vadd.f32 %v1240_v19, %v4924_v58  ;;  %v1514_v42 = vadd.f32 %v1513_v22, %v4927_v7 }
 0x1fc   : > { %v1243_v24 = vadd.f32 %v1242_v25, %v4918_v52  ;;  %v1516_v38 = vadd.f32 %v1515_v26, %v4921_v54  ;;  %v1244_v39 = vpop.f32.mrb[135].mxu1  ;;  %v1517_v40 = vpop.f32.mrb[135].mxu0 }
 0x1fd   : > { %v1245_v9 = vadd.f32 %v1244_v39, %v4924_v58  ;;  %v1518_v17 = vadd.f32 %v1517_v40, %v4927_v7 }
 0x1fe   : > { %v1668_v32 = vpack.c.bf16 %v1243_v24, %v1239_v34  ;;  %v1670_v23 = vpack.c.bf16 %v1516_v38, %v1512_v35 }
 0x1ff   : > { %v1669_v36 = vpack.c.bf16 %v1245_v9, %v1241_v6  ;;  %v1671_v46 = vpack.c.bf16 %v1518_v17, %v1514_v42 }
 0x200   : > { %1812 = vst [vmem:[#allocation2 + $0x400] sm:$0xff] %v1668_v32  ;;  %1814 = vst [vmem:[#allocation2 + $0x410] sm:$0xff] %v1670_v23 }
 0x201   : > { %1813 = vst [vmem:[#allocation2 + $0x408] sm:$0xff] %v1669_v36  ;;  %1815 = vst [vmem:[#allocation2 + $0x418] sm:$0xff] %v1671_v46  ;;  %v1248_v47 = vpop.f32.mrb[136].mxu1  ;;  %v1521_v49 = vpop.f32.mrb[136].mxu0 }
 0x202   : > { %v1250_v13 = vpop.f32.mrb[137].mxu1  ;;  %v1523_v10 = vpop.f32.mrb[137].mxu0  ;;  %v1249_v51 = vadd.f32 %v1248_v47, %v4918_v52  ;;  %v1522_v31 = vadd.f32 %v1521_v49, %v4921_v54 }
 0x203   : > { %v1252_v45 = vpop.f32.mrb[138].mxu1  ;;  %v1525_v11 = vpop.f32.mrb[138].mxu0  ;;  %v1251_v33 = vadd.f32 %v1250_v13, %v4924_v58  ;;  %v1524_v27 = vadd.f32 %v1523_v10, %v4927_v7 }
 0x204   : > { %v1253_v56 = vadd.f32 %v1252_v45, %v4918_v52  ;;  %v1526_v41 = vadd.f32 %v1525_v11, %v4921_v54  ;;  %v1254_v59 = vpop.f32.mrb[139].mxu1  ;;  %v1527_v60 = vpop.f32.mrb[139].mxu0 }
 0x205   : > { %v1255_v28 = vadd.f32 %v1254_v59, %v4924_v58  ;;  %v1528_v62 = vadd.f32 %v1527_v60, %v4927_v7 }
 0x206   : > { %v1674_v2 = vpack.c.bf16 %v1253_v56, %v1249_v51  ;;  %v1676_v63 = vpack.c.bf16 %v1526_v41, %v1522_v31 }
 0x207   : > { %v1675_v0 = vpack.c.bf16 %v1255_v28, %v1251_v33  ;;  %v1677_v48 = vpack.c.bf16 %v1528_v62, %v1524_v27 }
 0x208   : > { %1818 = vst [vmem:[#allocation2 + $0x430] sm:$0xff] %v1674_v2  ;;  %1820 = vst [vmem:[#allocation2 + $0x440] sm:$0xff] %v1676_v63 }
 0x209   : > { %1819 = vst [vmem:[#allocation2 + $0x438] sm:$0xff] %v1675_v0  ;;  %1821 = vst [vmem:[#allocation2 + $0x448] sm:$0xff] %v1677_v48  ;;  %v1258_v5 = vpop.f32.mrb[140].mxu1  ;;  %v1531_v14 = vpop.f32.mrb[140].mxu0 }
 0x20a   : > { %v1260_v55 = vpop.f32.mrb[141].mxu1  ;;  %v1533_v15 = vpop.f32.mrb[141].mxu0  ;;  %v1259_v43 = vadd.f32 %v1258_v5, %v4918_v52  ;;  %v1532_v44 = vadd.f32 %v1531_v14, %v4921_v54 }
 0x20b   : > { %v1262_v1 = vpop.f32.mrb[142].mxu1  ;;  %v1535_v16 = vpop.f32.mrb[142].mxu0  ;;  %v1261_v4 = vadd.f32 %v1260_v55, %v4924_v58  ;;  %v1534_v37 = vadd.f32 %v1533_v15, %v4927_v7 }
 0x20c   : > { %v1263_v50 = vadd.f32 %v1262_v1, %v4918_v52  ;;  %v1536_v12 = vadd.f32 %v1535_v16, %v4921_v54  ;;  %v1264_v18 = vpop.f32.mrb[143].mxu1  ;;  %v1537_v3 = vpop.f32.mrb[143].mxu0 }
 0x20d   : > { %v1265_v57 = vadd.f32 %v1264_v18, %v4924_v58  ;;  %v1538_v20 = vadd.f32 %v1537_v3, %v4927_v7 }
 0x20e   : > { %v1680_v8 = vpack.c.bf16 %v1263_v50, %v1259_v43  ;;  %v1682_v21 = vpack.c.bf16 %v1536_v12, %v1532_v44 }
 0x20f   : > { %v1681_v19 = vpack.c.bf16 %v1265_v57, %v1261_v4  ;;  %v1683_v22 = vpack.c.bf16 %v1538_v20, %v1534_v37 }
 0x210   : > { %1824 = vst [vmem:[#allocation2 + $0x460] sm:$0xff] %v1680_v8  ;;  %1826 = vst [vmem:[#allocation2 + $0x470] sm:$0xff] %v1682_v21 }
 0x211   : > { %1825 = vst [vmem:[#allocation2 + $0x468] sm:$0xff] %v1681_v19  ;;  %1827 = vst [vmem:[#allocation2 + $0x478] sm:$0xff] %v1683_v22 }
 0x212 LB: >> { %s3661_s23 = sshll.u32 %s4176_s22, 7  ;;  %s4176_s22 = sphi %s5122_s22, %s1833_s22  }
 0x213   : >> { %s1835_s25 = sshra.s32 %s3661_s23, 4 }
 0x214   : >> { %s3737_s26 = smul.u32 48, %s1835_s25 }
 0x216   : >> { %s5128_s27 = scalar_lea.vmem [#allocation2], %s3737_s26  ;;  %s4180_s26 = smov 1  }
 0x218   : >> { %v1857_v52 = vld [vmem:[%s5128_s27 + $0x18] sm:$0xff]  ;;  %v1856_v54 = vld [vmem:[%s5128_s27 + $0x10] sm:$0xff]  ;;  %v1859_v58 = vld [vmem:[%s5128_s27 + $0x48] sm:$0xff] }
 0x219   : >> { %1888 = vmatprep.subr.bf16.mxu0 %v1857_v52  ;;  %v1841_v7 = vld [vmem:[%s5128_s27 + $0x8] sm:$0xff]  ;;  %v1858_v25 = vld [vmem:[%s5128_s27 + $0x40] sm:$0xff]  ;;  %v1861_v26 = vld [vmem:[%s5128_s27 + $0x78] sm:$0xff] }
 0x21a   : >> { %1889 = vmatpush1.bf16.xpose.msra.mxu0 %v1856_v54  ;;  %1920 = vmatprep.mubr.bf16.mxu0 %v1841_v7  ;;  %v1860_v34 = vld [vmem:[%s5128_s27 + $0x70] sm:$0xff]  ;;  %v1863_v35 = vld [vmem:[%s5128_s27 + $0xa8] sm:$0xff]  ;;  %v1862_v24 = vld [vmem:[%s5128_s27 + $0xa0] sm:$0xff] }
 0x21b   : >> { %1890 = vmatprep.subr.bf16.mxu0 %v1859_v58  ;;  %v1865_v38 = vld [vmem:[%s5128_s27 + $0xd8] sm:$0xff]  ;;  %v1864_v39 = vld [vmem:[%s5128_s27 + $0xd0] sm:$0xff]  ;;  %v1867_v40 = vld [vmem:[%s5128_s27 + $0x108] sm:$0xff] }
 0x21c   : >> { %v1866_v6 = vld [vmem:[%s5128_s27 + $0x100] sm:$0xff]  ;;  %v1869_v42 = vld [vmem:[%s5128_s27 + $0x138] sm:$0xff]  ;;  %v1868_v9 = vld [vmem:[%s5128_s27 + $0x130] sm:$0xff] }
 0x21d   : >> { %v1871_v17 = vld [vmem:[%s5128_s27 + $0x168] sm:$0xff]  ;;  %v1870_v32 = vld [vmem:[%s5128_s27 + $0x160] sm:$0xff]  ;;  %v1843_v36 = vld [vmem:[%s5128_s27 + $0x38] sm:$0xff] }
 0x21e   : >> { %v1840_v23 = vld [vmem:[%s5128_s27] sm:$0xff]  ;;  %v1842_v46 = vld [vmem:[%s5128_s27 + $0x30] sm:$0xff]  ;;  %v1845_v47 = vld [vmem:[%s5128_s27 + $0x68] sm:$0xff] }
 0x21f   : >> { %v1844_v49 = vld [vmem:[%s5128_s27 + $0x60] sm:$0xff]  ;;  %v1847_v13 = vld [vmem:[%s5128_s27 + $0x98] sm:$0xff]  ;;  %v1846_v10 = vld [vmem:[%s5128_s27 + $0x90] sm:$0xff] }
 0x220   : >> { %v1849_v45 = vld [vmem:[%s5128_s27 + $0xc8] sm:$0xff]  ;;  %v1848_v11 = vld [vmem:[%s5128_s27 + $0xc0] sm:$0xff]  ;;  %v1851_v51 = vld [vmem:[%s5128_s27 + $0xf8] sm:$0xff] }
 0x221   : >> { %v1850_v31 = vld [vmem:[%s5128_s27 + $0xf0] sm:$0xff]  ;;  %v1853_v56 = vld [vmem:[%s5128_s27 + $0x128] sm:$0xff]  ;;  %v1852_v41 = vld [vmem:[%s5128_s27 + $0x120] sm:$0xff] }
 0x222   : >> { %1891 = vmatpush1.bf16.xpose.msra.mxu0 %v1858_v25  ;;  %v1855_v59 = vld [vmem:[%s5128_s27 + $0x158] sm:$0xff]  ;;  %v1854_v60 = vld [vmem:[%s5128_s27 + $0x150] sm:$0xff] }
 0x223   : >> { %1892 = vmatprep.subr.bf16.mxu0 %v1861_v26 }
 0x22a   : >> { %1893 = vmatpush1.bf16.xpose.msra.mxu0 %v1860_v34 }
 0x22b   : >> { %1894 = vmatprep.subr.bf16.mxu0 %v1863_v35 }
 0x232   : >> { %1895 = vmatpush1.bf16.xpose.msra.mxu0 %v1862_v24 }
 0x233   : >> { %1896 = vmatprep.subr.bf16.mxu0 %v1865_v38 }
 0x23a   : >> { %1897 = vmatpush1.bf16.xpose.msra.mxu0 %v1864_v39 }
 0x23b   : >> { %1898 = vmatprep.subr.bf16.mxu0 %v1867_v40 }
 0x242   : >> { %1899 = vmatpush1.bf16.xpose.msra.mxu0 %v1866_v6 }
 0x243   : >> { %1900 = vmatprep.subr.bf16.mxu0 %v1869_v42 }
 0x24a   : >> { %1901 = vmatpush1.bf16.xpose.msra.mxu0 %v1868_v9 }
 0x24b   : >> { %1902 = vmatprep.subr.bf16.mxu0 %v1871_v17 }
 0x252   : >> { %1903 = vmatpush1.bf16.xpose.msra.mxu0 %v1870_v32 }
 0x259   : >> { %1921 = vmatmul.mubr.bf16.vlgmr.msra.gmra.mrb[0].mxu0 %v1840_v23 }
 0x25a   : >> { %1928 = vmatprep.mubr.bf16.mxu0 %v1843_v36 }
 0x261   : >> { %1929 = vmatmul.mubr.bf16.gmra.mrb[4].mxu0 %v1842_v46 }
 0x262   : >> { %1936 = vmatprep.mubr.bf16.mxu0 %v1845_v47  ;;  %v1873_v47 = vld [vmem:[%s5128_s27 + $0x28] sm:$0xff] }
 0x263   : >> { %2153 = vmatprep.subr.bf16.mxu1 %v1873_v47 }
 0x269   : >> { %1937 = vmatmul.mubr.bf16.gmra.mrb[8].mxu0 %v1844_v49  ;;  %v1872_v49 = vld [vmem:[%s5128_s27 + $0x20] sm:$0xff] }
 0x26a   : >> { %1944 = vmatprep.mubr.bf16.mxu0 %v1847_v13  ;;  %v1875_v13 = vld [vmem:[%s5128_s27 + $0x58] sm:$0xff]  ;;  %2154 = vmatpush1.bf16.msra.mxu1 %v1872_v49 }
 0x26b   : >> { %2155 = vmatprep.subr.bf16.mxu1 %v1875_v13  ;;  %v1887_v49 = vld [vmem:[%s5128_s27 + $0x178] sm:$0xff] }
 0x271   : >> { %1945 = vmatmul.mubr.bf16.gmra.mrb[12].mxu0 %v1846_v10  ;;  %v1874_v10 = vld [vmem:[%s5128_s27 + $0x50] sm:$0xff] }
 0x272   : >> { %1952 = vmatprep.mubr.bf16.mxu0 %v1849_v45  ;;  %v1877_v45 = vld [vmem:[%s5128_s27 + $0x88] sm:$0xff]  ;;  %2156 = vmatpush1.bf16.msra.mxu1 %v1874_v10 }
 0x273   : >> { %2157 = vmatprep.subr.bf16.mxu1 %v1877_v45 }
 0x279   : >> { %1953 = vmatmul.mubr.bf16.gmra.mrb[16].mxu0 %v1848_v11  ;;  %v1876_v11 = vld [vmem:[%s5128_s27 + $0x80] sm:$0xff] }
 0x27a   : >> { %1960 = vmatprep.mubr.bf16.mxu0 %v1851_v51  ;;  %v1879_v51 = vld [vmem:[%s5128_s27 + $0xb8] sm:$0xff]  ;;  %2158 = vmatpush1.bf16.msra.mxu1 %v1876_v11  ;;  %v1886_v11 = vld [vmem:[%s5128_s27 + $0x170] sm:$0xff] }
 0x27b   : >> { %2159 = vmatprep.subr.bf16.mxu1 %v1879_v51 }
 0x281   : >> { %1961 = vmatmul.mubr.bf16.gmra.mrb[20].mxu0 %v1850_v31 }
 0x282   : >> { %1968 = vmatprep.mubr.bf16.mxu0 %v1853_v56 }
 0x289   : >> { %1969 = vmatmul.mubr.bf16.gmra.mrb[24].mxu0 %v1852_v41 }
 0x28a   : >> { %1976 = vmatprep.mubr.bf16.mxu0 %v1855_v59 }
 0x291   : >> { %1977 = vmatmul.mubr.bf16.gmra.mrb[28].mxu0 %v1854_v60 }
 0x32c   : >> { %v1922_v33 = vpop.f32.mrb[0].mxu0 }
 0x32d   : >> { %v5162_v27 = vmul.f32 0.0625, %v1922_v33  ;;  %v1924_v28 = vpop.f32.mrb[1].mxu0 }
 0x32e   : >> { %v1925_v62 = vpop.f32.mrb[2].mxu0 }
 0x32f   : >> { %2001 = vmax.xlane.f32.xlu0 %v5162_v27  ;;  %v1927_v2 = vpop.f32.mrb[3].mxu0  ;;  %v5165_v63 = vmul.f32 0.0625, %v1925_v62 }
 0x333   : >> { %2003 = vmax.xlane.f32.xlu0 %v5165_v63 }
 0x334   : >> { %v1930_v0 = vpop.f32.mrb[4].mxu0 }
 0x335   : >> { %v5168_v48 = vmul.f32 0.0625, %v1930_v0  ;;  %v1932_v5 = vpop.f32.mrb[5].mxu0 }
 0x336   : >> { %v1933_v14 = vpop.f32.mrb[6].mxu0 }
 0x337   : >> { %2005 = vmax.xlane.f32.xlu1 %v5168_v48  ;;  %v1935_v55 = vpop.f32.mrb[7].mxu0  ;;  %v5171_v15 = vmul.f32 0.0625, %v1933_v14 }
 0x33b   : >> { %2007 = vmax.xlane.f32.xlu1 %v5171_v15 }
 0x33c   : >> { %v1938_v1 = vpop.f32.mrb[8].mxu0 }
 0x33d   : >> { %v5174_v16 = vmul.f32 0.0625, %v1938_v1  ;;  %v1940_v43 = vpop.f32.mrb[9].mxu0 }
 0x33e   : >> { %v1941_v44 = vpop.f32.mrb[10].mxu0 }
 0x33f   : >> { %v5176_v50 = vmul.f32 0.0625, %v1941_v44  ;;  %2009 = vmax.xlane.f32.xlu0 %v5174_v16  ;;  %v1943_v12 = vpop.f32.mrb[11].mxu0 }
 0x341   : >> { %2011 = vmax.xlane.f32.xlu1 %v5176_v50 }
 0x344   : >> { %v1946_v18 = vpop.f32.mrb[12].mxu0 }
 0x345   : >> { %v5180_v3 = vmul.f32 0.0625, %v1946_v18  ;;  %v1948_v4 = vpop.f32.mrb[13].mxu0 }
 0x346   : >> { %v1949_v37 = vpop.f32.mrb[14].mxu0 }
 0x347   : >> { %v5182_v57 = vmul.f32 0.0625, %v1949_v37  ;;  %2013 = vmax.xlane.f32.xlu0 %v5180_v3  ;;  %v1951_v20 = vpop.f32.mrb[15].mxu0 }
 0x349   : >> { %2015 = vmax.xlane.f32.xlu1 %v5182_v57 }
 0x34c   : >> { %v1954_v8 = vpop.f32.mrb[16].mxu0 }
 0x34d   : >> { %v5186_v21 = vmul.f32 0.0625, %v1954_v8  ;;  %v1956_v19 = vpop.f32.mrb[17].mxu0 }
 0x34e   : >> { %v1957_v22 = vpop.f32.mrb[18].mxu0  ;;  %v1878_v19 = vld [vmem:[%s5128_s27 + $0xb0] sm:$0xff] }
 0x34f   : >> { %v5188_v52 = vmul.f32 0.0625, %v1957_v22  ;;  %2017 = vmax.xlane.f32.xlu0 %v5186_v21  ;;  %v1959_v54 = vpop.f32.mrb[19].mxu0  ;;  %2160 = vmatpush1.bf16.msra.mxu1 %v1878_v19  ;;  %v1881_v22 = vld [vmem:[%s5128_s27 + $0xe8] sm:$0xff] }
 0x350   : >> { %2161 = vmatprep.subr.bf16.mxu1 %v1881_v22  ;;  %v3966_v19 = vld [vmem:[%s6107_s4] ss:$8 sps:$4 sm:$0xff]  }
 0x351   : >> { %2019 = vmax.xlane.f32.xlu1 %v5188_v52 }
 0x354   : >> { %v1962_v58 = vpop.f32.mrb[20].mxu0 }
 0x355   : >> { %v5192_v7 = vmul.f32 0.0625, %v1962_v58  ;;  %v1964_v25 = vpop.f32.mrb[21].mxu0 }
 0x356   : >> { %v1965_v26 = vpop.f32.mrb[22].mxu0  ;;  %v1880_v25 = vld [vmem:[%s5128_s27 + $0xe0] sm:$0xff] }
 0x357   : >> { %v5194_v34 = vmul.f32 0.0625, %v1965_v26  ;;  %2021 = vmax.xlane.f32.xlu0 %v5192_v7  ;;  %v1967_v35 = vpop.f32.mrb[23].mxu0  ;;  %2162 = vmatpush1.bf16.msra.mxu1 %v1880_v25 }
 0x358   : >> { %v1883_v35 = vld [vmem:[%s5128_s27 + $0x118] sm:$0xff] }
 0x359   : >> { %2023 = vmax.xlane.f32.xlu1 %v5194_v34  ;;  %2163 = vmatprep.subr.bf16.mxu1 %v1883_v35 }
 0x35c   : >> { %v1970_v24 = vpop.f32.mrb[24].mxu0 }
 0x35d   : >> { %v5198_v38 = vmul.f32 0.0625, %v1970_v24  ;;  %v1972_v39 = vpop.f32.mrb[25].mxu0 }
 0x35e   : >> { %v1973_v40 = vpop.f32.mrb[26].mxu0 }
 0x35f   : >> { %v5200_v6 = vmul.f32 0.0625, %v1973_v40  ;;  %2025 = vmax.xlane.f32.xlu0 %v5198_v38  ;;  %v1975_v42 = vpop.f32.mrb[27].mxu0 }
 0x360   : >> { %v1882_v42 = vld [vmem:[%s5128_s27 + $0x110] sm:$0xff] }
 0x361   : >> { %2027 = vmax.xlane.f32.xlu1 %v5200_v6  ;;  %2164 = vmatpush1.bf16.msra.mxu1 %v1882_v42 }
 0x364   : >> { %v1978_v9 = vpop.f32.mrb[28].mxu0 }
 0x365   : >> { %v5204_v17 = vmul.f32 0.0625, %v1978_v9  ;;  %v1980_v32 = vpop.f32.mrb[29].mxu0  ;;  %v1885_v9 = vld [vmem:[%s5128_s27 + $0x148] sm:$0xff] }
 0x366   : >> { %v1981_v23 = vpop.f32.mrb[30].mxu0  ;;  %2165 = vmatprep.subr.bf16.mxu1 %v1885_v9 }
 0x367   : >> { %v5206_v36 = vmul.f32 0.0625, %v1981_v23  ;;  %2029 = vmax.xlane.f32.xlu0 %v5204_v17  ;;  %v1983_v46 = vpop.f32.mrb[31].mxu0 }
 0x369   : >> { %2031 = vmax.xlane.f32.xlu1 %v5206_v36 }
 0x3bc   : >> { %v2002_v31 = vpop.xlane.xlu0 %2001 }
 0x3bd   : >> { %v2033_v56 = vsub.f32 %v5162_v27, %v2002_v31 }
 0x3bf   : >> { %v2049_v41 = vmul.f32 1.442695, %v2033_v56 }
 0x3c0   : >> { %v2004_v59 = vpop.xlane.xlu0 %2003 }
 0x3c1   : >> { %4042 = vpow2.f32 %v2049_v41  ;;  %v2034_v60 = vsub.f32 %v5165_v63, %v2004_v59 }
 0x3c3   : >> { %v2051_v33 = vmul.f32 1.442695, %v2034_v60 }
 0x3c4   : >> { %v2006_v28 = vpop.xlane.xlu1 %2005 }
 0x3c5   : >> { %4044 = vpow2.f32 %v2051_v33  ;;  %v2035_v62 = vsub.f32 %v5168_v48, %v2006_v28 }
 0x3c7   : >> { %v2053_v2 = vmul.f32 1.442695, %v2035_v62 }
 0x3c8   : >> { %v2008_v0 = vpop.xlane.xlu1 %2007 }
 0x3c9   : >> { %4046 = vpow2.f32 %v2053_v2  ;;  %v2036_v5 = vsub.f32 %v5171_v15, %v2008_v0 }
 0x3cb   : >> { %v5221_v14 = vpop.eup %4042  ;;  %v2055_v55 = vmul.f32 1.442695, %v2036_v5 }
 0x3cc   : >> { %v2010_v1 = vpop.xlane.xlu0 %2009  ;;  %2081 = vadd.xlane.f32.xlu0 %v5221_v14 }
 0x3cd   : >> { %4048 = vpow2.f32 %v2055_v55  ;;  %v2037_v27 = vsub.f32 %v5174_v16, %v2010_v1 }
 0x3ce   : >> { %v2012_v63 = vpop.xlane.xlu1 %2011 }
 0x3cf   : >> { %v5225_v43 = vpop.eup %4044  ;;  %v2057_v44 = vmul.f32 1.442695, %v2037_v27  ;;  %v2038_v48 = vsub.f32 %v5176_v50, %v2012_v63 }
 0x3d0   : >> { %2083 = vadd.xlane.f32.xlu1 %v5225_v43 }
 0x3d1   : >> { %4050 = vpow2.f32 %v2057_v44  ;;  %v2059_v15 = vmul.f32 1.442695, %v2038_v48 }
 0x3d3   : >> { %v5229_v12 = vpop.eup %4046  ;;  %4052 = vpow2.f32 %v2059_v15 }
 0x3d4   : >> { %v2014_v18 = vpop.xlane.xlu0 %2013  ;;  %2085 = vadd.xlane.f32.xlu0 %v5229_v12 }
 0x3d5   : >> { %v2039_v16 = vsub.f32 %v5180_v3, %v2014_v18 }
 0x3d6   : >> { %v2016_v4 = vpop.xlane.xlu1 %2015 }
 0x3d7   : >> { %v5233_v37 = vpop.eup %4048  ;;  %v2061_v20 = vmul.f32 1.442695, %v2039_v16  ;;  %v2040_v50 = vsub.f32 %v5182_v57, %v2016_v4 }
 0x3d8   : >> { %2087 = vadd.xlane.f32.xlu1 %v5233_v37 }
 0x3d9   : >> { %4054 = vpow2.f32 %v2061_v20  ;;  %v2063_v8 = vmul.f32 1.442695, %v2040_v50 }
 0x3db   : >> { %v5239_v54 = vpop.eup %4050  ;;  %4056 = vpow2.f32 %v2063_v8 }
 0x3dc   : >> { %v2018_v3 = vpop.xlane.xlu0 %2017  ;;  %2089 = vadd.xlane.f32.xlu0 %v5239_v54 }
 0x3dd   : >> { %v5242_v58 = vpop.eup %4052  ;;  %v2041_v57 = vsub.f32 %v5186_v21, %v2018_v3 }
 0x3de   : >> { %v2020_v26 = vpop.xlane.xlu1 %2019  ;;  %2091 = vadd.xlane.f32.xlu1 %v5242_v58 }
 0x3df   : >> { %v2065_v24 = vmul.f32 1.442695, %v2041_v57  ;;  %v2042_v39 = vsub.f32 %v5188_v52, %v2020_v26  ;;  %v1884_v52 = vld [vmem:[%s5128_s27 + $0x140] sm:$0xff]  ;;  %v3971_v57 = vld [vmem:[%s6107_s4 + $0x14] ss:$8 sps:$4 sm:$0xff]   ;;  %s4181_s27 = smov 127  }
 0x3e0   : >> { %2166 = vmatpush1.bf16.msra.mxu1 %v1884_v52 }
 0x3e1   : >> { %4058 = vpow2.f32 %v2065_v24  ;;  %v2067_v40 = vmul.f32 1.442695, %v2042_v39  ;;  %2167 = vmatprep.subr.bf16.mxu1 %v1887_v49 }
 0x3e3   : >> { %v5251_v32 = vpop.eup %4054  ;;  %4060 = vpow2.f32 %v2067_v40  ;;  %v3972_v40 = vld [vmem:[%s6107_s4 + $0x20] ss:$8 sps:$4 sm:$0xff]  }
 0x3e4   : >> { %v2022_v21 = vpop.xlane.xlu0 %2021  ;;  %2093 = vadd.xlane.f32.xlu0 %v5251_v32  ;;  %2168 = vmatpush1.bf16.msra.mxu1 %v1886_v11 }
 0x3e5   : >> { %v5254_v23 = vpop.eup %4056  ;;  %v2043_v46 = vsub.f32 %v5192_v7, %v2022_v21  ;;  %v4179_v7 = vmov 0   ;;  %v3977_v21 = vld [vmem:[%s6107_s4 + $0x34] ss:$8 sps:$4 sm:$0xff]  }
 0x3e6   : >> { %v2024_v47 = vpop.xlane.xlu1 %2023  ;;  %2095 = vadd.xlane.f32.xlu1 %v5254_v23  ;;  %2185 = vmatprep.mubr.bf16.mxu1 %v4179_v7 }
 0x3e7   : >> { %v2069_v13 = vmul.f32 1.442695, %v2043_v46  ;;  %v2044_v10 = vsub.f32 %v5194_v34, %v2024_v47  ;;  %2679 = vmatprep.mubr.bf16.mxu0 %v4179_v7  ;;  %3925 = vset.pattern.permute.xlu1 %v4179_v7  ;;  %v3980_v47 = vld [vmem:[%s6107_s4 + $0x44] ss:$8 sps:$4 sm:$0xff]  }
 0x3e8   : >> { %3924 = vset.pattern.permute.xlu0 %v4179_v7 }
 0x3e9   : >> { %4062 = vpow2.f32 %v2069_v13  ;;  %v2071_v45 = vmul.f32 1.442695, %v2044_v10  ;;  %v3978_v10 = vld [vmem:[%s6107_s4 + $0x40] ss:$8 sps:$4 sm:$0xff]  }
 0x3eb   : >> { %v5262_v51 = vpop.eup %4058  ;;  %4064 = vpow2.f32 %v2071_v45 }
 0x3ec   : >> { %v2026_v31 = vpop.xlane.xlu0 %2025  ;;  %2097 = vadd.xlane.f32.xlu0 %v5262_v51 }
 0x3ed   : >> { %v5266_v56 = vpop.eup %4060  ;;  %v2045_v41 = vsub.f32 %v5198_v38, %v2026_v31 }
 0x3ee   : >> { %v2028_v34 = vpop.xlane.xlu1 %2027  ;;  %2099 = vadd.xlane.f32.xlu1 %v5266_v56 }
 0x3ef   : >> { %v2073_v59 = vmul.f32 1.442695, %v2045_v41  ;;  %v2046_v60 = vsub.f32 %v5200_v6, %v2028_v34 }
 0x3f1   : >> { %4066 = vpow2.f32 %v2073_v59  ;;  %v2075_v33 = vmul.f32 1.442695, %v2046_v60  ;;  %v3986_v59 = vld [vmem:[%s6107_s4 + $0x64] ss:$8 sps:$4 sm:$0xff]  }
 0x3f3   : >> { %v5274_v28 = vpop.eup %4062  ;;  %4068 = vpow2.f32 %v2075_v33 }
 0x3f4   : >> { %2101 = vadd.xlane.f32.xlu0 %v5274_v28  ;;  %v2030_v38 = vpop.xlane.xlu0 %2029 }
 0x3f5   : >> { %v5277_v62 = vpop.eup %4064  ;;  %v2047_v2 = vsub.f32 %v5204_v17, %v2030_v38  ;;  %v3984_v38 = vld [vmem:[%s6107_s4 + $0x60] ss:$8 sps:$4 sm:$0xff]  }
 0x3f6   : >> { %2103 = vadd.xlane.f32.xlu1 %v5277_v62  ;;  %v2032_v0 = vpop.xlane.xlu1 %2031 }
 0x3f7   : >> { %v2077_v5 = vmul.f32 1.442695, %v2047_v2  ;;  %v2048_v55 = vsub.f32 %v5206_v36, %v2032_v0  ;;  %v3968_v36 = vld [vmem:[%s6107_s4 + $0x4] ss:$8 sps:$4 sm:$0xff]  }
 0x3f8   : >> { %2486 = vmatprep.subr.bf16.mxu1 %v3968_v36  ;;  %v3992_v36 = vld [vmem:[%s6107_s4 + $0x84] ss:$8 sps:$4 sm:$0xff]  }
 0x3f9   : >> { %4070 = vpow2.f32 %v2077_v5  ;;  %v2079_v6 = vmul.f32 1.442695, %v2048_v55 }
 0x3fb   : >> { %v5282_v1 = vpop.eup %4066  ;;  %4072 = vpow2.f32 %v2079_v6 }
 0x3fc   : >> { %2105 = vadd.xlane.f32.xlu0 %v5282_v1 }
 0x3fd   : >> { %v5285_v27 = vpop.eup %4068 }
 0x3fe   : >> { %2107 = vadd.xlane.f32.xlu1 %v5285_v27 }
 0x403   : >> { %v5288_v63 = vpop.eup %4070 }
 0x404   : >> { %2109 = vadd.xlane.f32.xlu0 %v5288_v63 }
 0x405   : >> { %v5291_v17 = vpop.eup %4072 }
 0x406   : >> { %2111 = vadd.xlane.f32.xlu1 %v5291_v17 }
 0x459   : >> { %v2082_v44 = vpop.xlane.xlu0 %2081 }
 0x45a   : >> { %4074 = vrcp.f32 %v2082_v44 }
 0x45d   : >> { %v2084_v48 = vpop.xlane.xlu1 %2083 }
 0x45e   : >> { %4076 = vrcp.f32 %v2084_v48 }
 0x461   : >> { %v2086_v15 = vpop.xlane.xlu0 %2085 }
 0x462   : >> { %4078 = vrcp.f32 %v2086_v15  ;;  %v3990_v15 = vld [vmem:[%s6107_s4 + $0x80] ss:$8 sps:$4 sm:$0xff]  }
 0x464   : >> { %v4075_v16 = vpop.eup %4074 }
 0x465   : >> { %v2088_v18 = vpop.xlane.xlu1 %2087  ;;  %v2129_v50 = vmul.f32 %v4075_v16, %v5221_v14  ;;  %v3969_v14 = vld [vmem:[%s6107_s4 + $0x10] ss:$8 sps:$4 sm:$0xff]  }
 0x466   : >> { %4080 = vrcp.f32 %v2088_v18 }
 0x468   : >> { %v4077_v4 = vpop.eup %4076 }
 0x469   : >> { %v2090_v20 = vpop.xlane.xlu0 %2089  ;;  %v2130_v8 = vmul.f32 %v4077_v4, %v5225_v43  ;;  %v3974_v43 = vld [vmem:[%s6107_s4 + $0x24] ss:$8 sps:$4 sm:$0xff]  }
 0x46a   : >> { %4082 = vrcp.f32 %v2090_v20 }
 0x46b   : >> { %v2092_v22 = vpop.xlane.xlu1 %2091  ;;  %v2145_v3 = vpack.c.bf16 %v2130_v8, %v2129_v50  ;;  %v3998_v8 = vld [vmem:[%s6107_s4 + $0xa4] ss:$8 sps:$4 sm:$0xff]  }
 0x46c   : >> { %4084 = vrcp.f32 %v2092_v22  ;;  %v4079_v25 = vpop.eup %4078 }
 0x46d   : >> { %2186 = vmatmul.mubr.bf16.vlgmr.msra.gmra.mrb[0].mxu1 %v2145_v3  ;;  %v2131_v24 = vmul.f32 %v4079_v25, %v5229_v12  ;;  %v3975_v12 = vld [vmem:[%s6107_s4 + $0x30] ss:$8 sps:$4 sm:$0xff]   ;;  %v3996_v3 = vld [vmem:[%s6107_s4 + $0xa0] ss:$8 sps:$4 sm:$0xff]  }
 0x46e   : >> { %2195 = vmatprep.mubr.bf16.mxu1 %v4179_v7  ;;  %2487 = vmatpush1.bf16.msra.mxu1 %v3966_v19 }
 0x46f   : >> { %2488 = vmatprep.subr.bf16.mxu1 %v3971_v57 }
 0x470   : >> { %v4081_v26 = vpop.eup %4080 }
 0x471   : >> { %v2094_v35 = vpop.xlane.xlu0 %2093  ;;  %v2132_v39 = vmul.f32 %v4081_v26, %v5233_v37 }
 0x472   : >> { %2489 = vmatpush1.bf16.msra.mxu1 %v3969_v14  ;;  %4086 = vrcp.f32 %v2094_v35  ;;  %v4004_v35 = vld [vmem:[%s6107_s4 + $0xc4] ss:$8 sps:$4 sm:$0xff]  }
 0x473   : >> { %v2096_v42 = vpop.xlane.xlu1 %2095  ;;  %v2146_v9 = vpack.c.bf16 %v2132_v39, %v2131_v24  ;;  %2490 = vmatprep.subr.bf16.mxu1 %v3974_v43  ;;  %v4002_v39 = vld [vmem:[%s6107_s4 + $0xc0] ss:$8 sps:$4 sm:$0xff]  }
 0x474   : >> { %4088 = vrcp.f32 %v2096_v42  ;;  %v4083_v46 = vpop.eup %4082  ;;  %v4007_v42 = vld [vmem:[%s6107_s4 + $0xd4] ss:$8 sps:$4 sm:$0xff]  }
 0x475   : >> { %2196 = vmatmul.mubr.bf16.gmra.mrb[4].mxu1 %v2146_v9  ;;  %v2133_v13 = vmul.f32 %v4083_v46, %v5239_v54  ;;  %v3981_v54 = vld [vmem:[%s6107_s4 + $0x50] ss:$8 sps:$4 sm:$0xff]   ;;  %v4010_v46 = vld [vmem:[%s6107_s4 + $0xe4] ss:$8 sps:$4 sm:$0xff]  }
 0x476   : >> { %v4085_v52 = vpop.eup %4084  ;;  %2205 = vmatprep.mubr.bf16.mxu1 %v4179_v7  ;;  %2491 = vmatpush1.bf16.msra.mxu1 %v3972_v40 }
 0x477   : >> { %v2134_v37 = vmul.f32 %v4085_v52, %v5242_v58  ;;  %2492 = vmatprep.subr.bf16.mxu1 %v3977_v21  ;;  %v3983_v58 = vld [vmem:[%s6107_s4 + $0x54] ss:$8 sps:$4 sm:$0xff]  }
 0x479   : >> { %v2098_v49 = vpop.xlane.xlu0 %2097  ;;  %v2147_v11 = vpack.c.bf16 %v2134_v37, %v2133_v13 }
 0x47a   : >> { %2493 = vmatpush1.bf16.msra.mxu1 %v3975_v12  ;;  %4090 = vrcp.f32 %v2098_v49  ;;  %v4008_v12 = vld [vmem:[%s6107_s4 + $0xe0] ss:$8 sps:$4 sm:$0xff]  }
 0x47b   : >> { %v2100_v45 = vpop.xlane.xlu1 %2099  ;;  %2494 = vmatprep.subr.bf16.mxu1 %v3980_v47  ;;  %v4011_v47 = vld [vmem:[%s6107_s4 + $0xf0] ss:$8 sps:$4 sm:$0xff]  }
 0x47c   : >> { %4092 = vrcp.f32 %v2100_v45  ;;  %v4087_v31 = vpop.eup %4086 }
 0x47d   : >> { %2206 = vmatmul.mubr.bf16.gmra.mrb[8].mxu1 %v2147_v11  ;;  %v2135_v33 = vmul.f32 %v4087_v31, %v5251_v32  ;;  %v3987_v32 = vld [vmem:[%s6107_s4 + $0x70] ss:$8 sps:$4 sm:$0xff]  }
 0x47e   : >> { %v4089_v41 = vpop.eup %4088  ;;  %2215 = vmatprep.mubr.bf16.mxu1 %v4179_v7  ;;  %2495 = vmatpush1.bf16.msra.mxu1 %v3978_v10 }
 0x47f   : >> { %v2136_v34 = vmul.f32 %v4089_v41, %v5254_v23  ;;  %2496 = vmatprep.subr.bf16.mxu1 %v3983_v58  ;;  %v3989_v23 = vld [vmem:[%s6107_s4 + $0x74] ss:$8 sps:$4 sm:$0xff]  }
 0x481   : >> { %v2102_v60 = vpop.xlane.xlu0 %2101  ;;  %v2148_v0 = vpack.c.bf16 %v2136_v34, %v2135_v33 }
 0x482   : >> { %2497 = vmatpush1.bf16.msra.mxu1 %v3981_v54  ;;  %4094 = vrcp.f32 %v2102_v60 }
 0x483   : >> { %v2104_v2 = vpop.xlane.xlu1 %2103  ;;  %2498 = vmatprep.subr.bf16.mxu1 %v3986_v59 }
 0x484   : >> { %4096 = vrcp.f32 %v2104_v2  ;;  %v4091_v5 = vpop.eup %4090 }
 0x485   : >> { %2216 = vmatmul.mubr.bf16.gmra.mrb[12].mxu1 %v2148_v0  ;;  %v2137_v48 = vmul.f32 %v4091_v5, %v5262_v51  ;;  %v3993_v51 = vld [vmem:[%s6107_s4 + $0x90] ss:$8 sps:$4 sm:$0xff]  }
 0x486   : >> { %v4093_v55 = vpop.eup %4092  ;;  %2225 = vmatprep.mubr.bf16.mxu1 %v4179_v7  ;;  %2499 = vmatpush1.bf16.msra.mxu1 %v3984_v38 }
 0x487   : >> { %v2138_v6 = vmul.f32 %v4093_v55, %v5266_v56  ;;  %2500 = vmatprep.subr.bf16.mxu1 %v3989_v23  ;;  %v3995_v56 = vld [vmem:[%s6107_s4 + $0x94] ss:$8 sps:$4 sm:$0xff]  }
 0x489   : >> { %v2106_v44 = vpop.xlane.xlu0 %2105  ;;  %v2149_v16 = vpack.c.bf16 %v2138_v6, %v2137_v48 }
 0x48a   : >> { %2501 = vmatpush1.bf16.msra.mxu1 %v3987_v32  ;;  %4098 = vrcp.f32 %v2106_v44 }
 0x48b   : >> { %v2108_v18 = vpop.xlane.xlu1 %2107  ;;  %2502 = vmatprep.subr.bf16.mxu1 %v3992_v36 }
 0x48c   : >> { %4100 = vrcp.f32 %v2108_v18  ;;  %v4095_v4 = vpop.eup %4094 }
 0x48d   : >> { %2226 = vmatmul.mubr.bf16.gmra.mrb[16].mxu1 %v2149_v16  ;;  %v2139_v22 = vmul.f32 %v4095_v4, %v5274_v28  ;;  %v3999_v28 = vld [vmem:[%s6107_s4 + $0xb0] ss:$8 sps:$4 sm:$0xff]  }
 0x48e   : >> { %v4097_v20 = vpop.eup %4096  ;;  %2235 = vmatprep.mubr.bf16.mxu1 %v4179_v7  ;;  %2503 = vmatpush1.bf16.msra.mxu1 %v3990_v15 }
 0x48f   : >> { %v2140_v50 = vmul.f32 %v4097_v20, %v5277_v62  ;;  %2504 = vmatprep.subr.bf16.mxu1 %v3995_v56  ;;  %v4001_v62 = vld [vmem:[%s6107_s4 + $0xb4] ss:$8 sps:$4 sm:$0xff]  }
 0x491   : >> { %v2110_v19 = vpop.xlane.xlu0 %2109  ;;  %v2150_v25 = vpack.c.bf16 %v2140_v50, %v2139_v22 }
 0x492   : >> { %2505 = vmatpush1.bf16.msra.mxu1 %v3993_v51  ;;  %4102 = vrcp.f32 %v2110_v19 }
 0x493   : >> { %v2112_v57 = vpop.xlane.xlu1 %2111  ;;  %2506 = vmatprep.subr.bf16.mxu1 %v3998_v8 }
 0x494   : >> { %4104 = vrcp.f32 %v2112_v57  ;;  %v4099_v14 = vpop.eup %4098 }
 0x495   : >> { %2236 = vmatmul.mubr.bf16.gmra.mrb[20].mxu1 %v2150_v25  ;;  %v2141_v24 = vmul.f32 %v4099_v14, %v5282_v1  ;;  %v4005_v1 = vld [vmem:[%s6107_s4 + $0xd0] ss:$8 sps:$4 sm:$0xff]  }
 0x496   : >> { %v4101_v43 = vpop.eup %4100  ;;  %2245 = vmatprep.mubr.bf16.mxu1 %v4179_v7  ;;  %2507 = vmatpush1.bf16.msra.mxu1 %v3996_v3 }
 0x497   : >> { %v2142_v26 = vmul.f32 %v4101_v43, %v5285_v27  ;;  %2508 = vmatprep.subr.bf16.mxu1 %v4001_v62 }
 0x499   : >> { %v2151_v40 = vpack.c.bf16 %v2142_v26, %v2141_v24 }
 0x49a   : >> { %2509 = vmatpush1.bf16.msra.mxu1 %v3999_v28 }
 0x49b   : >> { %2510 = vmatprep.subr.bf16.mxu1 %v4004_v35 }
 0x49c   : >> { %v4103_v9 = vpop.eup %4102 }
 0x49d   : >> { %2246 = vmatmul.mubr.bf16.gmra.mrb[24].mxu1 %v2151_v40  ;;  %v2143_v52 = vmul.f32 %v4103_v9, %v5288_v63  ;;  %v2837_v9 = vld [vmem:[%s6110_s7 + $0x8] sm:$0xff] }
 0x49e   : >> { %v4105_v27 = vpop.eup %4104  ;;  %2255 = vmatprep.mubr.bf16.mxu1 %v4179_v7  ;;  %2511 = vmatpush1.bf16.msra.mxu1 %v4002_v39 }
 0x49f   : >> { %v2144_v21 = vmul.f32 %v4105_v27, %v5291_v17  ;;  %2512 = vmatprep.subr.bf16.mxu1 %v4007_v42  ;;  %v4013_v17 = vld [vmem:[%s6107_s4 + $0xf4] ss:$8 sps:$4 sm:$0xff]   ;;  %v2314_v42 = vld [vmem:[%s6108_s5] sm:$0x3]  ;;  %2851 = vperm.xlu1 %3925, %v2837_v9  }
 0x4a0   : >> { %v5422_v27 = vrot.slane %v2314_v42, %v496_v30 }
 0x4a1   : >> { %v2152_v37 = vpack.c.bf16 %v2144_v21, %v2143_v52  ;;  %v2836_v21 = vld [vmem:[%s6110_s7] sm:$0xff]  ;;  %v5432_v52 = vrot.slane %v2314_v42, %v500_v61 }
 0x4a2   : >> { %2513 = vmatpush1.bf16.msra.mxu1 %v4005_v1  ;;  %v2840_v1 = vld [vmem:[%s6110_s7 + $0x20] sm:$0xff]  ;;  %2846 = vperm.xlu0 %3924, %v2836_v21  }
 0x4a3   : >> { %2514 = vmatprep.subr.bf16.mxu1 %v4010_v46  ;;  %2866 = vperm.xlu1 %3925, %v2840_v1  }
 0x4a5   : >> { %2256 = vmatmul.mubr.bf16.gmra.mrb[28].mxu1 %v2152_v37  ;;  %v2839_v37 = vld [vmem:[%s6110_s7 + $0x18] sm:$0xff] }
 0x4a6   : >> { %2515 = vmatpush1.bf16.msra.mxu1 %v4008_v12  ;;  %2861 = vperm.xlu0 %3924, %v2839_v37  }
 0x4a7   : >> { %2516 = vmatprep.subr.bf16.mxu1 %v4013_v17 }
 0x4aa   : >> { %2517 = vmatpush1.bf16.msra.mxu1 %v4011_v47 }
 0x540   : >> { %v2187_v63 = vpop.f32.mrb[0].mxu1 }
 0x541   : >> { %v2189_v49 = vpop.f32.mrb[1].mxu1 }
 0x542   : >> { %v2191_v13 = vpop.f32.mrb[2].mxu1 }
 0x543   : >> { %v2266_v10 = vpack.c.bf16 %v2191_v13, %v2187_v63  ;;  %v2193_v45 = vpop.f32.mrb[3].mxu1  ;;  %v2841_v13 = vld [vmem:[%s6110_s7 + $0x28] sm:$0xff] }
 0x544   : >> { %v2267_v11 = vpack.c.bf16 %v2193_v45, %v2189_v49  ;;  %2871 = vperm.xlu1 %3925, %v2841_v13  }
 0x546   : >> { %2518 = vmatprep.mubr.bf16.mxu1 %v2267_v11 }
 0x547   : >> { %2519 = vmatmul.mubr.bf16.vlgmr.msra.gmra.mrb[32].mxu1 %v2266_v10 }
 0x548   : >> { %v2197_v58 = vpop.f32.mrb[4].mxu1 }
 0x549   : >> { %v2199_v31 = vpop.f32.mrb[5].mxu1 }
 0x54a   : >> { %v2201_v41 = vpop.f32.mrb[6].mxu1 }
 0x54b   : >> { %v2268_v54 = vpack.c.bf16 %v2201_v41, %v2197_v58  ;;  %v2203_v34 = vpop.f32.mrb[7].mxu1  ;;  %v2843_v41 = vld [vmem:[%s6110_s7 + $0x38] sm:$0xff] }
 0x54c   : >> { %v2269_v59 = vpack.c.bf16 %v2203_v34, %v2199_v31  ;;  %v2838_v31 = vld [vmem:[%s6110_s7 + $0x10] sm:$0xff]  ;;  %2881 = vperm.xlu0 %3924, %v2843_v41  }
 0x54d   : >> { %2856 = vperm.xlu1 %3925, %v2838_v31  }
 0x54e   : >> { %2528 = vmatprep.mubr.bf16.mxu1 %v2269_v59 }
 0x54f   : >> { %2529 = vmatmul.mubr.bf16.gmra.mrb[36].mxu1 %v2268_v54 }
 0x550   : >> { %v2207_v60 = vpop.f32.mrb[8].mxu1 }
 0x551   : >> { %v2209_v33 = vpop.f32.mrb[9].mxu1 }
 0x552   : >> { %v2211_v38 = vpop.f32.mrb[10].mxu1 }
 0x553   : >> { %v2270_v2 = vpack.c.bf16 %v2211_v38, %v2207_v60  ;;  %v2213_v0 = vpop.f32.mrb[11].mxu1 }
 0x554   : >> { %v2271_v23 = vpack.c.bf16 %v2213_v0, %v2209_v33 }
 0x556   : >> { %2538 = vmatprep.mubr.bf16.mxu1 %v2271_v23 }
 0x557   : >> { %2539 = vmatmul.mubr.bf16.gmra.mrb[40].mxu1 %v2270_v2  ;;  %v2842_v2 = vld [vmem:[%s6110_s7 + $0x30] sm:$0xff] }
 0x558   : >> { %v2217_v5 = vpop.f32.mrb[12].mxu1  ;;  %2876 = vperm.xlu1 %3925, %v2842_v2  }
 0x559   : >> { %v2219_v55 = vpop.f32.mrb[13].mxu1 }
 0x55a   : >> { %v2221_v32 = vpop.f32.mrb[14].mxu1 }
 0x55b   : >> { %v2272_v6 = vpack.c.bf16 %v2221_v32, %v2217_v5  ;;  %v2223_v36 = vpop.f32.mrb[15].mxu1 }
 0x55c   : >> { %v2273_v44 = vpack.c.bf16 %v2223_v36, %v2219_v55 }
 0x55e   : >> { %2548 = vmatprep.mubr.bf16.mxu1 %v2273_v44 }
 0x55f   : >> { %2549 = vmatmul.mubr.bf16.gmra.mrb[44].mxu1 %v2272_v6 }
 0x560   : >> { %v2227_v48 = vpop.f32.mrb[16].mxu1 }
 0x561   : >> { %v2229_v15 = vpop.f32.mrb[17].mxu1 }
 0x562   : >> { %v2231_v18 = vpop.f32.mrb[18].mxu1 }
 0x563   : >> { %v2274_v16 = vpack.c.bf16 %v2231_v18, %v2227_v48  ;;  %v2233_v56 = vpop.f32.mrb[19].mxu1 }
 0x564   : >> { %v2275_v4 = vpack.c.bf16 %v2233_v56, %v2229_v15 }
 0x566   : >> { %2558 = vmatprep.mubr.bf16.mxu1 %v2275_v4 }
 0x567   : >> { %2559 = vmatmul.mubr.bf16.gmra.mrb[48].mxu1 %v2274_v16 }
 0x568   : >> { %v2237_v20 = vpop.f32.mrb[20].mxu1 }
 0x569   : >> { %v2239_v51 = vpop.f32.mrb[21].mxu1 }
 0x56a   : >> { %v2241_v50 = vpop.f32.mrb[22].mxu1 }
 0x56b   : >> { %v2276_v8 = vpack.c.bf16 %v2241_v50, %v2237_v20  ;;  %v2243_v19 = vpop.f32.mrb[23].mxu1 }
 0x56c   : >> { %v2277_v22 = vpack.c.bf16 %v2243_v19, %v2239_v51 }
 0x56e   : >> { %2568 = vmatprep.mubr.bf16.mxu1 %v2277_v22 }
 0x56f   : >> { %2569 = vmatmul.mubr.bf16.gmra.mrb[52].mxu1 %v2276_v8 }
 0x570   : >> { %v2247_v3 = vpop.f32.mrb[24].mxu1 }
 0x571   : >> { %v2249_v57 = vpop.f32.mrb[25].mxu1 }
 0x572   : >> { %v2251_v25 = vpop.f32.mrb[26].mxu1 }
 0x573   : >> { %v2278_v62 = vpack.c.bf16 %v2251_v25, %v2247_v3  ;;  %v2253_v14 = vpop.f32.mrb[27].mxu1 }
 0x574   : >> { %v2279_v43 = vpack.c.bf16 %v2253_v14, %v2249_v57 }
 0x576   : >> { %2578 = vmatprep.mubr.bf16.mxu1 %v2279_v43 }
 0x577   : >> { %2579 = vmatmul.mubr.bf16.gmra.mrb[56].mxu1 %v2278_v62 }
 0x578   : >> { %v2257_v28 = vpop.f32.mrb[28].mxu1 }
 0x579   : >> { %v2259_v26 = vpop.f32.mrb[29].mxu1 }
 0x57a   : >> { %v2261_v35 = vpop.f32.mrb[30].mxu1 }
 0x57b   : >> { %v2280_v24 = vpack.c.bf16 %v2261_v35, %v2257_v28  ;;  %v2263_v39 = vpop.f32.mrb[31].mxu1 }
 0x57c   : >> { %v2281_v40 = vpack.c.bf16 %v2263_v39, %v2259_v26 }
 0x57e   : >> { %2588 = vmatprep.mubr.bf16.mxu1 %v2281_v40 }
 0x57f   : >> { %2589 = vmatmul.mubr.bf16.gmra.mrb[60].mxu1 %v2280_v24 }
 0x580   : >> { %2940 = vmatprep.mubr.bf16.mxu1 %v4179_v7 }
 0x61a   : >> { %v2520_v46 = vpop.f32.mrb[32].mxu1 }
 0x61b   : >> { %v2522_v12 = vpop.f32.mrb[33].mxu1  ;;  %v2521_v47 = vadd.f32 %v2520_v46, %v5422_v27 }
 0x61c   : >> { %v2524_v17 = vpop.f32.mrb[34].mxu1  ;;  %v2523_v10 = vadd.f32 %v2522_v12, %v5432_v52 }
 0x61d   : >> { %v2525_v63 = vadd.f32 %v2524_v17, %v5422_v27  ;;  %v2526_v49 = vpop.f32.mrb[35].mxu1 }
 0x61e   : >> { %v2527_v45 = vadd.f32 %v2526_v49, %v5432_v52 }
 0x61f   : >> { %v5444_v11 = vpack.c.bf16 %v2525_v63, %v2521_v47 }
 0x620   : >> { %v5446_v58 = vpack.c.bf16 %v2527_v45, %v2523_v10 }
 0x622   : >> { %v2530_v54 = vpop.f32.mrb[36].mxu1  ;;  %2647 = vmatprep.subr.bf16.mxu0 %v5446_v58  ;;  %2908 = vmatprep.subr.bf16.mxu1 %v5446_v58 }
 0x623   : >> { %v2532_v34 = vpop.f32.mrb[37].mxu1  ;;  %2648 = vmatpush1.bf16.msra.mxu0 %v5444_v11  ;;  %2909 = vmatpush1.bf16.msra.mxu1 %v5444_v11  ;;  %v2531_v60 = vadd.f32 %v2530_v54, %v5422_v27 }
 0x624   : >> { %v2534_v59 = vpop.f32.mrb[38].mxu1  ;;  %v2533_v0 = vadd.f32 %v2532_v34, %v5432_v52 }
 0x625   : >> { %v2535_v33 = vadd.f32 %v2534_v59, %v5422_v27  ;;  %v2536_v38 = vpop.f32.mrb[39].mxu1 }
 0x626   : >> { %v2537_v23 = vadd.f32 %v2536_v38, %v5432_v52 }
 0x627   : >> { %v5465_v5 = vpack.c.bf16 %v2535_v33, %v2531_v60 }
 0x628   : >> { %v5467_v55 = vpack.c.bf16 %v2537_v23, %v2533_v0 }
 0x62a   : >> { %v2540_v32 = vpop.f32.mrb[40].mxu1  ;;  %2649 = vmatprep.subr.bf16.mxu0 %v5467_v55  ;;  %2910 = vmatprep.subr.bf16.mxu1 %v5467_v55 }
 0x62b   : >> { %v2542_v6 = vpop.f32.mrb[41].mxu1  ;;  %2650 = vmatpush1.bf16.msra.mxu0 %v5465_v5  ;;  %2911 = vmatpush1.bf16.msra.mxu1 %v5465_v5  ;;  %v2541_v44 = vadd.f32 %v2540_v32, %v5422_v27 }
 0x62c   : >> { %v2544_v36 = vpop.f32.mrb[42].mxu1  ;;  %v2543_v18 = vadd.f32 %v2542_v6, %v5432_v52 }
 0x62d   : >> { %v2545_v48 = vadd.f32 %v2544_v36, %v5422_v27  ;;  %v2546_v15 = vpop.f32.mrb[43].mxu1 }
 0x62e   : >> { %v2547_v16 = vadd.f32 %v2546_v15, %v5432_v52 }
 0x62f   : >> { %v5477_v56 = vpack.c.bf16 %v2545_v48, %v2541_v44 }
 0x630   : >> { %v5479_v4 = vpack.c.bf16 %v2547_v16, %v2543_v18  ;;  %v4014_v16 = vld [vmem:[%s6109_s6] sm:$0xff]  }
 0x632   : >> { %v2550_v20 = vpop.f32.mrb[44].mxu1  ;;  %2651 = vmatprep.subr.bf16.mxu0 %v5479_v4  ;;  %2912 = vmatprep.subr.bf16.mxu1 %v5479_v4 }
 0x633   : >> { %v2552_v51 = vpop.f32.mrb[45].mxu1  ;;  %2652 = vmatpush1.bf16.msra.mxu0 %v5477_v56  ;;  %2913 = vmatpush1.bf16.msra.mxu1 %v5477_v56  ;;  %v2551_v8 = vadd.f32 %v2550_v20, %v5422_v27  ;;  %v4022_v20 = vld [vmem:[%s6109_s6 + $0x20] sm:$0xff]  }
 0x634   : >> { %v2554_v50 = vpop.f32.mrb[46].mxu1  ;;  %v2553_v3 = vadd.f32 %v2552_v51, %v5432_v52  ;;  %v4020_v51 = vld [vmem:[%s6109_s6 + $0x50] sm:$0xff]  }
 0x635   : >> { %v2555_v19 = vadd.f32 %v2554_v50, %v5422_v27  ;;  %v2556_v22 = vpop.f32.mrb[47].mxu1  ;;  %v4021_v50 = vld [vmem:[%s6109_s6 + $0x58] sm:$0xff]  }
 0x636   : >> { %v2557_v57 = vadd.f32 %v2556_v22, %v5432_v52 }
 0x637   : >> { %v5489_v25 = vpack.c.bf16 %v2555_v19, %v2551_v8  ;;  %v5582_v8 = vpop.permute.xlu1 %2851 }
 0x638   : >> { %v5491_v62 = vpack.c.bf16 %v2557_v57, %v2553_v3 }
 0x63a   : >> { %v2560_v14 = vpop.f32.mrb[48].mxu1  ;;  %2653 = vmatprep.subr.bf16.mxu0 %v5491_v62  ;;  %2914 = vmatprep.subr.bf16.mxu1 %v5491_v62 }
 0x63b   : >> { %v2562_v43 = vpop.f32.mrb[49].mxu1  ;;  %2654 = vmatpush1.bf16.msra.mxu0 %v5489_v25  ;;  %2915 = vmatpush1.bf16.msra.mxu1 %v5489_v25  ;;  %v2561_v26 = vadd.f32 %v2560_v14, %v5422_v27 }
 0x63c   : >> { %v2564_v28 = vpop.f32.mrb[50].mxu1  ;;  %v2563_v39 = vadd.f32 %v2562_v43, %v5432_v52 }
 0x63d   : >> { %v2565_v35 = vadd.f32 %v2564_v28, %v5422_v27  ;;  %v2566_v24 = vpop.f32.mrb[51].mxu1 }
 0x63e   : >> { %v2567_v40 = vadd.f32 %v2566_v24, %v5432_v52 }
 0x63f   : >> { %v5501_v42 = vpack.c.bf16 %v2565_v35, %v2561_v26 }
 0x640   : >> { %v5503_v9 = vpack.c.bf16 %v2567_v40, %v2563_v39 }
 0x642   : >> { %v2570_v1 = vpop.f32.mrb[52].mxu1  ;;  %2655 = vmatprep.subr.bf16.mxu0 %v5503_v9  ;;  %2916 = vmatprep.subr.bf16.mxu1 %v5503_v9 }
 0x643   : >> { %v2572_v21 = vpop.f32.mrb[53].mxu1  ;;  %2656 = vmatpush1.bf16.msra.mxu0 %v5501_v42  ;;  %2917 = vmatpush1.bf16.msra.mxu1 %v5501_v42  ;;  %v2571_v12 = vadd.f32 %v2570_v1, %v5422_v27 }
 0x644   : >> { %v2574_v46 = vpop.f32.mrb[54].mxu1  ;;  %v2573_v47 = vadd.f32 %v2572_v21, %v5432_v52 }
 0x645   : >> { %v2575_v37 = vadd.f32 %v2574_v46, %v5422_v27  ;;  %v2576_v17 = vpop.f32.mrb[55].mxu1 }
 0x646   : >> { %v2577_v63 = vadd.f32 %v2576_v17, %v5432_v52 }
 0x647   : >> { %v5513_v49 = vpack.c.bf16 %v2575_v37, %v2571_v12 }
 0x648   : >> { %v2610_v13 = vpack.c.bf16 %v2577_v63, %v2573_v47 }
 0x64a   : >> { %v2580_v10 = vpop.f32.mrb[56].mxu1  ;;  %2657 = vmatprep.subr.bf16.mxu0 %v2610_v13  ;;  %2918 = vmatprep.subr.bf16.mxu1 %v2610_v13 }
 0x64b   : >> { %v2582_v45 = vpop.f32.mrb[57].mxu1  ;;  %2658 = vmatpush1.bf16.msra.mxu0 %v5513_v49  ;;  %2919 = vmatpush1.bf16.msra.mxu1 %v5513_v49  ;;  %v2581_v41 = vadd.f32 %v2580_v10, %v5422_v27 }
 0x64c   : >> { %v2584_v31 = vpop.f32.mrb[58].mxu1  ;;  %v2583_v59 = vadd.f32 %v2582_v45, %v5432_v52 }
 0x64d   : >> { %v2585_v54 = vadd.f32 %v2584_v31, %v5422_v27  ;;  %v2586_v34 = vpop.f32.mrb[59].mxu1 }
 0x64e   : >> { %v2587_v60 = vadd.f32 %v2586_v34, %v5432_v52 }
 0x64f   : >> { %v2611_v33 = vpack.c.bf16 %v2585_v54, %v2581_v41 }
 0x650   : >> { %v2612_v38 = vpack.c.bf16 %v2587_v60, %v2583_v59 }
 0x652   : >> { %v2590_v2 = vpop.f32.mrb[60].mxu1  ;;  %2659 = vmatprep.subr.bf16.mxu0 %v2612_v38  ;;  %2920 = vmatprep.subr.bf16.mxu1 %v2612_v38 }
 0x653   : >> { %v2592_v0 = vpop.f32.mrb[61].mxu1  ;;  %2660 = vmatpush1.bf16.msra.mxu0 %v2611_v33  ;;  %2921 = vmatpush1.bf16.msra.mxu1 %v2611_v33  ;;  %v2591_v32 = vadd.f32 %v2590_v2, %v5422_v27 }
 0x654   : >> { %v2594_v23 = vpop.f32.mrb[62].mxu1  ;;  %v2593_v44 = vadd.f32 %v2592_v0, %v5432_v52 }
 0x655   : >> { %v2595_v6 = vadd.f32 %v2594_v23, %v5422_v27  ;;  %v2596_v36 = vpop.f32.mrb[63].mxu1  ;;  %v4015_v27 = vld [vmem:[%s6109_s6 + $0x8] sm:$0xff]  }
 0x656   : >> { %v2597_v48 = vadd.f32 %v2596_v36, %v5432_v52  ;;  %v4023_v52 = vld [vmem:[%s6109_s6 + $0x28] sm:$0xff]  }
 0x657   : >> { %v2613_v15 = vpack.c.bf16 %v2595_v6, %v2591_v32 }
 0x658   : >> { %v2614_v18 = vpack.c.bf16 %v2597_v48, %v2593_v44 }
 0x65a   : >> { %2661 = vmatprep.subr.bf16.mxu0 %v2614_v18  ;;  %2922 = vmatprep.subr.bf16.mxu1 %v2614_v18 }
 0x65b   : >> { %2662 = vmatpush1.bf16.msra.mxu0 %v2613_v15  ;;  %2923 = vmatpush1.bf16.msra.mxu1 %v2613_v15 }
 0x65c   : >> { %2760 = vmatprep.subr.bf16.mxu0 %v5446_v58  ;;  %v4024_v58 = vld [vmem:[%s6109_s6 + $0x30] sm:$0xff]  }
 0x65e   : >> { %2680 = vmatmul.mubr.bf16.vlgmr.msra.gmra.mrb[32].mxu0 %v4014_v16  ;;  %2941 = vmatmul.mubr.bf16.vlgmr.msra.gmra.mrb[64].mxu1 %v4022_v20 }
 0x65f   : >> { %2761 = vmatpush1.bf16.msra.mxu0 %v5444_v11  ;;  %2689 = vmatprep.mubr.bf16.mxu0 %v4179_v7  ;;  %v4016_v11 = vld [vmem:[%s6109_s6 + $0x10] sm:$0xff]  }
 0x660   : >> { %2762 = vmatprep.subr.bf16.mxu0 %v5467_v55  ;;  %2950 = vmatprep.mubr.bf16.mxu1 %v4179_v7  ;;  %v4025_v55 = vld [vmem:[%s6109_s6 + $0x38] sm:$0xff]  }
 0x663   : >> { %2763 = vmatpush1.bf16.msra.mxu0 %v5465_v5  ;;  %v4017_v5 = vld [vmem:[%s6109_s6 + $0x18] sm:$0xff]  }
 0x664   : >> { %2764 = vmatprep.subr.bf16.mxu0 %v5479_v4  ;;  %v4019_v4 = vld [vmem:[%s6109_s6 + $0x48] sm:$0xff]  }
 0x666   : >> { %2690 = vmatmul.mubr.bf16.gmra.mrb[36].mxu0 %v4015_v27  ;;  %2951 = vmatmul.mubr.bf16.gmra.mrb[68].mxu1 %v4023_v52  ;;  %v4026_v27 = vld [vmem:[%s6111_s8 + $0x40] sm:$0xff]  }
 0x667   : >> { %2765 = vmatpush1.bf16.msra.mxu0 %v5477_v56  ;;  %2699 = vmatprep.mubr.bf16.mxu0 %v4179_v7  ;;  %v4018_v56 = vld [vmem:[%s6109_s6 + $0x40] sm:$0xff]  }
 0x668   : >> { %2766 = vmatprep.subr.bf16.mxu0 %v5491_v62  ;;  %2960 = vmatprep.mubr.bf16.mxu1 %v4179_v7  ;;  %v4027_v52 = vld [vmem:[%s6111_s8] sm:$0xff]  }
 0x669   : >> { %3821 = vmatprep.subr.bf16.mxu1 %v4026_v27 }
 0x66a   : >> { %3829 = vmatpush3.bf16.msra.mxu1 %v4027_v52 }
 0x66b   : >> { %2767 = vmatpush1.bf16.msra.mxu0 %v5489_v25 }
 0x66c   : >> { %2768 = vmatprep.subr.bf16.mxu0 %v5503_v9 }
 0x66e   : >> { %2700 = vmatmul.mubr.bf16.gmra.mrb[40].mxu0 %v4016_v11  ;;  %2961 = vmatmul.mubr.bf16.gmra.mrb[72].mxu1 %v4024_v58  ;;  %v4028_v11 = vld [vmem:[%s6111_s8 + $0x48] sm:$0xff]  }
 0x66f   : >> { %2769 = vmatpush1.bf16.msra.mxu0 %v5501_v42  ;;  %2709 = vmatprep.mubr.bf16.mxu0 %v4179_v7  ;;  %v4029_v58 = vld [vmem:[%s6111_s8 + $0x8] sm:$0xff]  }
 0x670   : >> { %2770 = vmatprep.subr.bf16.mxu0 %v2610_v13  ;;  %2970 = vmatprep.mubr.bf16.mxu1 %v4179_v7 }
 0x671   : >> { %3822 = vmatprep.subr.bf16.mxu1 %v4028_v11 }
 0x672   : >> { %3830 = vmatpush3.bf16.msra.mxu1 %v4029_v58 }
 0x673   : >> { %2771 = vmatpush1.bf16.msra.mxu0 %v5513_v49 }
 0x674   : >> { %2772 = vmatprep.subr.bf16.mxu0 %v2612_v38 }
 0x676   : >> { %2710 = vmatmul.mubr.bf16.gmra.mrb[44].mxu0 %v4017_v5  ;;  %2971 = vmatmul.mubr.bf16.gmra.mrb[76].mxu1 %v4025_v55  ;;  %v4030_v5 = vld [vmem:[%s6111_s8 + $0x50] sm:$0xff]  }
 0x677   : >> { %2773 = vmatpush1.bf16.msra.mxu0 %v2611_v33  ;;  %2792 = vmatprep.mubr.bf16.mxu0 %v4179_v7  ;;  %v4031_v55 = vld [vmem:[%s6111_s8 + $0x10] sm:$0xff]  }
 0x678   : >> { %2774 = vmatprep.subr.bf16.mxu0 %v2614_v18  ;;  %3823 = vmatprep.subr.bf16.mxu1 %v4030_v5 }
 0x679   : >> { %3831 = vmatpush3.bf16.msra.mxu1 %v4031_v55 }
 0x67b   : >> { %2775 = vmatpush1.bf16.msra.mxu0 %v2613_v15 }
 0x67c   : >> { %3773 = vmatprep.subr.bf16.mxu0 %v4026_v27 }
 0x67e   : >> { %2793 = vmatmul.mubr.bf16.vlgmr.msra.gmra.mrb[48].mxu0 %v4018_v56  ;;  %v4032_v56 = vld [vmem:[%s6111_s8 + $0x58] sm:$0xff]  }
 0x67f   : >> { %2802 = vmatprep.mubr.bf16.mxu0 %v4179_v7  ;;  %3774 = vmatpush3.bf16.msra.mxu0 %v4027_v52 }
 0x680   : >> { %3775 = vmatprep.subr.bf16.mxu0 %v4028_v11  ;;  %3824 = vmatprep.subr.bf16.mxu1 %v4032_v56 }
 0x683   : >> { %3776 = vmatpush3.bf16.msra.mxu0 %v4029_v58 }
 0x684   : >> { %3777 = vmatprep.subr.bf16.mxu0 %v4030_v5 }
 0x686   : >> { %2803 = vmatmul.mubr.bf16.gmra.mrb[52].mxu0 %v4019_v4  ;;  %v4033_v4 = vld [vmem:[%s6111_s8 + $0x18] sm:$0xff]  }
 0x687   : >> { %2812 = vmatprep.mubr.bf16.mxu0 %v4179_v7  ;;  %3778 = vmatpush3.bf16.msra.mxu0 %v4031_v55  ;;  %v4038_v55 = vld [vmem:[%s6111_s8 + $0x70] sm:$0xff]  }
 0x688   : >> { %3779 = vmatprep.subr.bf16.mxu0 %v4032_v56  ;;  %3832 = vmatpush3.bf16.msra.mxu1 %v4033_v4  ;;  %v4039_v56 = vld [vmem:[%s6111_s8 + $0x30] sm:$0xff]  }
 0x68b   : >> { %3780 = vmatpush3.bf16.msra.mxu0 %v4033_v4 }
 0x68e   : >> { %2813 = vmatmul.mubr.bf16.gmra.mrb[56].mxu0 %v4020_v51  ;;  %v4034_v51 = vld [vmem:[%s6111_s8 + $0x60] sm:$0xff]  }
 0x68f   : >> { %2822 = vmatprep.mubr.bf16.mxu0 %v4179_v7  ;;  %3781 = vmatprep.subr.bf16.mxu0 %v4034_v51 }
 0x690   : >> { %3825 = vmatprep.subr.bf16.mxu1 %v4034_v51 }
 0x696   : >> { %2823 = vmatmul.mubr.bf16.gmra.mrb[60].mxu0 %v4021_v50  ;;  %v4035_v50 = vld [vmem:[%s6111_s8 + $0x20] sm:$0xff]  }
 0x697   : >> { %3782 = vmatpush3.bf16.msra.mxu0 %v4035_v50  ;;  %3833 = vmatpush3.bf16.msra.mxu1 %v4035_v50 }
 0x731   : >> { %v2681_v19 = vpop.f32.mrb[32].mxu0  ;;  %v5584_v22 = vpop.f32.mrb[64].mxu1 }
 0x732   : >> { %2983 = vrot.lane.b32.xlu1 %v2681_v19, %s4180_s26  ;;  %v2683_v3 = vpop.f32.mrb[33].mxu0  ;;  %v5587_v57 = vpop.f32.mrb[65].mxu1 }
 0x733   : >> { %v2685_v25 = vpop.f32.mrb[34].mxu0  ;;  %v5589_v62 = vpop.f32.mrb[66].mxu1 }
 0x734   : >> { %v2687_v7 = vpop.f32.mrb[35].mxu0  ;;  %v2948_v14 = vpop.f32.mrb[67].mxu1 }
 0x735   : >> { %3001 = vrot.lane.b32.xlu0 %v2687_v7, %s4180_s26  ;;  %v5593_v43 = vadd.f32 %v2948_v14, %v5582_v8  ;;  %v5679_v19 = vpop.permute.xlu1 %2866  ;;  %v2847_v7 = vpop.permute.xlu0 %2846 }
 0x736   : >> { %2999 = vrot.lane.b32.xlu1 %v2683_v3, %s4180_s26  ;;  %v2943_v27 = vadd.f32 %v5584_v22, %v2847_v7  ;;  %v2945_v11 = vadd.f32 %v5587_v57, %v2847_v7 }
 0x739   : >> { %v2691_v28 = vpop.f32.mrb[36].mxu0  ;;  %v5596_v26 = vpop.f32.mrb[68].mxu1 }
 0x73a   : >> { %2985 = vrot.lane.b32.xlu1 %v2685_v25, %s4180_s26  ;;  %v2693_v35 = vpop.f32.mrb[37].mxu0  ;;  %v5599_v24 = vpop.f32.mrb[69].mxu1 }
 0x73b   : >> { %v2695_v39 = vpop.f32.mrb[38].mxu0  ;;  %v5601_v40 = vpop.f32.mrb[70].mxu1 }
 0x73c   : >> { %2989 = vrot.lane.b32.xlu0 %v2695_v39, %s4180_s26  ;;  %v2697_v42 = vpop.f32.mrb[39].mxu0  ;;  %v5604_v9 = vpop.f32.mrb[71].mxu1 }
 0x73d   : >> { %v5681_v3 = vpop.permute.xlu1 %2871 }
 0x73e   : >> { %2987 = vrot.lane.b32.xlu1 %v2691_v28, %s4180_s26  ;;  %v5687_v28 = vpop.permute.xlu0 %2861 }
 0x740   : >> { %3005 = vrot.lane.b32.xlu0 %v2697_v42, %s4180_s26 }
 0x741   : >> { %v2701_v1 = vpop.f32.mrb[40].mxu0  ;;  %v5608_v21 = vpop.f32.mrb[72].mxu1 }
 0x742   : >> { %3003 = vrot.lane.b32.xlu1 %v2693_v35, %s4180_s26  ;;  %v2703_v46 = vpop.f32.mrb[41].mxu0  ;;  %v5611_v12 = vpop.f32.mrb[73].mxu1 }
 0x743   : >> { %v2705_v37 = vpop.f32.mrb[42].mxu0  ;;  %v5613_v17 = vpop.f32.mrb[74].mxu1 }
 0x744   : >> { %v2707_v47 = vpop.f32.mrb[43].mxu0  ;;  %v5615_v63 = vpop.f32.mrb[75].mxu1 }
 0x745   : >> { %3009 = vrot.lane.b32.xlu0 %v2707_v47, %s4180_s26  ;;  %v5683_v25 = vpop.permute.xlu1 %2856  ;;  %v5689_v39 = vpop.permute.xlu0 %2881 }
 0x746   : >> { %2991 = vrot.lane.b32.xlu1 %v2701_v1, %s4180_s26  ;;  %v2953_v4 = vadd.f32 %v5596_v26, %v5683_v25 }
 0x749   : >> { %v2711_v49 = vpop.f32.mrb[44].mxu0  ;;  %v5619_v13 = vpop.f32.mrb[76].mxu1 }
 0x74a   : >> { %3007 = vrot.lane.b32.xlu1 %v2703_v46, %s4180_s26  ;;  %v2713_v10 = vpop.f32.mrb[45].mxu0  ;;  %v5622_v45 = vpop.f32.mrb[77].mxu1 }
 0x74b   : >> { %v2715_v31 = vpop.f32.mrb[46].mxu0  ;;  %v5624_v41 = vpop.f32.mrb[78].mxu1 }
 0x74c   : >> { %2997 = vrot.lane.b32.xlu0 %v2715_v31, %s4180_s26  ;;  %v2717_v54 = vpop.f32.mrb[47].mxu0  ;;  %v5627_v34 = vpop.f32.mrb[79].mxu1 }
 0x74d   : >> { %v5685_v14 = vpop.permute.xlu1 %2876 }
 0x74e   : >> { %2993 = vrot.lane.b32.xlu1 %v2705_v37, %s4180_s26 }
 0x750   : >> { %3013 = vrot.lane.b32.xlu0 %v2717_v54, %s4180_s26 }
 0x751   : >> { %v2794_v59 = vpop.f32.mrb[48].mxu0 }
 0x752   : >> { %2995 = vrot.lane.b32.xlu1 %v2711_v49, %s4180_s26  ;;  %v2796_v60 = vpop.f32.mrb[49].mxu0 }
 0x753   : >> { %v2798_v33 = vpop.f32.mrb[50].mxu0 }
 0x754   : >> { %3068 = vrot.lane.b32.xlu0 %v2798_v33, %s4181_s27  ;;  %v2800_v38 = vpop.f32.mrb[51].mxu0 }
 0x756   : >> { %3011 = vrot.lane.b32.xlu1 %v2713_v10, %s4180_s26 }
 0x758   : >> { %3084 = vrot.lane.b32.xlu0 %v2800_v38, %s4181_s27 }
 0x759   : >> { %v2804_v2 = vpop.f32.mrb[52].mxu0 }
 0x75a   : >> { %3066 = vrot.lane.b32.xlu1 %v2794_v59, %s4181_s27  ;;  %v2806_v0 = vpop.f32.mrb[53].mxu0 }
 0x75b   : >> { %v2808_v23 = vpop.f32.mrb[54].mxu0 }
 0x75c   : >> { %3072 = vrot.lane.b32.xlu0 %v2808_v23, %s4181_s27  ;;  %v2810_v32 = vpop.f32.mrb[55].mxu0 }
 0x75e   : >> { %3082 = vrot.lane.b32.xlu1 %v2796_v60, %s4181_s27 }
 0x760   : >> { %3088 = vrot.lane.b32.xlu0 %v2810_v32, %s4181_s27 }
 0x761   : >> { %v2814_v6 = vpop.f32.mrb[56].mxu0 }
 0x762   : >> { %3070 = vrot.lane.b32.xlu1 %v2804_v2, %s4181_s27  ;;  %v2816_v36 = vpop.f32.mrb[57].mxu0  ;;  %v5712_v2 = vand.u32 127, %v494_v29 }
 0x763   : >> { %v2818_v44 = vpop.f32.mrb[58].mxu0 }
 0x764   : >> { %3076 = vrot.lane.b32.xlu0 %v2818_v44, %s4181_s27  ;;  %v2820_v48 = vpop.f32.mrb[59].mxu0  ;;  %vm3015_vm2 = vcmp.lt.s32.totalorder %v5712_v2, 1  ;;  %vm2981_vm3 = vcmp.eq.s32.totalorder %v5712_v2, 0  ;;  %vm3098_vm4 = vcmp.lt.s32.totalorder %v5712_v2, 127 }
 0x766   : >> { %3086 = vrot.lane.b32.xlu1 %v2806_v0, %s4181_s27 }
 0x768   : >> { %3092 = vrot.lane.b32.xlu0 %v2820_v48, %s4181_s27  ;;  %v5729_v48 = vadd.s32 128, %v5712_v2 }
 0x769   : >> { %v2824_v15 = vpop.f32.mrb[60].mxu0 }
 0x76a   : >> { %3074 = vrot.lane.b32.xlu1 %v2814_v6, %s4181_s27  ;;  %v2826_v18 = vpop.f32.mrb[61].mxu0  ;;  %vm3065_vm5 = vcmp.eq.s32.totalorder %v5729_v48, 255 }
 0x76b   : >> { %v2828_v16 = vpop.f32.mrb[62].mxu0 }
 0x76c   : >> { %3080 = vrot.lane.b32.xlu0 %v2828_v16, %s4181_s27  ;;  %v2830_v20 = vpop.f32.mrb[63].mxu0 }
 0x76e   : >> { %3090 = vrot.lane.b32.xlu1 %v2816_v36, %s4181_s27  ;;  %v4036_v36 = vld [vmem:[%s6111_s8 + $0x68] sm:$0xff]  }
 0x76f   : >> { %3783 = vmatprep.subr.bf16.mxu0 %v4036_v36  ;;  %3826 = vmatprep.subr.bf16.mxu1 %v4036_v36 }
 0x770   : >> { %3096 = vrot.lane.b32.xlu0 %v2830_v20, %s4181_s27  ;;  %v2947_v20 = vadd.f32 %v5589_v62, %v5582_v8 }
 0x772   : >> { %3078 = vrot.lane.b32.xlu1 %v2824_v15, %s4181_s27 }
 0x776   : >> { %3094 = vrot.lane.b32.xlu1 %v2826_v18, %s4181_s27  ;;  %v4037_v18 = vld [vmem:[%s6111_s8 + $0x28] sm:$0xff]  }
 0x777   : >> { %3784 = vmatpush3.bf16.msra.mxu0 %v4037_v18  ;;  %3834 = vmatpush3.bf16.msra.mxu1 %v4037_v18 }
 0x778   : >> { %3785 = vmatprep.subr.bf16.mxu0 %v4038_v55  ;;  %3827 = vmatprep.subr.bf16.mxu1 %v4038_v55 }
 0x77b   : >> { %3786 = vmatpush3.bf16.msra.mxu0 %v4039_v56  ;;  %3835 = vmatpush3.bf16.msra.mxu1 %v4039_v56 }
 0x7a4   : >> { %v2984_v35 = vpop.permute.xlu1 %2983 }
 0x7a7   : >> { %v3002_v1 = vpop.permute.xlu0 %3001 }
 0x7a8   : >> { %v3000_v42 = vpop.permute.xlu1 %2999 }
 0x7a9   : >> { %v3024_v44 = vsel %vm3015_vm2, %v3000_v42, %v2984_v35  ;;  %v3016_v8 = vsel %vm3015_vm2, %v2984_v35, %v3000_v42 }
 0x7aa   : >> { %v3032_v58 = vsel %vm2981_vm3, 0.0, %v3024_v44 }
 0x7ab   : >> { %v3048_v50 = vadd.f32 %v3032_v58, %v2943_v27  ;;  %v2955_v27 = vadd.f32 %v5599_v24, %v5683_v25 }
 0x7ac   : >> { %v2986_v46 = vpop.permute.xlu1 %2985 }
 0x7ad   : >> { %v3025_v32 = vsel %vm3015_vm2, %v3002_v1, %v2986_v46  ;;  %v3017_v51 = vsel %vm3015_vm2, %v2986_v46, %v3002_v1 }
 0x7ae   : >> { %v5691_v37 = vpop.permute.xlu0 %2989  ;;  %v3034_v16 = vsel %vm2981_vm3, 0.0, %v3025_v32  ;;  %v4040_v32 = vld [vmem:[%s6111_s8 + $0x78] sm:$0xff]   ;;  %v3051_v36 = vadd.f32 %v3017_v51, %v5593_v43  ;;  %v2957_v43 = vadd.f32 %v5601_v40, %v5687_v28  ;;  %v2959_v40 = vadd.f32 %v5604_v9, %v5687_v28 }
 0x7af   : >> { %v3050_v62 = vadd.f32 %v3034_v16, %v2947_v20  ;;  %v4041_v20 = vld [vmem:[%s6111_s8 + $0x38] sm:$0xff]   ;;  %3787 = vmatprep.subr.bf16.mxu0 %v4040_v32  ;;  %3828 = vmatprep.subr.bf16.mxu1 %v4040_v32  ;;  %v2963_v28 = vadd.f32 %v5608_v21, %v5679_v19 }
 0x7b0   : >> { %v5693_v47 = vpop.permute.xlu1 %2987  ;;  %3788 = vmatpush3.bf16.msra.mxu0 %v4041_v20  ;;  %3836 = vmatpush3.bf16.msra.mxu1 %v4041_v20  ;;  %v2967_v20 = vadd.f32 %v5613_v17, %v5681_v3 }
 0x7b2   : >> { %v5697_v10 = vpop.permute.xlu0 %3005 }
 0x7b3   : >> { %v3027_v7 = vsel %vm3015_vm2, %v5697_v10, %v5691_v37  ;;  %v3019_v58 = vsel %vm3015_vm2, %v5691_v37, %v5697_v10 }
 0x7b4   : >> { %v5695_v49 = vpop.permute.xlu1 %3003 }
 0x7b5   : >> { %v3026_v44 = vsel %vm3015_vm2, %v5695_v49, %v5693_v47 }
 0x7b6   : >> { %v3036_v37 = vsel %vm2981_vm3, 0.0, %v3026_v44 }
 0x7b7   : >> { %v5701_v54 = vpop.permute.xlu0 %3009 }
 0x7b8   : >> { %v5699_v31 = vpop.permute.xlu1 %2991 }
 0x7bc   : >> { %v5703_v59 = vpop.permute.xlu1 %3007 }
 0x7bd   : >> { %v3028_v21 = vsel %vm3015_vm2, %v5703_v59, %v5699_v31 }
 0x7be   : >> { %v5705_v60 = vpop.permute.xlu0 %2997  ;;  %v3040_v17 = vsel %vm2981_vm3, 0.0, %v3028_v21 }
 0x7c0   : >> { %v5707_v33 = vpop.permute.xlu1 %2993 }
 0x7c2   : >> { %v5709_v38 = vpop.permute.xlu0 %3013 }
 0x7c4   : >> { %v5714_v0 = vpop.permute.xlu1 %2995 }
 0x7c6   : >> { %v3069_v23 = vpop.permute.xlu0 %3068 }
 0x7c8   : >> { %v5719_v6 = vpop.permute.xlu1 %3011 }
 0x7ca   : >> { %v3085_v15 = vpop.permute.xlu0 %3084 }
 0x7cb   : >> { %v3100_v5 = vsel %vm3098_vm4, %v3069_v23, %v3085_v15  ;;  %v3108_v22 = vsel %vm3098_vm4, %v3085_v15, %v3069_v23  ;;  %v3049_v23 = vadd.f32 %v3016_v8, %v2945_v11  ;;  %v3018_v8 = vsel %vm3015_vm2, %v5693_v47, %v5695_v49 }
 0x7cc   : >> { %v3067_v52 = vpop.permute.xlu1 %3066  ;;  %v5763_v35 = vadd.f32 %v3100_v5, %v3050_v62  ;;  %v3118_v26 = vsel %vm3065_vm5, 0.0, %v3108_v22  ;;  %v3055_v47 = vadd.f32 %v3019_v58, %v2959_v40  ;;  %v3029_v49 = vsel %vm3015_vm2, %v5701_v54, %v5707_v33 }
 0x7cd   : >> { %v5798_v5 = vadd.f32 %v3118_v26, %v3051_v36 }
 0x7ce   : >> { %v3073_v57 = vpop.permute.xlu0 %3072  ;;  %v3149_v55 = vmax.f32 %v5763_v35, 0.0 }
 0x7d0   : >> { %v3083_v42 = vpop.permute.xlu1 %3082 }
 0x7d1   : >> { %v3099_v1 = vsel %vm3098_vm4, %v3067_v52, %v3083_v42  ;;  %v3107_v46 = vsel %vm3098_vm4, %v3083_v42, %v3067_v52  ;;  %v3038_v52 = vsel %vm2981_vm3, 0.0, %v3027_v7  ;;  %v3053_v7 = vadd.f32 %v3018_v8, %v2955_v27 }
 0x7d2   : >> { %v3116_v15 = vsel %vm3065_vm5, 0.0, %v3107_v46  ;;  %v5781_v18 = vadd.f32 %v3099_v1, %v3048_v50  ;;  %v3089_v16 = vpop.permute.xlu0 %3088  ;;  %v3054_v62 = vadd.f32 %v3038_v52, %v2957_v43  ;;  %v3052_v50 = vadd.f32 %v3036_v37, %v2953_v4 }
 0x7d3   : >> { %v5792_v11 = vadd.f32 %v3116_v15, %v3049_v23  ;;  %v3102_v10 = vsel %vm3098_vm4, %v3073_v57, %v3089_v16  ;;  %v3110_v56 = vsel %vm3098_vm4, %v3089_v16, %v3073_v57  ;;  %v3150_v42 = vmax.f32 %v5798_v5, 0.0 }
 0x7d4   : >> { %v3147_v24 = vmax.f32 %v5781_v18, 0.0  ;;  %v3071_v25 = vpop.permute.xlu1 %3070  ;;  %v5826_v57 = vadd.f32 %v3102_v10, %v3054_v62  ;;  %v3122_v26 = vsel %vm3065_vm5, 0.0, %v3110_v56  ;;  %v3042_v46 = vsel %vm2981_vm3, 0.0, %v3029_v49 }
 0x7d5   : >> { %v3148_v22 = vmax.f32 %v5792_v11, 0.0  ;;  %v2965_v16 = vadd.f32 %v5611_v12, %v5679_v19  ;;  %v2969_v27 = vadd.f32 %v5615_v63, %v5681_v3  ;;  %v3020_v52 = vsel %vm3015_vm2, %v5699_v31, %v5703_v59 }
 0x7d6   : >> { %v3077_v51 = vpop.permute.xlu0 %3076  ;;  %v3926_v9 = vpack.i.bf16 %v3149_v55, %v3147_v24  ;;  %v5861_v58 = vadd.f32 %v3122_v26, %v3055_v47  ;;  %v3021_v63 = vsel %vm3015_vm2, %v5707_v33, %v5701_v54  ;;  %v3058_v19 = vadd.f32 %v3042_v46, %v2967_v20 }
 0x7d7   : >> { %v3931_v15 = vpack.i.bf16 %v3150_v42, %v3148_v22  ;;  %v3031_v31 = vsel %vm3015_vm2, %v5709_v38, %v5705_v60  ;;  %v3057_v33 = vadd.f32 %v3020_v52, %v2965_v16  ;;  %v3056_v10 = vadd.f32 %v3040_v17, %v2963_v28 }
 0x7d8   : >> { %v3087_v23 = vpop.permute.xlu1 %3086  ;;  %3927 = vrot.lane.b32.xlu1 %v3926_v9, %s4181_s27  ;;  %v3059_v62 = vadd.f32 %v3021_v63, %v2969_v27  ;;  %v3154_v56 = vmax.f32 %v5861_v58, 0.0  ;;  %v3046_v49 = vsel %vm2981_vm3, 0.0, %v3031_v31  ;;  %v2973_v20 = vadd.f32 %v5619_v13, %v5685_v14 }
 0x7d9   : >> { %v3101_v1 = vsel %vm3098_vm4, %v3071_v25, %v3087_v23  ;;  %v3109_v4 = vsel %vm3098_vm4, %v3087_v23, %v3071_v25  ;;  %v3153_v25 = vmax.f32 %v5826_v57, 0.0 }
 0x7da   : >> { %v3120_v32 = vsel %vm3065_vm5, 0.0, %v3109_v4  ;;  %v5843_v36 = vadd.f32 %v3101_v1, %v3052_v50  ;;  %v3093_v44 = vpop.permute.xlu0 %3092  ;;  %v2977_v4 = vadd.f32 %v5624_v41, %v5689_v39 }
 0x7db   : >> { %v5855_v43 = vadd.f32 %v3120_v32, %v3053_v7  ;;  %v3104_v3 = vsel %vm3098_vm4, %v3077_v51, %v3093_v44  ;;  %v3112_v8 = vsel %vm3098_vm4, %v3093_v44, %v3077_v51  ;;  %v3030_v7 = vsel %vm3015_vm2, %v5719_v6, %v5714_v0 }
 0x7dc   : >> { %v3151_v40 = vmax.f32 %v5843_v36, 0.0  ;;  %v3075_v12 = vpop.permute.xlu1 %3074  ;;  %3932 = vrot.lane.b32.xlu1 %v3931_v15, %s4181_s27  ;;  %v5886_v9 = vadd.f32 %v3104_v3, %v3058_v19  ;;  %v3126_v51 = vsel %vm3065_vm5, 0.0, %v3112_v8  ;;  %v3062_v27 = vadd.f32 %v3046_v49, %v2977_v4 }
 0x7dd   : >> { %v3152_v59 = vmax.f32 %v5855_v43, 0.0  ;;  %v5913_v32 = vadd.f32 %v3126_v51, %v3059_v62  ;;  %v3044_v52 = vsel %vm2981_vm3, 0.0, %v3030_v7  ;;  %v2975_v19 = vadd.f32 %v5622_v45, %v5685_v14 }
 0x7de   : >> { %v3081_v37 = vpop.permute.xlu0 %3080  ;;  %v3936_v54 = vpack.i.bf16 %v3153_v25, %v3151_v40  ;;  %v3157_v44 = vmax.f32 %v5886_v9, 0.0  ;;  %v3023_v3 = vsel %vm3015_vm2, %v5705_v60, %v5709_v38 }
 0x7df   : >> { %v3956_v1 = vpack.i.bf16 %v3154_v56, %v3152_v59  ;;  %v3158_v31 = vmax.f32 %v5913_v32, 0.0 }
 0x7e0   : >> { %v3091_v47 = vpop.permute.xlu1 %3090  ;;  %3937 = vrot.lane.b32.xlu1 %v3936_v54, %s4181_s27 }
 0x7e1   : >> { %v3103_v50 = vsel %vm3098_vm4, %v3075_v12, %v3091_v47  ;;  %v3111_v28 = vsel %vm3098_vm4, %v3091_v47, %v3075_v12  ;;  %v3022_v12 = vsel %vm3015_vm2, %v5714_v0, %v5719_v6  ;;  %v2979_v0 = vadd.f32 %v5627_v34, %v5689_v39 }
 0x7e2   : >> { %v3124_v23 = vsel %vm3065_vm5, 0.0, %v3111_v28  ;;  %v5903_v21 = vadd.f32 %v3103_v50, %v3056_v10  ;;  %v3097_v26 = vpop.permute.xlu0 %3096  ;;  %v3060_v6 = vadd.f32 %v3044_v52, %v2973_v20  ;;  %v3061_v54 = vadd.f32 %v3022_v12, %v2975_v19 }
 0x7e3   : >> { %v5911_v46 = vadd.f32 %v3124_v23, %v3057_v33  ;;  %v3106_v41 = vsel %vm3098_vm4, %v3081_v37, %v3097_v26  ;;  %v3114_v63 = vsel %vm3098_vm4, %v3097_v26, %v3081_v37  ;;  %v3063_v38 = vadd.f32 %v3023_v3, %v2979_v0 }
 0x7e4   : >> { %v3155_v15 = vmax.f32 %v5903_v21, 0.0  ;;  %v3079_v16 = vpop.permute.xlu1 %3078  ;;  %3957 = vrot.lane.b32.xlu1 %v3956_v1, %s4181_s27  ;;  %v5944_v8 = vadd.f32 %v3106_v41, %v3062_v27  ;;  %v3130_v45 = vsel %vm3065_vm5, 0.0, %v3114_v63 }
 0x7e5   : >> { %v3156_v17 = vmax.f32 %v5911_v46, 0.0  ;;  %v5963_v62 = vadd.f32 %v3130_v45, %v3063_v38 }
 0x7e6   : >> { %v3941_v13 = vpack.i.bf16 %v3157_v44, %v3155_v15  ;;  %v3161_v47 = vmax.f32 %v5944_v8, 0.0 }
 0x7e7   : >> { %v3946_v33 = vpack.i.bf16 %v3158_v31, %v3156_v17  ;;  %v3162_v50 = vmax.f32 %v5963_v62, 0.0 }
 0x7e8   : >> { %v3095_v37 = vpop.permute.xlu1 %3094  ;;  %3942 = vrot.lane.b32.xlu0 %v3941_v13, %s4181_s27 }
 0x7e9   : >> { %v3105_v14 = vsel %vm3098_vm4, %v3079_v16, %v3095_v37  ;;  %v3113_v60 = vsel %vm3098_vm4, %v3095_v37, %v3079_v16 }
 0x7ea   : >> { %v3128_v34 = vsel %vm3065_vm5, 0.0, %v3113_v60  ;;  %v5955_v39 = vadd.f32 %v3105_v14, %v3060_v6 }
 0x7eb   : >> { %v5961_v10 = vadd.f32 %v3128_v34, %v3061_v54 }
 0x7ec   : >> { %v3159_v49 = vmax.f32 %v5955_v39, 0.0  ;;  %3947 = vrot.lane.b32.xlu0 %v3946_v33, %s4181_s27 }
 0x7ed   : >> { %v3160_v48 = vmax.f32 %v5961_v10, 0.0 }
 0x7ee   : >> { %v3951_v51 = vpack.i.bf16 %v3161_v47, %v3159_v49 }
 0x7ef   : >> { %v3961_v28 = vpack.i.bf16 %v3162_v50, %v3160_v48 }
 0x7f0   : >> { %3952 = vrot.lane.b32.xlu0 %v3951_v51, %s4181_s27 }
 0x7f4   : >> { %3962 = vrot.lane.b32.xlu0 %v3961_v28, %s4181_s27  ;;  %s3746_s27 = sshll.u32 %s4176_s22, 5  ;;  %s1833_s22 = sadd.s32 1, %s4176_s22  }
 0x7f5   : >> { %s3462_s14 = scalar_lea.vmem %s326_s17, %s3746_s27 [#allocation3]  ;;  %p1830_p11 = scmp.ge.s32.totalorder %s1833_s22, 3  }
 0x7f6   : > { %s3772_s21 = smul.u32 (%p1830_p11), 1536, %s4256_s13  ;;  %s3486_s28 = sshll.u32 (%p1830_p11), %s326_s17, 4  ;;  %s6058_s28 = int_to_ptr.vmem [resolvable:$true] %s3486_s28 }
 0x7f7   : > { %s6116_s25 = sand.u32 (%p1830_p11), 1, %s4164_s10   ;;  %s4106_s26 = scalar_lea.vmem (%p1830_p11), %s6058_s28, 1536 }
 0x7f8   : > { %s6056_s23 = scalar_lea.hbm (%p1830_p11), %s6112_s9, %s3772_s21  ;;  %s6062_s22 = scalar_lea.sflag (%p1830_p11), [#allocation4], %s6116_s25 }
 0x7f9   : > { %p4107_p12 = scmp.ne.s32.totalorder (%p1830_p11), %s6058_s28, %s4106_s26  ;;  %s4182_s13 = smov (%p1830_p11), [#allocation3]  }
 0x7fa   : > { %s4110_s24 = sshll.u32 (%p1830_p11), %s4182_s13, 4  ;;  %s4111_s24 = int_to_ptr.vmem [resolvable:$false] %s4110_s24 }
 0x7fb   : > { %p4108_p13 = pnand (%p1830_p11), %p4107_p12, %p4273_p5  ;;  %s4112_s17 = scalar_lea.vmem (%p1830_p11), %s4111_s24, 3072 }
 0x7fc   : > { %p4113_p1 = scmp.lt.s32.totalorder (%p1830_p11), %s6058_s28, %s4111_s24  ;;  %p4114_p2 = scmp.lt.s32.totalorder (%p1830_p11), %s4112_s17, %s4106_s26 }
 0x7fd   : > { %p4109_p0 = pneg (%p1830_p11), %p4108_p13 }
 0x7fe   : > { %p4115_p3 = por (%p1830_p11), %p4114_p2, %p4113_p1 }
 0x800   : > { %p4116_p4 = pnand (%p1830_p11), %p4115_p3, %p4109_p0 }
 0x84a   : >> { %v3928_v7 = vpop.permute.xlu1 %3927 }
 0x84b   : >> { %v3930_v26 = vunpack.i.h.bf16 %v3928_v7  ;;  %v3929_v1 = vunpack.i.l.bf16 %v3928_v7 }
 0x84e   : >> { %v3933_v23 = vpop.permute.xlu1 %3932 }
 0x84f   : >> { %v3935_v4 = vunpack.i.h.bf16 %v3933_v23  ;;  %v3934_v16 = vunpack.i.l.bf16 %v3933_v23 }
 0x851   : >> { %v3195_v20 = vsel %vm3098_vm4, %v3929_v1, %v3934_v16  ;;  %v3196_v27 = vsel %vm3098_vm4, %v3930_v26, %v3935_v4  ;;  %v3203_v52 = vsel %vm3098_vm4, %v3934_v16, %v3929_v1  ;;  %v3204_v41 = vsel %vm3098_vm4, %v3935_v4, %v3930_v26 }
 0x852   : >> { %v3211_v12 = vmax.f32 %v3147_v24, %v3195_v20  ;;  %v3213_v63 = vmax.f32 %v3149_v55, %v3196_v27  ;;  %v3938_v13 = vpop.permute.xlu1 %3937  ;;  %v3212_v19 = vmax.f32 %v3148_v22, %v3203_v52  ;;  %v3214_v3 = vmax.f32 %v3150_v42, %v3204_v41 }
 0x853   : >> { %v3940_v54 = vunpack.i.h.bf16 %v3938_v13  ;;  %v3939_v45 = vunpack.i.l.bf16 %v3938_v13 }
 0x854   : >> { %v3227_v0 = vpack.c.bf16 %v3213_v63, %v3211_v12  ;;  %v3228_v6 = vpack.c.bf16 %v3214_v3, %v3212_v19 }
 0x856   : >> { %v3958_v37 = vpop.permute.xlu1 %3957  ;;  %3395 = vmatprep.mubr.bf16.mxu0 %v3228_v6 }
 0x857   : >> { %v3960_v14 = vunpack.i.h.bf16 %v3958_v37  ;;  %v3959_v60 = vunpack.i.l.bf16 %v3958_v37  ;;  %3396 = vmatmul.mubr.bf16.vlgmr.msra.gmra.mrb[64].mxu0 %v3227_v0 }
 0x859   : >> { %v3197_v35 = vsel %vm3098_vm4, %v3939_v45, %v3959_v60  ;;  %v3198_v18 = vsel %vm3098_vm4, %v3940_v54, %v3960_v14  ;;  %v3205_v11 = vsel %vm3098_vm4, %v3959_v60, %v3939_v45  ;;  %v3206_v5 = vsel %vm3098_vm4, %v3960_v14, %v3940_v54 }
 0x85a   : >> { %v3943_v55 = vpop.permute.xlu0 %3942  ;;  %v3216_v24 = vmax.f32 %v3152_v59, %v3205_v11  ;;  %v3218_v22 = vmax.f32 %v3154_v56, %v3206_v5  ;;  %v3215_v42 = vmax.f32 %v3151_v40, %v3197_v35  ;;  %v3217_v38 = vmax.f32 %v3153_v25, %v3198_v18 }
 0x85b   : >> { %v3945_v28 = vunpack.i.h.bf16 %v3943_v55  ;;  %v3944_v7 = vunpack.i.l.bf16 %v3943_v55 }
 0x85c   : >> { %v3230_v34 = vpack.c.bf16 %v3218_v22, %v3216_v24  ;;  %v3229_v33 = vpack.c.bf16 %v3217_v38, %v3215_v42 }
 0x85e   : >> { %3403 = vmatprep.mubr.bf16.mxu0 %v3230_v34  ;;  %v3948_v51 = vpop.permute.xlu0 %3947 }
 0x85f   : >> { %v3950_v23 = vunpack.i.h.bf16 %v3948_v51  ;;  %v3949_v26 = vunpack.i.l.bf16 %v3948_v51  ;;  %3404 = vmatmul.mubr.bf16.gmra.mrb[68].mxu0 %v3229_v33 }
 0x861   : >> { %v3199_v43 = vsel %vm3098_vm4, %v3944_v7, %v3949_v26  ;;  %v3200_v58 = vsel %vm3098_vm4, %v3945_v28, %v3950_v23  ;;  %v3207_v36 = vsel %vm3098_vm4, %v3949_v26, %v3944_v7  ;;  %v3208_v57 = vsel %vm3098_vm4, %v3950_v23, %v3945_v28 }
 0x862   : >> { %v3219_v25 = vmax.f32 %v3155_v15, %v3199_v43  ;;  %v3221_v40 = vmax.f32 %v3157_v44, %v3200_v58  ;;  %v3953_v59 = vpop.permute.xlu0 %3952  ;;  %v3220_v56 = vmax.f32 %v3156_v17, %v3207_v36  ;;  %v3222_v1 = vmax.f32 %v3158_v31, %v3208_v57 }
 0x863   : >> { %v3955_v27 = vunpack.i.h.bf16 %v3953_v59  ;;  %v3954_v52 = vunpack.i.l.bf16 %v3953_v59 }
 0x864   : >> { %v3231_v4 = vpack.c.bf16 %v3221_v40, %v3219_v25  ;;  %v3232_v16 = vpack.c.bf16 %v3222_v1, %v3220_v56 }
 0x866   : >> { %v3963_v20 = vpop.permute.xlu0 %3962  ;;  %3411 = vmatprep.mubr.bf16.mxu1 %v3232_v16 }
 0x867   : >> { %v3965_v41 = vunpack.i.h.bf16 %v3963_v20  ;;  %v3964_v12 = vunpack.i.l.bf16 %v3963_v20  ;;  %3412 = vmatmul.mubr.bf16.vlgmr.msra.gmra.mrb[80].mxu1 %v3231_v4 }
 0x869   : >> { %v3201_v9 = vsel %vm3098_vm4, %v3954_v52, %v3964_v12  ;;  %v3202_v21 = vsel %vm3098_vm4, %v3955_v27, %v3965_v41  ;;  %v3209_v46 = vsel %vm3098_vm4, %v3964_v12, %v3954_v52  ;;  %v3210_v32 = vsel %vm3098_vm4, %v3965_v41, %v3955_v27 }
 0x86a   : >> { %v3224_v44 = vmax.f32 %v3160_v48, %v3209_v46  ;;  %v3226_v15 = vmax.f32 %v3162_v50, %v3210_v32  ;;  %v3223_v17 = vmax.f32 %v3159_v49, %v3201_v9  ;;  %v3225_v31 = vmax.f32 %v3161_v47, %v3202_v21 }
 0x86c   : >> { %v3234_v63 = vpack.c.bf16 %v3226_v15, %v3224_v44  ;;  %v3233_v13 = vpack.c.bf16 %v3225_v31, %v3223_v17 }
 0x86e   : >> { %3419 = vmatprep.mubr.bf16.mxu1 %v3234_v63 }
 0x86f   : >> { %3420 = vmatmul.mubr.bf16.gmra.mrb[84].mxu1 %v3233_v13 }
 0x92a   : >> { %v3789_v19 = vpop.f32.mrb[64].mxu0 }
 0x92b   : >> { %v3790_v2 = vpop.f32.mrb[65].mxu0 }
 0x92c   : >> { %v3791_v3 = vadd.f32 %v3790_v2, %v3789_v19  ;;  %v3792_v0 = vpop.f32.mrb[66].mxu0 }
 0x92d   : >> { %v3793_v10 = vpop.f32.mrb[67].mxu0 }
 0x92e   : >> { %v3794_v48 = vadd.f32 %v3793_v10, %v3792_v0 }
 0x930   : >> { %v3752_v62 = vpack.c.bf16 %v3794_v48, %v3791_v3 }
 0x932   : >> { %3753 = vst [vmem:[%s3462_s14] sm:$0xff] %v3752_v62   ;;  %v3795_v39 = vpop.f32.mrb[68].mxu0 }
 0x933   : >> { %v3796_v49 = vpop.f32.mrb[69].mxu0 }
 0x934   : >> { %v3797_v50 = vadd.f32 %v3796_v49, %v3795_v39  ;;  %v3798_v8 = vpop.f32.mrb[70].mxu0 }
 0x935   : >> { %v3799_v47 = vpop.f32.mrb[71].mxu0 }
 0x936   : >> { %v3800_v6 = vadd.f32 %v3799_v47, %v3798_v8 }
 0x938   : >> { %v3757_v37 = vpack.c.bf16 %v3800_v6, %v3797_v50 }
 0x93a   : >> { %3769 = vst [vmem:[%s3462_s14 + $0x8] sm:$0xff] %v3757_v37   ;;  %v3801_v54 = vpop.f32.mrb[80].mxu1 }
 0x93b   : >> { %v3802_v45 = vpop.f32.mrb[81].mxu1 }
 0x93c   : >> { %v3803_v14 = vadd.f32 %v3802_v45, %v3801_v54  ;;  %v3804_v60 = vpop.f32.mrb[82].mxu1 }
 0x93d   : >> { %v3805_v35 = vpop.f32.mrb[83].mxu1 }
 0x93e   : >> { %v3806_v18 = vadd.f32 %v3805_v35, %v3804_v60 }
 0x940   : >> { %v3762_v11 = vpack.c.bf16 %v3806_v18, %v3803_v14 }
 0x942   : >> { %3770 = vst [vmem:[%s3462_s14 + $0x10] sm:$0xff] %v3762_v11   ;;  %v3807_v5 = vpop.f32.mrb[84].mxu1 }
 0x943   : >> { %v3808_v55 = vpop.f32.mrb[85].mxu1 }
 0x944   : >> { %v3809_v24 = vadd.f32 %v3808_v55, %v3807_v5  ;;  %v3810_v22 = vpop.f32.mrb[86].mxu1  ;;  %1832 = sbr.rel (!%p1830_p11) target bundleno = 530 (0x212), region = 100 }
 0x945   : >> { %v3811_v42 = vpop.f32.mrb[87].mxu1 }
 0x946   : >> { %v3812_v38 = vadd.f32 %v3811_v42, %v3810_v22 }
 0x948   : >> { %v3767_v34 = vpack.c.bf16 %v3812_v38, %v3809_v24 }
 0x94a   : >> { %3771 = vst [vmem:[%s3462_s14 + $0x18] sm:$0xff] %v3767_v34  }
 0x94b   : > { %4119 = shalt.err (!%p4116_p4)
}
 0x94c   : > { %s4120_s27 = scalar_lea.hbm %s6056_s23, 1536  ;;  %s4124_s29 = scalar_lea.hbm %s6112_s9, 4608 }
 0x94d   : > { %p4121_p7 = scmp.ne.s32.totalorder %s6056_s23, %s4120_s27  ;;  %p4125_p10 = scmp.lt.u32.totalorder %s6056_s23, %s6112_s9 }
 0x94e   : > { %p4126_p11 = scmp.lt.u32.totalorder %s4124_s29, %s4120_s27  ;;  %p4128_p13 = scmp.lt.u32.totalorder %s4120_s27, %s6056_s23 }
 0x94f   : > { %p4122_p8 = pnand %p4121_p7, %p4273_p5 }
 0x950   : > { %p4127_p12 = por %p4126_p11, %p4125_p10 }
 0x951   : > { %p4123_p9 = pneg %p4122_p8 }
 0x952   : > { %p4129_p0 = por %p4128_p13, %p4127_p12 }
 0x954   : > { %p4130_p1 = pnand %p4129_p0, %p4123_p9 }
 0x956   : > { %4133 = shalt.err (!%p4130_p1)
}
 0x957   : > { %s4183_s26 = smov 64   ;;  %s4184_s13 = smov 4  }
 0x958   : > { %3838 = dma.vmem_to_hbm [thread:$0]  (%p4273_p5), %s6058_s28, 1536, %s6056_s23, %s6062_s22, %s4183_s26, %s4183_s26, %s4184_s13  }
 0x959 PF: > { %p3844_p2 = scmp.ge.s32.totalorder %s4172_s12, 2  ;;  %s3501_s24 = sand.u32 1, %s4160_s30  }
 0x95a   : > { %s3502_s17 = scalar_lea.sflag [#allocation4], %s3501_s24 }
 0x95b   : > { %p3841_p3 = pnand %p3844_p2, %p4277_p6 }
 0x95d   : > { %4155 = dma.done.wait (!%p3841_p3), %s3502_s17, 1536  }
 0x95e   : > { %4157 = vsyncadd (!%p3841_p3), %s3502_s17, 4294965760  ;;  %p19_p4 = scmp.ge.s32.totalorder %s4260_s15, 5   ;;  %s6117_s30 = smov %s4164_s10 }
 0x95f   : > { %s6118_s10 = smov %s4168_s11  ;;  %s6119_s11 = smov %s4271_s18 }
 0x960   : > { %s6120_s12 = smov %s4260_s15  ;;  %21 = sbr.rel (!%p19_p4) target bundleno = 3 (0x3), region = 111 }
 0x967   :  { %3507 = vsyncpa [#allocation4], 1 }
 0x968   :  { %3509 = vsyncpa [#allocation4 + $0x1], 1 }

</bundles_post_ra>
